<compile_context>
chip_gen: v7x
topology: tpu7x:2x2x1
jax: 0.10.0
libtpu: 0.0.40
codegen_flags: <defaults>
</compile_context>

<pallas_src>
import jax
import jax.numpy as jnp
import numpy as np
from jax import lax
from jax.experimental import pallas as pl
from jax.experimental.pallas import tpu as pltpu

SEQ_LEN = 550          # hard-coded by the module: x.view(batch, 550, 2)
INPUT_SIZE = 2
HIDDEN = 64
NUM_LAYERS = 2

UNROLL = 5             # 550 % 5 == 0 -> no remainder steps in the time loops
MAX_BT = 32            # batch-tile cap: gates (bt, 512) stay <= 16 vregs and a
                       # single MXU row pass even on v5e's 128-row MXU
K0 = 8                 # layer-0 packed input width: [x_fwd(2) | x_bwd(2) | pad(4)]


# --------------------------------------------------------------------------
# Fused Pallas kernel: 2 bidirectional LSTM layers + FC head, one call.
# --------------------------------------------------------------------------
def _fused_bilstm_kernel(xp_ref, w0_ref, b0_ref, whh0_ref, w1in_ref, b1_ref,
                         whh1_ref, fcw_ref, fcb_ref, out_ref, p_ref):
    """One batch tile of the whole network (H2 = 2*hidden = 128, G = 8*hidden = 512).

    xp_ref   : (T, bt, 8)    packed raw input in loop order:
                             xp[t] = [x[t](2) | x[T-1-t](2) | zeros(4)].
    w0_ref   : (8, G)        layer-0 input weights (direction-block structured).
    b0_ref   : (1, G)        layer-0 bias (b_ih + b_hh, both directions).
    whh0_ref : (H2, G)       layer-0 recurrent weights.
    w1in_ref : (2*H2, G)     layer-1 input weights applied to [P[t] | P[T-1-t]].
    b1_ref   : (1, G)        layer-1 bias.
    whh1_ref : (H2, G)       layer-1 recurrent weights.
    fcw_ref  : (1, H2)       FC weight row ([fwd | bwd] order).
    fcb_ref  : (1, 1)        FC bias.
    out_ref  : (bt, 1)       logits.
    p_ref    : (T, bt, H2)   scratch: packed layer-0 output sequence in loop
                             order, P[t] = [h_fwd(t) | h_bwd(T-1-t)].
    """
    T, bt = xp_ref.shape[0], xp_ref.shape[1]
    H2 = whh0_ref.shape[0]

    def sigmoid(x):
        # 1 EUP (tanh) push instead of exp + reciprocal for the i/f/o gates.
        return 0.5 * jnp.tanh(0.5 * x) + 0.5

    def cell(gates, c_prev):
        # PyTorch gate order (i, f, g, o); each slice is a full 128-lane block
        # covering both directions at once.
        i = sigmoid(gates[:, 0 * H2:1 * H2])
        f = sigmoid(gates[:, 1 * H2:2 * H2])
        g = jnp.tanh(gates[:, 2 * H2:3 * H2])
        o = sigmoid(gates[:, 3 * H2:4 * H2])
        c_new = f * c_prev + i * g
        return o * jnp.tanh(c_new), c_new

    zeros = jnp.zeros((bt, H2), jnp.float32)
    b0 = b0_ref[...]                     # hoist tiny bias loads out of the loops
    b1 = b1_ref[...]

    # ------------- layer 0: fwd + bwd chains fused, h/c carried in vregs -----
    def l0_step(t, h, c):
        # K=8 input projection does not depend on h -> off the critical chain.
        xg = jnp.dot(xp_ref[t], w0_ref[...], preferred_element_type=jnp.float32)
        gates = xg + b0 + jnp.dot(h, whh0_ref[...],
                                  preferred_element_type=jnp.float32)
        h, c = cell(gates, c)
        p_ref[t] = h                      # single lane-dense (bt, 128) store
        return h, c

    def l0_body(s, carry):                # manual 5x unroll widens the LLO window
        h, c = carry
        t = s * UNROLL
        for j in range(UNROLL):
            h, c = l0_step(t + j, h, c)
        return h, c

    h, c = lax.fori_loop(0, T // UNROLL, l0_body, (zeros, zeros))
    for r in range(T - T % UNROLL, T):    # static remainder (empty: 550 % 5 == 0)
        h, c = l0_step(r, h, c)

    # ------------- layer 1: fwd + bwd chains fused, h/c carried in vregs -----
    def l1_step(t, h, c):
        # Input projection of the already-computed layer-0 sequence; one K=256
        # matmul, independent of the recurrent state, so it pipelines off the
        # serial chain -- only h @ W_hh sits on the critical path.
        pin = jnp.concatenate([p_ref[t], p_ref[T - 1 - t]], axis=-1)  # (bt, 2*H2)
        xg = jnp.dot(pin, w1in_ref[...], preferred_element_type=jnp.float32)
        gates = xg + b1 + jnp.dot(h, whh1_ref[...],
                                  preferred_element_type=jnp.float32)
        return cell(gates, c)

    def l1_body(s, carry):
        h, c = carry
        t = s * UNROLL
        for j in range(UNROLL):
            h, c = l1_step(t + j, h, c)
        return h, c

    h, c = lax.fori_loop(0, T // UNROLL, l1_body, (zeros, zeros))
    for r in range(T - T % UNROLL, T):
        h, c = l1_step(r, h, c)

    # ------------- FC head ----------------------------------------------------
    # Final packed state == [h_fwd(T-1) | h_bwd(orig time 0)]
    #                    == concat(h_n[-2], h_n[-1]).
    out_ref[...] = (jnp.sum(h * fcw_ref[...], axis=-1, keepdims=True)
                    + fcb_ref[...])


# --------------------------------------------------------------------------
# Weight packing (lane-dense combined-direction layout)
# --------------------------------------------------------------------------
def _stack_dirs(mf, mb, H=HIDDEN):
    """Interleave fwd/bwd gate blocks: (...,4H),(...,4H) -> (...,8H) ordered
    [i_f i_b | f_f f_b | g_f g_b | o_f o_b] (each sub-block H wide)."""
    lead = mf.shape[:-1]
    mf = mf.reshape(lead + (4, H))
    mb = mb.reshape(lead + (4, H))
    return jnp.stack([mf, mb], axis=-2).reshape(lead + (8 * H,))


def _pack_params(params):
    H = HIDDEN
    ZH = jnp.zeros((H, 4 * H), jnp.float32)
    Z2 = jnp.zeros((2, 4 * H), jnp.float32)
    Z4 = jnp.zeros((4, 4 * H), jnp.float32)

    wih0_f, whh0_f, b0_f = params["l0_fwd"]
    wih0_b, whh0_b, b0_b = params["l0_bwd"]
    wih1_f, whh1_f, b1_f = params["l1_fwd"]
    wih1_b, whh1_b, b1_b = params["l1_bwd"]

    pk = {}
    # Layer-0 input weights on xp[t] = [x[t] | x[T-1-t] | pad]:
    #   fwd gates <- x[t] @ wih0_f ; bwd gates <- x[T-1-t] @ wih0_b.
    pk["w0"] = _stack_dirs(jnp.concatenate([wih0_f, Z2, Z4], axis=0),
                           jnp.concatenate([Z2, wih0_b, Z4], axis=0))     # (8, 8H)
    pk["b0"] = _stack_dirs(b0_f, b0_b)                                    # (1, 8H)
    # Recurrent weights: [h_f | h_b] rows hit only their own direction's gates.
    pk["whh0"] = _stack_dirs(jnp.concatenate([whh0_f, ZH], axis=0),
                             jnp.concatenate([ZH, whh0_b], axis=0))       # (2H, 8H)
    pk["whh1"] = _stack_dirs(jnp.concatenate([whh1_f, ZH], axis=0),
                             jnp.concatenate([ZH, whh1_b], axis=0))
    # Layer-1 input weights on the loop-order packed P[t] = [h_f(t) | h_b(T-1-t)]:
    #   fwd chain (step t):  h_f(t)@wih1_f[:H]     + h_b(t)@wih1_f[H:]     + b1_f
    #   bwd chain (step t):  h_f(T-1-t)@wih1_b[:H] + h_b(T-1-t)@wih1_b[H:] + b1_b
    # regrouped into a matrix for P[t] and one for P[T-1-t], stacked along K.
    w_same = _stack_dirs(jnp.concatenate([wih1_f[:H], ZH], axis=0),
                         jnp.concatenate([ZH, wih1_b[H:]], axis=0))       # acts on P[t]
    w_flip = _stack_dirs(jnp.concatenate([ZH, wih1_f[H:]], axis=0),
                         jnp.concatenate([wih1_b[:H], ZH], axis=0))       # acts on P[T-1-t]
    pk["w1in"] = jnp.concatenate([w_same, w_flip], axis=0)                # (4H, 8H)
    pk["b1"] = _stack_dirs(b1_f, b1_b)                                    # (1, 8H)
    pk["fc_w"] = params["fc_w"].reshape(1, 2 * H)                         # (1, 2H)
    pk["fc_b"] = params["fc_b"]                                           # (1, 1)
    return pk


# --------------------------------------------------------------------------
# Batch tiling policy
# --------------------------------------------------------------------------
def _round_up(v, m):
    return -(-v // m) * m


def _is_two_core_chip():
    try:
        kind = jax.devices()[0].device_kind.lower()
    except Exception:
        return False
    return "v7" in kind


def _choose_batch_tiles(B):
    """Pick (padded batch, batch tile, #tiles).

    Fewest grid steps wins (each step replays the whole 1100-step serial
    recurrence), so bt is made as large as practical; MAX_BT caps vreg/EUP
    pressure.  On v7x (2 TensorCores/chip) the tile count is made even so the
    "parallel" grid axis keeps both cores busy.
    """
    Bp = _round_up(B, 8)
    nb = -(-Bp // MAX_BT)
    if _is_two_core_chip() and nb % 2 == 1 and Bp > 8:
        nb += 1
    bt = _round_up(-(-Bp // nb), 8)
    return bt * nb, bt, nb


# --------------------------------------------------------------------------
# Wrapper
# --------------------------------------------------------------------------
def lstm_anomaly_forward(x, params):
    """Equivalent of LSTMAnomalyDetector.forward: (B, 550, 2) -> (B, 1) logits."""
    B = x.shape[0]
    H, T = HIDDEN, SEQ_LEN
    H2, G = 2 * H, 8 * H
    x = x.reshape(B, T, INPUT_SIZE).astype(jnp.float32)

    Bp, bt, nb = _choose_batch_tiles(B)
    if Bp != B:                       # zero-pad so every tile is sublane-aligned
        x = jnp.concatenate(
            [x, jnp.zeros((Bp - B, T, INPUT_SIZE), jnp.float32)], axis=0)

    # Packed loop-order raw input: xp[t] = [x[t] | x[T-1-t] | zeros]; the bwd
    # chain's input is already time-reversed so one load per step feeds both
    # chains and no (T,B,8H) gate buffer is ever materialized.
    x_tm = jnp.transpose(x, (1, 0, 2))                                   # (T, Bp, 2)
    xp = jnp.concatenate(
        [x_tm, x_tm[::-1],
         jnp.zeros((T, Bp, K0 - 2 * INPUT_SIZE), jnp.float32)], axis=-1)  # (T, Bp, 8)

    pk = _pack_params(params)

    # TODO(synk): nn.LSTM inter-layer dropout (p=0.3) is train-mode only; this
    # is the deterministic inference forward pass (no dropout).

    # Explicit VMEM limit on every generation (v5e's 16 MiB scoped default is
    # too small).  The xp tile is lane-padded to 128 in VMEM, count it as such.
    est = 4 * (2 * T * bt * 128                 # xp tile (double-buffered, lane-padded)
               + T * bt * H2                    # P scratch
               + 2 * (4 * H2 * G + 3 * G + H2 + 1)   # weights/biases (x2 buffers)
               + 2 * bt)                        # output tile
    vmem_limit = int(min(max(int(est * 1.25), 24 << 20), 56 << 20))

    const = lambda b: (0, 0)
    out = pl.pallas_call(
        _fused_bilstm_kernel,
        out_shape=jax.ShapeDtypeStruct((Bp, 1), jnp.float32),
        grid_spec=pltpu.PrefetchScalarGridSpec(
            num_scalar_prefetch=0,
            grid=(nb,),
            in_specs=[
                pl.BlockSpec((T, bt, K0), lambda b: (0, b, 0)),   # xp
                pl.BlockSpec((K0, G), const),                     # w0
                pl.BlockSpec((1, G), const),                      # b0
                pl.BlockSpec((H2, G), const),                     # whh0
                pl.BlockSpec((2 * H2, G), const),                 # w1in
                pl.BlockSpec((1, G), const),                      # b1
                pl.BlockSpec((H2, G), const),                     # whh1
                pl.BlockSpec((1, H2), const),                     # fc_w
                pl.BlockSpec((1, 1), const),                      # fc_b
            ],
            out_specs=pl.BlockSpec((bt, 1), lambda b: (b, 0)),
            scratch_shapes=[pltpu.VMEM((T, bt, H2), jnp.float32)]),  # P
        compiler_params=pltpu.CompilerParams(
            dimension_semantics=("parallel",),
            vmem_limit_bytes=vmem_limit),
    )(xp, pk["w0"], pk["b0"], pk["whh0"], pk["w1in"], pk["b1"], pk["whh1"],
      pk["fc_w"], pk["fc_b"])
    return out[:B]


# --------------------------------------------------------------------------
# Pure-JAX reference (for correctness check)
# --------------------------------------------------------------------------
def _lstm_layer_ref(x_tm, wih, whh, b):
    H = whh.shape[0]
    B = x_tm.shape[1]

    def step(carry, xt):
        h, c = carry
        gates = xt @ wih + h @ whh + b
        i = jax.nn.sigmoid(gates[:, 0 * H:1 * H])
        f = jax.nn.sigmoid(gates[:, 1 * H:2 * H])
        g = jnp.tanh(gates[:, 2 * H:3 * H])
        o = jax.nn.sigmoid(gates[:, 3 * H:4 * H])
        c = f * c + i * g
        h = o * jnp.tanh(c)
        return (h, c), h

    init = (jnp.zeros((B, H), jnp.float32), jnp.zeros((B, H), jnp.float32))
    (h, _), hs = lax.scan(step, init, x_tm)
    return hs, h


def lstm_anomaly_forward_ref(x, params):
    B = x.shape[0]
    x = x.reshape(B, SEQ_LEN, INPUT_SIZE).astype(jnp.float32)
    layer_in = jnp.transpose(x, (1, 0, 2))
    h_last_f = h_last_b = None
    for layer in range(NUM_LAYERS):
        wih_f, whh_f, b_f = params[f"l{layer}_fwd"]
        wih_b, whh_b, b_b = params[f"l{layer}_bwd"]
        h_seq_f, h_last_f = _lstm_layer_ref(layer_in, wih_f, whh_f, b_f)
        h_seq_b_rev, h_last_b = _lstm_layer_ref(layer_in[::-1], wih_b, whh_b, b_b)
        layer_in = jnp.concatenate([h_seq_f, h_seq_b_rev[::-1]], axis=-1)
    final_hidden = jnp.concatenate([h_last_f, h_last_b], axis=-1)
    return final_hidden @ params["fc_w"] + params["fc_b"]


# --------------------------------------------------------------------------
# Deterministic parameter init (shapes match nn.LSTM / nn.Linear of the module)
# --------------------------------------------------------------------------
def init_params(key, input_size=INPUT_SIZE, hidden=HIDDEN, num_layers=NUM_LAYERS):
    H = hidden
    bound = 1.0 / np.sqrt(H)
    params = {}
    keys = iter(jax.random.split(key, num_layers * 2 * 4 + 2))

    def u(k, shape):
        return jax.random.uniform(k, shape, jnp.float32, minval=-bound, maxval=bound)

    for layer in range(num_layers):
        d_in = input_size if layer == 0 else 2 * H
        for direction in ("fwd", "bwd"):
            wih = u(next(keys), (d_in, 4 * H))     # W_ih^T
            whh = u(next(keys), (H, 4 * H))        # W_hh^T
            b_ih = u(next(keys), (1, 4 * H))
            b_hh = u(next(keys), (1, 4 * H))
            params[f"l{layer}_{direction}"] = (wih, whh, b_ih + b_hh)

    params["fc_w"] = u(next(keys), (2 * H, 1))     # Linear(128 -> 1) weight^T
    params["fc_b"] = u(next(keys), (1, 1))
    return params


# --------------------------------------------------------------------------
if __name__ == "__main__":
    key = jax.random.PRNGKey(0)
    k_param, k_x = jax.random.split(key)
    params = init_params(k_param)

    batch = 2
    x = jax.random.normal(k_x, (batch, SEQ_LEN, INPUT_SIZE), dtype=jnp.float32)

    fwd = jax.jit(lstm_anomaly_forward)
    out = jax.block_until_ready(fwd(x, params))
    ref = jax.block_until_ready(lstm_anomaly_forward_ref(x, params))

    assert out.shape == (batch, 1), out.shape
    err = float(np.max(np.abs(np.asarray(out) - np.asarray(ref))))
    assert np.allclose(np.asarray(out), np.asarray(ref), atol=1e-3, rtol=1e-3), err

    print("KERNEL_OK")
</pallas_src>

<mosaic_0001>
module attributes {stable_mosaic.version = 11 : i64} {
  func.func @_fused_bilstm_kernel(%arg0: i32, %arg1: memref<550x8x8xf32, #tpu.memory_space<vmem>>, %arg2: memref<8x512xf32, #tpu.memory_space<vmem>>, %arg3: memref<1x512xf32, #tpu.memory_space<vmem>>, %arg4: memref<128x512xf32, #tpu.memory_space<vmem>>, %arg5: memref<256x512xf32, #tpu.memory_space<vmem>>, %arg6: memref<1x512xf32, #tpu.memory_space<vmem>>, %arg7: memref<128x512xf32, #tpu.memory_space<vmem>>, %arg8: memref<1x128xf32, #tpu.memory_space<vmem>>, %arg9: memref<1x1xf32, #tpu.memory_space<vmem>>, %arg10: memref<8x1xf32, #tpu.memory_space<vmem>>, %arg11: memref<550x8x128xf32, #tpu.memory_space<vmem>>) attributes {dimension_semantics = [#tpu.dimension_semantics<parallel>], iteration_bounds = array<i64: 1>, scalar_prefetch = 0 : i64, scratch_operands = 1 : i64, tpu.core_type = #tpu.core_type<tc>, window_params = [{transform_indices = @transform_0, window_bounds = array<i64: 550, 8, 8>}, {pipeline_mode = #tpu.pipeline_mode<synchronous>, transform_indices = @transform_1, window_bounds = array<i64: 8, 512>}, {pipeline_mode = #tpu.pipeline_mode<synchronous>, transform_indices = @transform_2, window_bounds = array<i64: 1, 512>}, {pipeline_mode = #tpu.pipeline_mode<synchronous>, transform_indices = @transform_3, window_bounds = array<i64: 128, 512>}, {pipeline_mode = #tpu.pipeline_mode<synchronous>, transform_indices = @transform_4, window_bounds = array<i64: 256, 512>}, {pipeline_mode = #tpu.pipeline_mode<synchronous>, transform_indices = @transform_5, window_bounds = array<i64: 1, 512>}, {pipeline_mode = #tpu.pipeline_mode<synchronous>, transform_indices = @transform_6, window_bounds = array<i64: 128, 512>}, {pipeline_mode = #tpu.pipeline_mode<synchronous>, transform_indices = @transform_7, window_bounds = array<i64: 1, 128>}, {pipeline_mode = #tpu.pipeline_mode<synchronous>, transform_indices = @transform_8, window_bounds = array<i64: 1, 1>}, {transform_indices = @transform_9, window_bounds = array<i64: 8, 1>}]} {
    %cst = arith.constant 0.000000e+00 : f32
    %0 = vector.broadcast %cst : f32 to vector<8x128xf32>
    %c0 = arith.constant 0 : index
    %c0_0 = arith.constant 0 : index
    %1 = vector.load %arg3[%c0, %c0_0] : memref<1x512xf32, #tpu.memory_space<vmem>>, vector<1x512xf32>
    %c0_1 = arith.constant 0 : index
    %c0_2 = arith.constant 0 : index
    %2 = vector.load %arg6[%c0_1, %c0_2] : memref<1x512xf32, #tpu.memory_space<vmem>>, vector<1x512xf32>
    %c0_i32 = arith.constant 0 : i32
    %c110_i32 = arith.constant 110 : i32
    %3 = arith.addi %c0_i32, %c110_i32 : i32
    %c1_i32 = arith.constant 1 : i32
    %4:2 = scf.for %arg12 = %c0_i32 to %3 step %c1_i32 iter_args(%arg13 = %0, %arg14 = %0) -> (vector<8x128xf32>, vector<8x128xf32>)  : i32 {
      %c5_i32 = arith.constant 5 : i32
      %16 = arith.muli %arg12, %c5_i32 : i32
      %c0_i32_15 = arith.constant 0 : i32
      %17 = arith.addi %16, %c0_i32_15 : i32
      %18 = arith.index_cast %17 : i32 to index
      %c0_16 = arith.constant 0 : index
      %c0_17 = arith.constant 0 : index
      %19 = vector.load %arg1[%18, %c0_16, %c0_17] : memref<550x8x8xf32, #tpu.memory_space<vmem>>, vector<1x8x8xf32>
      %20 = vector.shape_cast %19 : vector<1x8x8xf32> to vector<8x8xf32>
      %c0_18 = arith.constant 0 : index
      %c0_19 = arith.constant 0 : index
      %21 = vector.load %arg2[%c0_18, %c0_19] : memref<8x512xf32, #tpu.memory_space<vmem>>, vector<8x512xf32>
      %cst_20 = arith.constant dense<0.000000e+00> : vector<8x512xf32>
      %22 = tpu.matmul %20, %21, %cst_20 {dimension_numbers = #tpu.dot_dimension_numbers<[1], [0], [0], [1], [0, 0, 1, 1], [], []>} : vector<8x8xf32>, vector<8x512xf32>, vector<8x512xf32> -> vector<8x512xf32>
      %23 = vector.broadcast %1 : vector<1x512xf32> to vector<8x512xf32>
      %24 = arith.addf %22, %23 : vector<8x512xf32>
      %c0_21 = arith.constant 0 : index
      %c0_22 = arith.constant 0 : index
      %25 = vector.load %arg4[%c0_21, %c0_22] : memref<128x512xf32, #tpu.memory_space<vmem>>, vector<128x512xf32>
      %cst_23 = arith.constant dense<0.000000e+00> : vector<8x512xf32>
      %26 = tpu.matmul %arg13, %25, %cst_23 {dimension_numbers = #tpu.dot_dimension_numbers<[1], [0], [0], [1], [0, 0, 1, 1], [], []>} : vector<8x128xf32>, vector<128x512xf32>, vector<8x512xf32> -> vector<8x512xf32>
      %27 = arith.addf %24, %26 : vector<8x512xf32>
      %28 = vector.extract_strided_slice %27 {offsets = [0, 0], sizes = [8, 128], strides = [1, 1]} : vector<8x512xf32> to vector<8x128xf32>
      %cst_24 = arith.constant 5.000000e-01 : f32
      %29 = vector.broadcast %cst_24 : f32 to vector<8x128xf32>
      %30 = arith.mulf %29, %28 : vector<8x128xf32>
      %31 = math.tanh %30 : vector<8x128xf32>
      %cst_25 = arith.constant 5.000000e-01 : f32
      %32 = vector.broadcast %cst_25 : f32 to vector<8x128xf32>
      %33 = arith.mulf %32, %31 : vector<8x128xf32>
      %cst_26 = arith.constant 5.000000e-01 : f32
      %34 = vector.broadcast %cst_26 : f32 to vector<8x128xf32>
      %35 = arith.addf %33, %34 : vector<8x128xf32>
      %36 = vector.extract_strided_slice %27 {offsets = [0, 128], sizes = [8, 128], strides = [1, 1]} : vector<8x512xf32> to vector<8x128xf32>
      %cst_27 = arith.constant 5.000000e-01 : f32
      %37 = vector.broadcast %cst_27 : f32 to vector<8x128xf32>
      %38 = arith.mulf %37, %36 : vector<8x128xf32>
      %39 = math.tanh %38 : vector<8x128xf32>
      %cst_28 = arith.constant 5.000000e-01 : f32
      %40 = vector.broadcast %cst_28 : f32 to vector<8x128xf32>
      %41 = arith.mulf %40, %39 : vector<8x128xf32>
      %cst_29 = arith.constant 5.000000e-01 : f32
      %42 = vector.broadcast %cst_29 : f32 to vector<8x128xf32>
      %43 = arith.addf %41, %42 : vector<8x128xf32>
      %44 = vector.extract_strided_slice %27 {offsets = [0, 256], sizes = [8, 128], strides = [1, 1]} : vector<8x512xf32> to vector<8x128xf32>
      %45 = math.tanh %44 : vector<8x128xf32>
      %46 = vector.extract_strided_slice %27 {offsets = [0, 384], sizes = [8, 128], strides = [1, 1]} : vector<8x512xf32> to vector<8x128xf32>
      %cst_30 = arith.constant 5.000000e-01 : f32
      %47 = vector.broadcast %cst_30 : f32 to vector<8x128xf32>
      %48 = arith.mulf %47, %46 : vector<8x128xf32>
      %49 = math.tanh %48 : vector<8x128xf32>
      %cst_31 = arith.constant 5.000000e-01 : f32
      %50 = vector.broadcast %cst_31 : f32 to vector<8x128xf32>
      %51 = arith.mulf %50, %49 : vector<8x128xf32>
      %cst_32 = arith.constant 5.000000e-01 : f32
      %52 = vector.broadcast %cst_32 : f32 to vector<8x128xf32>
      %53 = arith.addf %51, %52 : vector<8x128xf32>
      %54 = arith.mulf %43, %arg14 : vector<8x128xf32>
      %55 = arith.mulf %35, %45 : vector<8x128xf32>
      %56 = arith.addf %54, %55 : vector<8x128xf32>
      %57 = math.tanh %56 : vector<8x128xf32>
      %58 = arith.mulf %53, %57 : vector<8x128xf32>
      %59 = arith.index_cast %17 : i32 to index
      %c0_33 = arith.constant 0 : index
      %c0_34 = arith.constant 0 : index
      %60 = vector.load %arg11[%59, %c0_33, %c0_34] : memref<550x8x128xf32, #tpu.memory_space<vmem>>, vector<1x8x128xf32>
      %61 = vector.shape_cast %60 : vector<1x8x128xf32> to vector<8x128xf32>
      %62 = vector.shape_cast %58 : vector<8x128xf32> to vector<1x8x128xf32>
      tpu.vector_store %arg11[%59, %c0_33, %c0_34], %62 {strides = array<i32>} : memref<550x8x128xf32, #tpu.memory_space<vmem>>, vector<1x8x128xf32>,
      %c1_i32_35 = arith.constant 1 : i32
      %63 = arith.addi %16, %c1_i32_35 : i32
      %64 = arith.index_cast %63 : i32 to index
      %c0_36 = arith.constant 0 : index
      %c0_37 = arith.constant 0 : index
      %65 = vector.load %arg1[%64, %c0_36, %c0_37] : memref<550x8x8xf32, #tpu.memory_space<vmem>>, vector<1x8x8xf32>
      %66 = vector.shape_cast %65 : vector<1x8x8xf32> to vector<8x8xf32>
      %c0_38 = arith.constant 0 : index
      %c0_39 = arith.constant 0 : index
      %67 = vector.load %arg2[%c0_38, %c0_39] : memref<8x512xf32, #tpu.memory_space<vmem>>, vector<8x512xf32>
      %cst_40 = arith.constant dense<0.000000e+00> : vector<8x512xf32>
      %68 = tpu.matmul %66, %67, %cst_40 {dimension_numbers = #tpu.dot_dimension_numbers<[1], [0], [0], [1], [0, 0, 1, 1], [], []>} : vector<8x8xf32>, vector<8x512xf32>, vector<8x512xf32> -> vector<8x512xf32>
      %69 = vector.broadcast %1 : vector<1x512xf32> to vector<8x512xf32>
      %70 = arith.addf %68, %69 : vector<8x512xf32>
      %c0_41 = arith.constant 0 : index
      %c0_42 = arith.constant 0 : index
      %71 = vector.load %arg4[%c0_41, %c0_42] : memref<128x512xf32, #tpu.memory_space<vmem>>, vector<128x512xf32>
      %cst_43 = arith.constant dense<0.000000e+00> : vector<8x512xf32>
      %72 = tpu.matmul %58, %71, %cst_43 {dimension_numbers = #tpu.dot_dimension_numbers<[1], [0], [0], [1], [0, 0, 1, 1], [], []>} : vector<8x128xf32>, vector<128x512xf32>, vector<8x512xf32> -> vector<8x512xf32>
      %73 = arith.addf %70, %72 : vector<8x512xf32>
      %74 = vector.extract_strided_slice %73 {offsets = [0, 0], sizes = [8, 128], strides = [1, 1]} : vector<8x512xf32> to vector<8x128xf32>
      %cst_44 = arith.constant 5.000000e-01 : f32
      %75 = vector.broadcast %cst_44 : f32 to vector<8x128xf32>
      %76 = arith.mulf %75, %74 : vector<8x128xf32>
      %77 = math.tanh %76 : vector<8x128xf32>
      %cst_45 = arith.constant 5.000000e-01 : f32
      %78 = vector.broadcast %cst_45 : f32 to vector<8x128xf32>
      %79 = arith.mulf %78, %77 : vector<8x128xf32>
      %cst_46 = arith.constant 5.000000e-01 : f32
      %80 = vector.broadcast %cst_46 : f32 to vector<8x128xf32>
      %81 = arith.addf %79, %80 : vector<8x128xf32>
      %82 = vector.extract_strided_slice %73 {offsets = [0, 128], sizes = [8, 128], strides = [1, 1]} : vector<8x512xf32> to vector<8x128xf32>
      %cst_47 = arith.constant 5.000000e-01 : f32
      %83 = vector.broadcast %cst_47 : f32 to vector<8x128xf32>
      %84 = arith.mulf %83, %82 : vector<8x128xf32>
      %85 = math.tanh %84 : vector<8x128xf32>
      %cst_48 = arith.constant 5.000000e-01 : f32
      %86 = vector.broadcast %cst_48 : f32 to vector<8x128xf32>
      %87 = arith.mulf %86, %85 : vector<8x128xf32>
      %cst_49 = arith.constant 5.000000e-01 : f32
      %88 = vector.broadcast %cst_49 : f32 to vector<8x128xf32>
      %89 = arith.addf %87, %88 : vector<8x128xf32>
      %90 = vector.extract_strided_slice %73 {offsets = [0, 256], sizes = [8, 128], strides = [1, 1]} : vector<8x512xf32> to vector<8x128xf32>
      %91 = math.tanh %90 : vector<8x128xf32>
      %92 = vector.extract_strided_slice %73 {offsets = [0, 384], sizes = [8, 128], strides = [1, 1]} : vector<8x512xf32> to vector<8x128xf32>
      %cst_50 = arith.constant 5.000000e-01 : f32
      %93 = vector.broadcast %cst_50 : f32 to vector<8x128xf32>
      %94 = arith.mulf %93, %92 : vector<8x128xf32>
      %95 = math.tanh %94 : vector<8x128xf32>
      %cst_51 = arith.constant 5.000000e-01 : f32
      %96 = vector.broadcast %cst_51 : f32 to vector<8x128xf32>
      %97 = arith.mulf %96, %95 : vector<8x128xf32>
      %cst_52 = arith.constant 5.000000e-01 : f32
      %98 = vector.broadcast %cst_52 : f32 to vector<8x128xf32>
      %99 = arith.addf %97, %98 : vector<8x128xf32>
      %100 = arith.mulf %89, %56 : vector<8x128xf32>
      %101 = arith.mulf %81, %91 : vector<8x128xf32>
      %102 = arith.addf %100, %101 : vector<8x128xf32>
      %103 = math.tanh %102 : vector<8x128xf32>
      %104 = arith.mulf %99, %103 : vector<8x128xf32>
      %105 = arith.index_cast %63 : i32 to index
      %c0_53 = arith.constant 0 : index
      %c0_54 = arith.constant 0 : index
      %106 = vector.load %arg11[%105, %c0_53, %c0_54] : memref<550x8x128xf32, #tpu.memory_space<vmem>>, vector<1x8x128xf32>
      %107 = vector.shape_cast %106 : vector<1x8x128xf32> to vector<8x128xf32>
      %108 = vector.shape_cast %104 : vector<8x128xf32> to vector<1x8x128xf32>
      tpu.vector_store %arg11[%105, %c0_53, %c0_54], %108 {strides = array<i32>} : memref<550x8x128xf32, #tpu.memory_space<vmem>>, vector<1x8x128xf32>,
      %c2_i32 = arith.constant 2 : i32
      %109 = arith.addi %16, %c2_i32 : i32
      %110 = arith.index_cast %109 : i32 to index
      %c0_55 = arith.constant 0 : index
      %c0_56 = arith.constant 0 : index
      %111 = vector.load %arg1[%110, %c0_55, %c0_56] : memref<550x8x8xf32, #tpu.memory_space<vmem>>, vector<1x8x8xf32>
      %112 = vector.shape_cast %111 : vector<1x8x8xf32> to vector<8x8xf32>
      %c0_57 = arith.constant 0 : index
      %c0_58 = arith.constant 0 : index
      %113 = vector.load %arg2[%c0_57, %c0_58] : memref<8x512xf32, #tpu.memory_space<vmem>>, vector<8x512xf32>
      %cst_59 = arith.constant dense<0.000000e+00> : vector<8x512xf32>
      %114 = tpu.matmul %112, %113, %cst_59 {dimension_numbers = #tpu.dot_dimension_numbers<[1], [0], [0], [1], [0, 0, 1, 1], [], []>} : vector<8x8xf32>, vector<8x512xf32>, vector<8x512xf32> -> vector<8x512xf32>
      %115 = vector.broadcast %1 : vector<1x512xf32> to vector<8x512xf32>
      %116 = arith.addf %114, %115 : vector<8x512xf32>
      %c0_60 = arith.constant 0 : index
      %c0_61 = arith.constant 0 : index
      %117 = vector.load %arg4[%c0_60, %c0_61] : memref<128x512xf32, #tpu.memory_space<vmem>>, vector<128x512xf32>
      %cst_62 = arith.constant dense<0.000000e+00> : vector<8x512xf32>
      %118 = tpu.matmul %104, %117, %cst_62 {dimension_numbers = #tpu.dot_dimension_numbers<[1], [0], [0], [1], [0, 0, 1, 1], [], []>} : vector<8x128xf32>, vector<128x512xf32>, vector<8x512xf32> -> vector<8x512xf32>
      %119 = arith.addf %116, %118 : vector<8x512xf32>
      %120 = vector.extract_strided_slice %119 {offsets = [0, 0], sizes = [8, 128], strides = [1, 1]} : vector<8x512xf32> to vector<8x128xf32>
      %cst_63 = arith.constant 5.000000e-01 : f32
      %121 = vector.broadcast %cst_63 : f32 to vector<8x128xf32>
      %122 = arith.mulf %121, %120 : vector<8x128xf32>
      %123 = math.tanh %122 : vector<8x128xf32>
      %cst_64 = arith.constant 5.000000e-01 : f32
      %124 = vector.broadcast %cst_64 : f32 to vector<8x128xf32>
      %125 = arith.mulf %124, %123 : vector<8x128xf32>
      %cst_65 = arith.constant 5.000000e-01 : f32
      %126 = vector.broadcast %cst_65 : f32 to vector<8x128xf32>
      %127 = arith.addf %125, %126 : vector<8x128xf32>
      %128 = vector.extract_strided_slice %119 {offsets = [0, 128], sizes = [8, 128], strides = [1, 1]} : vector<8x512xf32> to vector<8x128xf32>
      %cst_66 = arith.constant 5.000000e-01 : f32
      %129 = vector.broadcast %cst_66 : f32 to vector<8x128xf32>
      %130 = arith.mulf %129, %128 : vector<8x128xf32>
      %131 = math.tanh %130 : vector<8x128xf32>
      %cst_67 = arith.constant 5.000000e-01 : f32
      %132 = vector.broadcast %cst_67 : f32 to vector<8x128xf32>
      %133 = arith.mulf %132, %131 : vector<8x128xf32>
      %cst_68 = arith.constant 5.000000e-01 : f32
      %134 = vector.broadcast %cst_68 : f32 to vector<8x128xf32>
      %135 = arith.addf %133, %134 : vector<8x128xf32>
      %136 = vector.extract_strided_slice %119 {offsets = [0, 256], sizes = [8, 128], strides = [1, 1]} : vector<8x512xf32> to vector<8x128xf32>
      %137 = math.tanh %136 : vector<8x128xf32>
      %138 = vector.extract_strided_slice %119 {offsets = [0, 384], sizes = [8, 128], strides = [1, 1]} : vector<8x512xf32> to vector<8x128xf32>
      %cst_69 = arith.constant 5.000000e-01 : f32
      %139 = vector.broadcast %cst_69 : f32 to vector<8x128xf32>
      %140 = arith.mulf %139, %138 : vector<8x128xf32>
      %141 = math.tanh %140 : vector<8x128xf32>
      %cst_70 = arith.constant 5.000000e-01 : f32
      %142 = vector.broadcast %cst_70 : f32 to vector<8x128xf32>
      %143 = arith.mulf %142, %141 : vector<8x128xf32>
      %cst_71 = arith.constant 5.000000e-01 : f32
      %144 = vector.broadcast %cst_71 : f32 to vector<8x128xf32>
      %145 = arith.addf %143, %144 : vector<8x128xf32>
      %146 = arith.mulf %135, %102 : vector<8x128xf32>
      %147 = arith.mulf %127, %137 : vector<8x128xf32>
      %148 = arith.addf %146, %147 : vector<8x128xf32>
      %149 = math.tanh %148 : vector<8x128xf32>
      %150 = arith.mulf %145, %149 : vector<8x128xf32>
      %151 = arith.index_cast %109 : i32 to index
      %c0_72 = arith.constant 0 : index
      %c0_73 = arith.constant 0 : index
      %152 = vector.load %arg11[%151, %c0_72, %c0_73] : memref<550x8x128xf32, #tpu.memory_space<vmem>>, vector<1x8x128xf32>
      %153 = vector.shape_cast %152 : vector<1x8x128xf32> to vector<8x128xf32>
      %154 = vector.shape_cast %150 : vector<8x128xf32> to vector<1x8x128xf32>
      tpu.vector_store %arg11[%151, %c0_72, %c0_73], %154 {strides = array<i32>} : memref<550x8x128xf32, #tpu.memory_space<vmem>>, vector<1x8x128xf32>,
      %c3_i32 = arith.constant 3 : i32
      %155 = arith.addi %16, %c3_i32 : i32
      %156 = arith.index_cast %155 : i32 to index
      %c0_74 = arith.constant 0 : index
      %c0_75 = arith.constant 0 : index
      %157 = vector.load %arg1[%156, %c0_74, %c0_75] : memref<550x8x8xf32, #tpu.memory_space<vmem>>, vector<1x8x8xf32>
      %158 = vector.shape_cast %157 : vector<1x8x8xf32> to vector<8x8xf32>
      %c0_76 = arith.constant 0 : index
      %c0_77 = arith.constant 0 : index
      %159 = vector.load %arg2[%c0_76, %c0_77] : memref<8x512xf32, #tpu.memory_space<vmem>>, vector<8x512xf32>
      %cst_78 = arith.constant dense<0.000000e+00> : vector<8x512xf32>
      %160 = tpu.matmul %158, %159, %cst_78 {dimension_numbers = #tpu.dot_dimension_numbers<[1], [0], [0], [1], [0, 0, 1, 1], [], []>} : vector<8x8xf32>, vector<8x512xf32>, vector<8x512xf32> -> vector<8x512xf32>
      %161 = vector.broadcast %1 : vector<1x512xf32> to vector<8x512xf32>
      %162 = arith.addf %160, %161 : vector<8x512xf32>
      %c0_79 = arith.constant 0 : index
      %c0_80 = arith.constant 0 : index
      %163 = vector.load %arg4[%c0_79, %c0_80] : memref<128x512xf32, #tpu.memory_space<vmem>>, vector<128x512xf32>
      %cst_81 = arith.constant dense<0.000000e+00> : vector<8x512xf32>
      %164 = tpu.matmul %150, %163, %cst_81 {dimension_numbers = #tpu.dot_dimension_numbers<[1], [0], [0], [1], [0, 0, 1, 1], [], []>} : vector<8x128xf32>, vector<128x512xf32>, vector<8x512xf32> -> vector<8x512xf32>
      %165 = arith.addf %162, %164 : vector<8x512xf32>
      %166 = vector.extract_strided_slice %165 {offsets = [0, 0], sizes = [8, 128], strides = [1, 1]} : vector<8x512xf32> to vector<8x128xf32>
      %cst_82 = arith.constant 5.000000e-01 : f32
      %167 = vector.broadcast %cst_82 : f32 to vector<8x128xf32>
      %168 = arith.mulf %167, %166 : vector<8x128xf32>
      %169 = math.tanh %168 : vector<8x128xf32>
      %cst_83 = arith.constant 5.000000e-01 : f32
      %170 = vector.broadcast %cst_83 : f32 to vector<8x128xf32>
      %171 = arith.mulf %170, %169 : vector<8x128xf32>
      %cst_84 = arith.constant 5.000000e-01 : f32
      %172 = vector.broadcast %cst_84 : f32 to vector<8x128xf32>
      %173 = arith.addf %171, %172 : vector<8x128xf32>
      %174 = vector.extract_strided_slice %165 {offsets = [0, 128], sizes = [8, 128], strides = [1, 1]} : vector<8x512xf32> to vector<8x128xf32>
      %cst_85 = arith.constant 5.000000e-01 : f32
      %175 = vector.broadcast %cst_85 : f32 to vector<8x128xf32>
      %176 = arith.mulf %175, %174 : vector<8x128xf32>
      %177 = math.tanh %176 : vector<8x128xf32>
      %cst_86 = arith.constant 5.000000e-01 : f32
      %178 = vector.broadcast %cst_86 : f32 to vector<8x128xf32>
      %179 = arith.mulf %178, %177 : vector<8x128xf32>
      %cst_87 = arith.constant 5.000000e-01 : f32
      %180 = vector.broadcast %cst_87 : f32 to vector<8x128xf32>
      %181 = arith.addf %179, %180 : vector<8x128xf32>
      %182 = vector.extract_strided_slice %165 {offsets = [0, 256], sizes = [8, 128], strides = [1, 1]} : vector<8x512xf32> to vector<8x128xf32>
      %183 = math.tanh %182 : vector<8x128xf32>
      %184 = vector.extract_strided_slice %165 {offsets = [0, 384], sizes = [8, 128], strides = [1, 1]} : vector<8x512xf32> to vector<8x128xf32>
      %cst_88 = arith.constant 5.000000e-01 : f32
      %185 = vector.broadcast %cst_88 : f32 to vector<8x128xf32>
      %186 = arith.mulf %185, %184 : vector<8x128xf32>
      %187 = math.tanh %186 : vector<8x128xf32>
      %cst_89 = arith.constant 5.000000e-01 : f32
      %188 = vector.broadcast %cst_89 : f32 to vector<8x128xf32>
      %189 = arith.mulf %188, %187 : vector<8x128xf32>
      %cst_90 = arith.constant 5.000000e-01 : f32
      %190 = vector.broadcast %cst_90 : f32 to vector<8x128xf32>
      %191 = arith.addf %189, %190 : vector<8x128xf32>
      %192 = arith.mulf %181, %148 : vector<8x128xf32>
      %193 = arith.mulf %173, %183 : vector<8x128xf32>
      %194 = arith.addf %192, %193 : vector<8x128xf32>
      %195 = math.tanh %194 : vector<8x128xf32>
      %196 = arith.mulf %191, %195 : vector<8x128xf32>
      %197 = arith.index_cast %155 : i32 to index
      %c0_91 = arith.constant 0 : index
      %c0_92 = arith.constant 0 : index
      %198 = vector.load %arg11[%197, %c0_91, %c0_92] : memref<550x8x128xf32, #tpu.memory_space<vmem>>, vector<1x8x128xf32>
      %199 = vector.shape_cast %198 : vector<1x8x128xf32> to vector<8x128xf32>
      %200 = vector.shape_cast %196 : vector<8x128xf32> to vector<1x8x128xf32>
      tpu.vector_store %arg11[%197, %c0_91, %c0_92], %200 {strides = array<i32>} : memref<550x8x128xf32, #tpu.memory_space<vmem>>, vector<1x8x128xf32>,
      %c4_i32 = arith.constant 4 : i32
      %201 = arith.addi %16, %c4_i32 : i32
      %202 = arith.index_cast %201 : i32 to index
      %c0_93 = arith.constant 0 : index
      %c0_94 = arith.constant 0 : index
      %203 = vector.load %arg1[%202, %c0_93, %c0_94] : memref<550x8x8xf32, #tpu.memory_space<vmem>>, vector<1x8x8xf32>
      %204 = vector.shape_cast %203 : vector<1x8x8xf32> to vector<8x8xf32>
      %c0_95 = arith.constant 0 : index
      %c0_96 = arith.constant 0 : index
      %205 = vector.load %arg2[%c0_95, %c0_96] : memref<8x512xf32, #tpu.memory_space<vmem>>, vector<8x512xf32>
      %cst_97 = arith.constant dense<0.000000e+00> : vector<8x512xf32>
      %206 = tpu.matmul %204, %205, %cst_97 {dimension_numbers = #tpu.dot_dimension_numbers<[1], [0], [0], [1], [0, 0, 1, 1], [], []>} : vector<8x8xf32>, vector<8x512xf32>, vector<8x512xf32> -> vector<8x512xf32>
      %207 = vector.broadcast %1 : vector<1x512xf32> to vector<8x512xf32>
      %208 = arith.addf %206, %207 : vector<8x512xf32>
      %c0_98 = arith.constant 0 : index
      %c0_99 = arith.constant 0 : index
      %209 = vector.load %arg4[%c0_98, %c0_99] : memref<128x512xf32, #tpu.memory_space<vmem>>, vector<128x512xf32>
      %cst_100 = arith.constant dense<0.000000e+00> : vector<8x512xf32>
      %210 = tpu.matmul %196, %209, %cst_100 {dimension_numbers = #tpu.dot_dimension_numbers<[1], [0], [0], [1], [0, 0, 1, 1], [], []>} : vector<8x128xf32>, vector<128x512xf32>, vector<8x512xf32> -> vector<8x512xf32>
      %211 = arith.addf %208, %210 : vector<8x512xf32>
      %212 = vector.extract_strided_slice %211 {offsets = [0, 0], sizes = [8, 128], strides = [1, 1]} : vector<8x512xf32> to vector<8x128xf32>
      %cst_101 = arith.constant 5.000000e-01 : f32
      %213 = vector.broadcast %cst_101 : f32 to vector<8x128xf32>
      %214 = arith.mulf %213, %212 : vector<8x128xf32>
      %215 = math.tanh %214 : vector<8x128xf32>
      %cst_102 = arith.constant 5.000000e-01 : f32
      %216 = vector.broadcast %cst_102 : f32 to vector<8x128xf32>
      %217 = arith.mulf %216, %215 : vector<8x128xf32>
      %cst_103 = arith.constant 5.000000e-01 : f32
      %218 = vector.broadcast %cst_103 : f32 to vector<8x128xf32>
      %219 = arith.addf %217, %218 : vector<8x128xf32>
      %220 = vector.extract_strided_slice %211 {offsets = [0, 128], sizes = [8, 128], strides = [1, 1]} : vector<8x512xf32> to vector<8x128xf32>
      %cst_104 = arith.constant 5.000000e-01 : f32
      %221 = vector.broadcast %cst_104 : f32 to vector<8x128xf32>
      %222 = arith.mulf %221, %220 : vector<8x128xf32>
      %223 = math.tanh %222 : vector<8x128xf32>
      %cst_105 = arith.constant 5.000000e-01 : f32
      %224 = vector.broadcast %cst_105 : f32 to vector<8x128xf32>
      %225 = arith.mulf %224, %223 : vector<8x128xf32>
      %cst_106 = arith.constant 5.000000e-01 : f32
      %226 = vector.broadcast %cst_106 : f32 to vector<8x128xf32>
      %227 = arith.addf %225, %226 : vector<8x128xf32>
      %228 = vector.extract_strided_slice %211 {offsets = [0, 256], sizes = [8, 128], strides = [1, 1]} : vector<8x512xf32> to vector<8x128xf32>
      %229 = math.tanh %228 : vector<8x128xf32>
      %230 = vector.extract_strided_slice %211 {offsets = [0, 384], sizes = [8, 128], strides = [1, 1]} : vector<8x512xf32> to vector<8x128xf32>
      %cst_107 = arith.constant 5.000000e-01 : f32
      %231 = vector.broadcast %cst_107 : f32 to vector<8x128xf32>
      %232 = arith.mulf %231, %230 : vector<8x128xf32>
      %233 = math.tanh %232 : vector<8x128xf32>
      %cst_108 = arith.constant 5.000000e-01 : f32
      %234 = vector.broadcast %cst_108 : f32 to vector<8x128xf32>
      %235 = arith.mulf %234, %233 : vector<8x128xf32>
      %cst_109 = arith.constant 5.000000e-01 : f32
      %236 = vector.broadcast %cst_109 : f32 to vector<8x128xf32>
      %237 = arith.addf %235, %236 : vector<8x128xf32>
      %238 = arith.mulf %227, %194 : vector<8x128xf32>
      %239 = arith.mulf %219, %229 : vector<8x128xf32>
      %240 = arith.addf %238, %239 : vector<8x128xf32>
      %241 = math.tanh %240 : vector<8x128xf32>
      %242 = arith.mulf %237, %241 : vector<8x128xf32>
      %243 = arith.index_cast %201 : i32 to index
      %c0_110 = arith.constant 0 : index
      %c0_111 = arith.constant 0 : index
      %244 = vector.load %arg11[%243, %c0_110, %c0_111] : memref<550x8x128xf32, #tpu.memory_space<vmem>>, vector<1x8x128xf32>
      %245 = vector.shape_cast %244 : vector<1x8x128xf32> to vector<8x128xf32>
      %246 = vector.shape_cast %242 : vector<8x128xf32> to vector<1x8x128xf32>
      tpu.vector_store %arg11[%243, %c0_110, %c0_111], %246 {strides = array<i32>} : memref<550x8x128xf32, #tpu.memory_space<vmem>>, vector<1x8x128xf32>,
      scf.yield %242, %240 : vector<8x128xf32>, vector<8x128xf32>
    }
    %c110_i32_3 = arith.constant 110 : i32
    %c0_i32_4 = arith.constant 0 : i32
    %c110_i32_5 = arith.constant 110 : i32
    %5 = arith.addi %c0_i32_4, %c110_i32_5 : i32
    %c1_i32_6 = arith.constant 1 : i32
    %6:2 = scf.for %arg12 = %c0_i32_4 to %5 step %c1_i32_6 iter_args(%arg13 = %0, %arg14 = %0) -> (vector<8x128xf32>, vector<8x128xf32>)  : i32 {
      %c5_i32 = arith.constant 5 : i32
      %16 = arith.muli %arg12, %c5_i32 : i32
      %c0_i32_15 = arith.constant 0 : i32
      %17 = arith.addi %16, %c0_i32_15 : i32
      %18 = arith.index_cast %17 : i32 to index
      %c0_16 = arith.constant 0 : index
      %c0_17 = arith.constant 0 : index
      %19 = vector.load %arg11[%18, %c0_16, %c0_17] : memref<550x8x128xf32, #tpu.memory_space<vmem>>, vector<1x8x128xf32>
      %20 = vector.shape_cast %19 : vector<1x8x128xf32> to vector<8x128xf32>
      %c549_i32 = arith.constant 549 : i32
      %21 = arith.subi %c549_i32, %17 : i32
      %22 = arith.index_cast %21 : i32 to index
      %c0_18 = arith.constant 0 : index
      %c0_19 = arith.constant 0 : index
      %23 = vector.load %arg11[%22, %c0_18, %c0_19] : memref<550x8x128xf32, #tpu.memory_space<vmem>>, vector<1x8x128xf32>
      %24 = vector.shape_cast %23 : vector<1x8x128xf32> to vector<8x128xf32>
      %25 = tpu.concatenate %20, %24 in 1 : vector<8x128xf32>, vector<8x128xf32> -> vector<8x256xf32>
      %c0_20 = arith.constant 0 : index
      %c0_21 = arith.constant 0 : index
      %26 = vector.load %arg5[%c0_20, %c0_21] : memref<256x512xf32, #tpu.memory_space<vmem>>, vector<256x512xf32>
      %cst_22 = arith.constant dense<0.000000e+00> : vector<8x512xf32>
      %27 = tpu.matmul %25, %26, %cst_22 {dimension_numbers = #tpu.dot_dimension_numbers<[1], [0], [0], [1], [0, 0, 1, 1], [], []>} : vector<8x256xf32>, vector<256x512xf32>, vector<8x512xf32> -> vector<8x512xf32>
      %28 = vector.broadcast %2 : vector<1x512xf32> to vector<8x512xf32>
      %29 = arith.addf %27, %28 : vector<8x512xf32>
      %c0_23 = arith.constant 0 : index
      %c0_24 = arith.constant 0 : index
      %30 = vector.load %arg7[%c0_23, %c0_24] : memref<128x512xf32, #tpu.memory_space<vmem>>, vector<128x512xf32>
      %cst_25 = arith.constant dense<0.000000e+00> : vector<8x512xf32>
      %31 = tpu.matmul %arg13, %30, %cst_25 {dimension_numbers = #tpu.dot_dimension_numbers<[1], [0], [0], [1], [0, 0, 1, 1], [], []>} : vector<8x128xf32>, vector<128x512xf32>, vector<8x512xf32> -> vector<8x512xf32>
      %32 = arith.addf %29, %31 : vector<8x512xf32>
      %33 = vector.extract_strided_slice %32 {offsets = [0, 0], sizes = [8, 128], strides = [1, 1]} : vector<8x512xf32> to vector<8x128xf32>
      %cst_26 = arith.constant 5.000000e-01 : f32
      %34 = vector.broadcast %cst_26 : f32 to vector<8x128xf32>
      %35 = arith.mulf %34, %33 : vector<8x128xf32>
      %36 = math.tanh %35 : vector<8x128xf32>
      %cst_27 = arith.constant 5.000000e-01 : f32
      %37 = vector.broadcast %cst_27 : f32 to vector<8x128xf32>
      %38 = arith.mulf %37, %36 : vector<8x128xf32>
      %cst_28 = arith.constant 5.000000e-01 : f32
      %39 = vector.broadcast %cst_28 : f32 to vector<8x128xf32>
      %40 = arith.addf %38, %39 : vector<8x128xf32>
      %41 = vector.extract_strided_slice %32 {offsets = [0, 128], sizes = [8, 128], strides = [1, 1]} : vector<8x512xf32> to vector<8x128xf32>
      %cst_29 = arith.constant 5.000000e-01 : f32
      %42 = vector.broadcast %cst_29 : f32 to vector<8x128xf32>
      %43 = arith.mulf %42, %41 : vector<8x128xf32>
      %44 = math.tanh %43 : vector<8x128xf32>
      %cst_30 = arith.constant 5.000000e-01 : f32
      %45 = vector.broadcast %cst_30 : f32 to vector<8x128xf32>
      %46 = arith.mulf %45, %44 : vector<8x128xf32>
      %cst_31 = arith.constant 5.000000e-01 : f32
      %47 = vector.broadcast %cst_31 : f32 to vector<8x128xf32>
      %48 = arith.addf %46, %47 : vector<8x128xf32>
      %49 = vector.extract_strided_slice %32 {offsets = [0, 256], sizes = [8, 128], strides = [1, 1]} : vector<8x512xf32> to vector<8x128xf32>
      %50 = math.tanh %49 : vector<8x128xf32>
      %51 = vector.extract_strided_slice %32 {offsets = [0, 384], sizes = [8, 128], strides = [1, 1]} : vector<8x512xf32> to vector<8x128xf32>
      %cst_32 = arith.constant 5.000000e-01 : f32
      %52 = vector.broadcast %cst_32 : f32 to vector<8x128xf32>
      %53 = arith.mulf %52, %51 : vector<8x128xf32>
      %54 = math.tanh %53 : vector<8x128xf32>
      %cst_33 = arith.constant 5.000000e-01 : f32
      %55 = vector.broadcast %cst_33 : f32 to vector<8x128xf32>
      %56 = arith.mulf %55, %54 : vector<8x128xf32>
      %cst_34 = arith.constant 5.000000e-01 : f32
      %57 = vector.broadcast %cst_34 : f32 to vector<8x128xf32>
      %58 = arith.addf %56, %57 : vector<8x128xf32>
      %59 = arith.mulf %48, %arg14 : vector<8x128xf32>
      %60 = arith.mulf %40, %50 : vector<8x128xf32>
      %61 = arith.addf %59, %60 : vector<8x128xf32>
      %62 = math.tanh %61 : vector<8x128xf32>
      %63 = arith.mulf %58, %62 : vector<8x128xf32>
      %c1_i32_35 = arith.constant 1 : i32
      %64 = arith.addi %16, %c1_i32_35 : i32
      %65 = arith.index_cast %64 : i32 to index
      %c0_36 = arith.constant 0 : index
      %c0_37 = arith.constant 0 : index
      %66 = vector.load %arg11[%65, %c0_36, %c0_37] : memref<550x8x128xf32, #tpu.memory_space<vmem>>, vector<1x8x128xf32>
      %67 = vector.shape_cast %66 : vector<1x8x128xf32> to vector<8x128xf32>
      %c549_i32_38 = arith.constant 549 : i32
      %68 = arith.subi %c549_i32_38, %64 : i32
      %69 = arith.index_cast %68 : i32 to index
      %c0_39 = arith.constant 0 : index
      %c0_40 = arith.constant 0 : index
      %70 = vector.load %arg11[%69, %c0_39, %c0_40] : memref<550x8x128xf32, #tpu.memory_space<vmem>>, vector<1x8x128xf32>
      %71 = vector.shape_cast %70 : vector<1x8x128xf32> to vector<8x128xf32>
      %72 = tpu.concatenate %67, %71 in 1 : vector<8x128xf32>, vector<8x128xf32> -> vector<8x256xf32>
      %c0_41 = arith.constant 0 : index
      %c0_42 = arith.constant 0 : index
      %73 = vector.load %arg5[%c0_41, %c0_42] : memref<256x512xf32, #tpu.memory_space<vmem>>, vector<256x512xf32>
      %cst_43 = arith.constant dense<0.000000e+00> : vector<8x512xf32>
      %74 = tpu.matmul %72, %73, %cst_43 {dimension_numbers = #tpu.dot_dimension_numbers<[1], [0], [0], [1], [0, 0, 1, 1], [], []>} : vector<8x256xf32>, vector<256x512xf32>, vector<8x512xf32> -> vector<8x512xf32>
      %75 = vector.broadcast %2 : vector<1x512xf32> to vector<8x512xf32>
      %76 = arith.addf %74, %75 : vector<8x512xf32>
      %c0_44 = arith.constant 0 : index
      %c0_45 = arith.constant 0 : index
      %77 = vector.load %arg7[%c0_44, %c0_45] : memref<128x512xf32, #tpu.memory_space<vmem>>, vector<128x512xf32>
      %cst_46 = arith.constant dense<0.000000e+00> : vector<8x512xf32>
      %78 = tpu.matmul %63, %77, %cst_46 {dimension_numbers = #tpu.dot_dimension_numbers<[1], [0], [0], [1], [0, 0, 1, 1], [], []>} : vector<8x128xf32>, vector<128x512xf32>, vector<8x512xf32> -> vector<8x512xf32>
      %79 = arith.addf %76, %78 : vector<8x512xf32>
      %80 = vector.extract_strided_slice %79 {offsets = [0, 0], sizes = [8, 128], strides = [1, 1]} : vector<8x512xf32> to vector<8x128xf32>
      %cst_47 = arith.constant 5.000000e-01 : f32
      %81 = vector.broadcast %cst_47 : f32 to vector<8x128xf32>
      %82 = arith.mulf %81, %80 : vector<8x128xf32>
      %83 = math.tanh %82 : vector<8x128xf32>
      %cst_48 = arith.constant 5.000000e-01 : f32
      %84 = vector.broadcast %cst_48 : f32 to vector<8x128xf32>
      %85 = arith.mulf %84, %83 : vector<8x128xf32>
      %cst_49 = arith.constant 5.000000e-01 : f32
      %86 = vector.broadcast %cst_49 : f32 to vector<8x128xf32>
      %87 = arith.addf %85, %86 : vector<8x128xf32>
      %88 = vector.extract_strided_slice %79 {offsets = [0, 128], sizes = [8, 128], strides = [1, 1]} : vector<8x512xf32> to vector<8x128xf32>
      %cst_50 = arith.constant 5.000000e-01 : f32
      %89 = vector.broadcast %cst_50 : f32 to vector<8x128xf32>
      %90 = arith.mulf %89, %88 : vector<8x128xf32>
      %91 = math.tanh %90 : vector<8x128xf32>
      %cst_51 = arith.constant 5.000000e-01 : f32
      %92 = vector.broadcast %cst_51 : f32 to vector<8x128xf32>
      %93 = arith.mulf %92, %91 : vector<8x128xf32>
      %cst_52 = arith.constant 5.000000e-01 : f32
      %94 = vector.broadcast %cst_52 : f32 to vector<8x128xf32>
      %95 = arith.addf %93, %94 : vector<8x128xf32>
      %96 = vector.extract_strided_slice %79 {offsets = [0, 256], sizes = [8, 128], strides = [1, 1]} : vector<8x512xf32> to vector<8x128xf32>
      %97 = math.tanh %96 : vector<8x128xf32>
      %98 = vector.extract_strided_slice %79 {offsets = [0, 384], sizes = [8, 128], strides = [1, 1]} : vector<8x512xf32> to vector<8x128xf32>
      %cst_53 = arith.constant 5.000000e-01 : f32
      %99 = vector.broadcast %cst_53 : f32 to vector<8x128xf32>
      %100 = arith.mulf %99, %98 : vector<8x128xf32>
      %101 = math.tanh %100 : vector<8x128xf32>
      %cst_54 = arith.constant 5.000000e-01 : f32
      %102 = vector.broadcast %cst_54 : f32 to vector<8x128xf32>
      %103 = arith.mulf %102, %101 : vector<8x128xf32>
      %cst_55 = arith.constant 5.000000e-01 : f32
      %104 = vector.broadcast %cst_55 : f32 to vector<8x128xf32>
      %105 = arith.addf %103, %104 : vector<8x128xf32>
      %106 = arith.mulf %95, %61 : vector<8x128xf32>
      %107 = arith.mulf %87, %97 : vector<8x128xf32>
      %108 = arith.addf %106, %107 : vector<8x128xf32>
      %109 = math.tanh %108 : vector<8x128xf32>
      %110 = arith.mulf %105, %109 : vector<8x128xf32>
      %c2_i32 = arith.constant 2 : i32
      %111 = arith.addi %16, %c2_i32 : i32
      %112 = arith.index_cast %111 : i32 to index
      %c0_56 = arith.constant 0 : index
      %c0_57 = arith.constant 0 : index
      %113 = vector.load %arg11[%112, %c0_56, %c0_57] : memref<550x8x128xf32, #tpu.memory_space<vmem>>, vector<1x8x128xf32>
      %114 = vector.shape_cast %113 : vector<1x8x128xf32> to vector<8x128xf32>
      %c549_i32_58 = arith.constant 549 : i32
      %115 = arith.subi %c549_i32_58, %111 : i32
      %116 = arith.index_cast %115 : i32 to index
      %c0_59 = arith.constant 0 : index
      %c0_60 = arith.constant 0 : index
      %117 = vector.load %arg11[%116, %c0_59, %c0_60] : memref<550x8x128xf32, #tpu.memory_space<vmem>>, vector<1x8x128xf32>
      %118 = vector.shape_cast %117 : vector<1x8x128xf32> to vector<8x128xf32>
      %119 = tpu.concatenate %114, %118 in 1 : vector<8x128xf32>, vector<8x128xf32> -> vector<8x256xf32>
      %c0_61 = arith.constant 0 : index
      %c0_62 = arith.constant 0 : index
      %120 = vector.load %arg5[%c0_61, %c0_62] : memref<256x512xf32, #tpu.memory_space<vmem>>, vector<256x512xf32>
      %cst_63 = arith.constant dense<0.000000e+00> : vector<8x512xf32>
      %121 = tpu.matmul %119, %120, %cst_63 {dimension_numbers = #tpu.dot_dimension_numbers<[1], [0], [0], [1], [0, 0, 1, 1], [], []>} : vector<8x256xf32>, vector<256x512xf32>, vector<8x512xf32> -> vector<8x512xf32>
      %122 = vector.broadcast %2 : vector<1x512xf32> to vector<8x512xf32>
      %123 = arith.addf %121, %122 : vector<8x512xf32>
      %c0_64 = arith.constant 0 : index
      %c0_65 = arith.constant 0 : index
      %124 = vector.load %arg7[%c0_64, %c0_65] : memref<128x512xf32, #tpu.memory_space<vmem>>, vector<128x512xf32>
      %cst_66 = arith.constant dense<0.000000e+00> : vector<8x512xf32>
      %125 = tpu.matmul %110, %124, %cst_66 {dimension_numbers = #tpu.dot_dimension_numbers<[1], [0], [0], [1], [0, 0, 1, 1], [], []>} : vector<8x128xf32>, vector<128x512xf32>, vector<8x512xf32> -> vector<8x512xf32>
      %126 = arith.addf %123, %125 : vector<8x512xf32>
      %127 = vector.extract_strided_slice %126 {offsets = [0, 0], sizes = [8, 128], strides = [1, 1]} : vector<8x512xf32> to vector<8x128xf32>
      %cst_67 = arith.constant 5.000000e-01 : f32
      %128 = vector.broadcast %cst_67 : f32 to vector<8x128xf32>
      %129 = arith.mulf %128, %127 : vector<8x128xf32>
      %130 = math.tanh %129 : vector<8x128xf32>
      %cst_68 = arith.constant 5.000000e-01 : f32
      %131 = vector.broadcast %cst_68 : f32 to vector<8x128xf32>
      %132 = arith.mulf %131, %130 : vector<8x128xf32>
      %cst_69 = arith.constant 5.000000e-01 : f32
      %133 = vector.broadcast %cst_69 : f32 to vector<8x128xf32>
      %134 = arith.addf %132, %133 : vector<8x128xf32>
      %135 = vector.extract_strided_slice %126 {offsets = [0, 128], sizes = [8, 128], strides = [1, 1]} : vector<8x512xf32> to vector<8x128xf32>
      %cst_70 = arith.constant 5.000000e-01 : f32
      %136 = vector.broadcast %cst_70 : f32 to vector<8x128xf32>
      %137 = arith.mulf %136, %135 : vector<8x128xf32>
      %138 = math.tanh %137 : vector<8x128xf32>
      %cst_71 = arith.constant 5.000000e-01 : f32
      %139 = vector.broadcast %cst_71 : f32 to vector<8x128xf32>
      %140 = arith.mulf %139, %138 : vector<8x128xf32>
      %cst_72 = arith.constant 5.000000e-01 : f32
      %141 = vector.broadcast %cst_72 : f32 to vector<8x128xf32>
      %142 = arith.addf %140, %141 : vector<8x128xf32>
      %143 = vector.extract_strided_slice %126 {offsets = [0, 256], sizes = [8, 128], strides = [1, 1]} : vector<8x512xf32> to vector<8x128xf32>
      %144 = math.tanh %143 : vector<8x128xf32>
      %145 = vector.extract_strided_slice %126 {offsets = [0, 384], sizes = [8, 128], strides = [1, 1]} : vector<8x512xf32> to vector<8x128xf32>
      %cst_73 = arith.constant 5.000000e-01 : f32
      %146 = vector.broadcast %cst_73 : f32 to vector<8x128xf32>
      %147 = arith.mulf %146, %145 : vector<8x128xf32>
      %148 = math.tanh %147 : vector<8x128xf32>
      %cst_74 = arith.constant 5.000000e-01 : f32
      %149 = vector.broadcast %cst_74 : f32 to vector<8x128xf32>
      %150 = arith.mulf %149, %148 : vector<8x128xf32>
      %cst_75 = arith.constant 5.000000e-01 : f32
      %151 = vector.broadcast %cst_75 : f32 to vector<8x128xf32>
      %152 = arith.addf %150, %151 : vector<8x128xf32>
      %153 = arith.mulf %142, %108 : vector<8x128xf32>
      %154 = arith.mulf %134, %144 : vector<8x128xf32>
      %155 = arith.addf %153, %154 : vector<8x128xf32>
      %156 = math.tanh %155 : vector<8x128xf32>
      %157 = arith.mulf %152, %156 : vector<8x128xf32>
      %c3_i32 = arith.constant 3 : i32
      %158 = arith.addi %16, %c3_i32 : i32
      %159 = arith.index_cast %158 : i32 to index
      %c0_76 = arith.constant 0 : index
      %c0_77 = arith.constant 0 : index
      %160 = vector.load %arg11[%159, %c0_76, %c0_77] : memref<550x8x128xf32, #tpu.memory_space<vmem>>, vector<1x8x128xf32>
      %161 = vector.shape_cast %160 : vector<1x8x128xf32> to vector<8x128xf32>
      %c549_i32_78 = arith.constant 549 : i32
      %162 = arith.subi %c549_i32_78, %158 : i32
      %163 = arith.index_cast %162 : i32 to index
      %c0_79 = arith.constant 0 : index
      %c0_80 = arith.constant 0 : index
      %164 = vector.load %arg11[%163, %c0_79, %c0_80] : memref<550x8x128xf32, #tpu.memory_space<vmem>>, vector<1x8x128xf32>
      %165 = vector.shape_cast %164 : vector<1x8x128xf32> to vector<8x128xf32>
      %166 = tpu.concatenate %161, %165 in 1 : vector<8x128xf32>, vector<8x128xf32> -> vector<8x256xf32>
      %c0_81 = arith.constant 0 : index
      %c0_82 = arith.constant 0 : index
      %167 = vector.load %arg5[%c0_81, %c0_82] : memref<256x512xf32, #tpu.memory_space<vmem>>, vector<256x512xf32>
      %cst_83 = arith.constant dense<0.000000e+00> : vector<8x512xf32>
      %168 = tpu.matmul %166, %167, %cst_83 {dimension_numbers = #tpu.dot_dimension_numbers<[1], [0], [0], [1], [0, 0, 1, 1], [], []>} : vector<8x256xf32>, vector<256x512xf32>, vector<8x512xf32> -> vector<8x512xf32>
      %169 = vector.broadcast %2 : vector<1x512xf32> to vector<8x512xf32>
      %170 = arith.addf %168, %169 : vector<8x512xf32>
      %c0_84 = arith.constant 0 : index
      %c0_85 = arith.constant 0 : index
      %171 = vector.load %arg7[%c0_84, %c0_85] : memref<128x512xf32, #tpu.memory_space<vmem>>, vector<128x512xf32>
      %cst_86 = arith.constant dense<0.000000e+00> : vector<8x512xf32>
      %172 = tpu.matmul %157, %171, %cst_86 {dimension_numbers = #tpu.dot_dimension_numbers<[1], [0], [0], [1], [0, 0, 1, 1], [], []>} : vector<8x128xf32>, vector<128x512xf32>, vector<8x512xf32> -> vector<8x512xf32>
      %173 = arith.addf %170, %172 : vector<8x512xf32>
      %174 = vector.extract_strided_slice %173 {offsets = [0, 0], sizes = [8, 128], strides = [1, 1]} : vector<8x512xf32> to vector<8x128xf32>
      %cst_87 = arith.constant 5.000000e-01 : f32
      %175 = vector.broadcast %cst_87 : f32 to vector<8x128xf32>
      %176 = arith.mulf %175, %174 : vector<8x128xf32>
      %177 = math.tanh %176 : vector<8x128xf32>
      %cst_88 = arith.constant 5.000000e-01 : f32
      %178 = vector.broadcast %cst_88 : f32 to vector<8x128xf32>
      %179 = arith.mulf %178, %177 : vector<8x128xf32>
      %cst_89 = arith.constant 5.000000e-01 : f32
      %180 = vector.broadcast %cst_89 : f32 to vector<8x128xf32>
      %181 = arith.addf %179, %180 : vector<8x128xf32>
      %182 = vector.extract_strided_slice %173 {offsets = [0, 128], sizes = [8, 128], strides = [1, 1]} : vector<8x512xf32> to vector<8x128xf32>
      %cst_90 = arith.constant 5.000000e-01 : f32
      %183 = vector.broadcast %cst_90 : f32 to vector<8x128xf32>
      %184 = arith.mulf %183, %182 : vector<8x128xf32>
      %185 = math.tanh %184 : vector<8x128xf32>
      %cst_91 = arith.constant 5.000000e-01 : f32
      %186 = vector.broadcast %cst_91 : f32 to vector<8x128xf32>
      %187 = arith.mulf %186, %185 : vector<8x128xf32>
      %cst_92 = arith.constant 5.000000e-01 : f32
      %188 = vector.broadcast %cst_92 : f32 to vector<8x128xf32>
      %189 = arith.addf %187, %188 : vector<8x128xf32>
      %190 = vector.extract_strided_slice %173 {offsets = [0, 256], sizes = [8, 128], strides = [1, 1]} : vector<8x512xf32> to vector<8x128xf32>
      %191 = math.tanh %190 : vector<8x128xf32>
      %192 = vector.extract_strided_slice %173 {offsets = [0, 384], sizes = [8, 128], strides = [1, 1]} : vector<8x512xf32> to vector<8x128xf32>
      %cst_93 = arith.constant 5.000000e-01 : f32
      %193 = vector.broadcast %cst_93 : f32 to vector<8x128xf32>
      %194 = arith.mulf %193, %192 : vector<8x128xf32>
      %195 = math.tanh %194 : vector<8x128xf32>
      %cst_94 = arith.constant 5.000000e-01 : f32
      %196 = vector.broadcast %cst_94 : f32 to vector<8x128xf32>
      %197 = arith.mulf %196, %195 : vector<8x128xf32>
      %cst_95 = arith.constant 5.000000e-01 : f32
      %198 = vector.broadcast %cst_95 : f32 to vector<8x128xf32>
      %199 = arith.addf %197, %198 : vector<8x128xf32>
      %200 = arith.mulf %189, %155 : vector<8x128xf32>
      %201 = arith.mulf %181, %191 : vector<8x128xf32>
      %202 = arith.addf %200, %201 : vector<8x128xf32>
      %203 = math.tanh %202 : vector<8x128xf32>
      %204 = arith.mulf %199, %203 : vector<8x128xf32>
      %c4_i32 = arith.constant 4 : i32
      %205 = arith.addi %16, %c4_i32 : i32
      %206 = arith.index_cast %205 : i32 to index
      %c0_96 = arith.constant 0 : index
      %c0_97 = arith.constant 0 : index
      %207 = vector.load %arg11[%206, %c0_96, %c0_97] : memref<550x8x128xf32, #tpu.memory_space<vmem>>, vector<1x8x128xf32>
      %208 = vector.shape_cast %207 : vector<1x8x128xf32> to vector<8x128xf32>
      %c549_i32_98 = arith.constant 549 : i32
      %209 = arith.subi %c549_i32_98, %205 : i32
      %210 = arith.index_cast %209 : i32 to index
      %c0_99 = arith.constant 0 : index
      %c0_100 = arith.constant 0 : index
      %211 = vector.load %arg11[%210, %c0_99, %c0_100] : memref<550x8x128xf32, #tpu.memory_space<vmem>>, vector<1x8x128xf32>
      %212 = vector.shape_cast %211 : vector<1x8x128xf32> to vector<8x128xf32>
      %213 = tpu.concatenate %208, %212 in 1 : vector<8x128xf32>, vector<8x128xf32> -> vector<8x256xf32>
      %c0_101 = arith.constant 0 : index
      %c0_102 = arith.constant 0 : index
      %214 = vector.load %arg5[%c0_101, %c0_102] : memref<256x512xf32, #tpu.memory_space<vmem>>, vector<256x512xf32>
      %cst_103 = arith.constant dense<0.000000e+00> : vector<8x512xf32>
      %215 = tpu.matmul %213, %214, %cst_103 {dimension_numbers = #tpu.dot_dimension_numbers<[1], [0], [0], [1], [0, 0, 1, 1], [], []>} : vector<8x256xf32>, vector<256x512xf32>, vector<8x512xf32> -> vector<8x512xf32>
      %216 = vector.broadcast %2 : vector<1x512xf32> to vector<8x512xf32>
      %217 = arith.addf %215, %216 : vector<8x512xf32>
      %c0_104 = arith.constant 0 : index
      %c0_105 = arith.constant 0 : index
      %218 = vector.load %arg7[%c0_104, %c0_105] : memref<128x512xf32, #tpu.memory_space<vmem>>, vector<128x512xf32>
      %cst_106 = arith.constant dense<0.000000e+00> : vector<8x512xf32>
      %219 = tpu.matmul %204, %218, %cst_106 {dimension_numbers = #tpu.dot_dimension_numbers<[1], [0], [0], [1], [0, 0, 1, 1], [], []>} : vector<8x128xf32>, vector<128x512xf32>, vector<8x512xf32> -> vector<8x512xf32>
      %220 = arith.addf %217, %219 : vector<8x512xf32>
      %221 = vector.extract_strided_slice %220 {offsets = [0, 0], sizes = [8, 128], strides = [1, 1]} : vector<8x512xf32> to vector<8x128xf32>
      %cst_107 = arith.constant 5.000000e-01 : f32
      %222 = vector.broadcast %cst_107 : f32 to vector<8x128xf32>
      %223 = arith.mulf %222, %221 : vector<8x128xf32>
      %224 = math.tanh %223 : vector<8x128xf32>
      %cst_108 = arith.constant 5.000000e-01 : f32
      %225 = vector.broadcast %cst_108 : f32 to vector<8x128xf32>
      %226 = arith.mulf %225, %224 : vector<8x128xf32>
      %cst_109 = arith.constant 5.000000e-01 : f32
      %227 = vector.broadcast %cst_109 : f32 to vector<8x128xf32>
      %228 = arith.addf %226, %227 : vector<8x128xf32>
      %229 = vector.extract_strided_slice %220 {offsets = [0, 128], sizes = [8, 128], strides = [1, 1]} : vector<8x512xf32> to vector<8x128xf32>
      %cst_110 = arith.constant 5.000000e-01 : f32
      %230 = vector.broadcast %cst_110 : f32 to vector<8x128xf32>
      %231 = arith.mulf %230, %229 : vector<8x128xf32>
      %232 = math.tanh %231 : vector<8x128xf32>
      %cst_111 = arith.constant 5.000000e-01 : f32
      %233 = vector.broadcast %cst_111 : f32 to vector<8x128xf32>
      %234 = arith.mulf %233, %232 : vector<8x128xf32>
      %cst_112 = arith.constant 5.000000e-01 : f32
      %235 = vector.broadcast %cst_112 : f32 to vector<8x128xf32>
      %236 = arith.addf %234, %235 : vector<8x128xf32>
      %237 = vector.extract_strided_slice %220 {offsets = [0, 256], sizes = [8, 128], strides = [1, 1]} : vector<8x512xf32> to vector<8x128xf32>
      %238 = math.tanh %237 : vector<8x128xf32>
      %239 = vector.extract_strided_slice %220 {offsets = [0, 384], sizes = [8, 128], strides = [1, 1]} : vector<8x512xf32> to vector<8x128xf32>
      %cst_113 = arith.constant 5.000000e-01 : f32
      %240 = vector.broadcast %cst_113 : f32 to vector<8x128xf32>
      %241 = arith.mulf %240, %239 : vector<8x128xf32>
      %242 = math.tanh %241 : vector<8x128xf32>
      %cst_114 = arith.constant 5.000000e-01 : f32
      %243 = vector.broadcast %cst_114 : f32 to vector<8x128xf32>
      %244 = arith.mulf %243, %242 : vector<8x128xf32>
      %cst_115 = arith.constant 5.000000e-01 : f32
      %245 = vector.broadcast %cst_115 : f32 to vector<8x128xf32>
      %246 = arith.addf %244, %245 : vector<8x128xf32>
      %247 = arith.mulf %236, %202 : vector<8x128xf32>
      %248 = arith.mulf %228, %238 : vector<8x128xf32>
      %249 = arith.addf %247, %248 : vector<8x128xf32>
      %250 = math.tanh %249 : vector<8x128xf32>
      %251 = arith.mulf %246, %250 : vector<8x128xf32>
      scf.yield %251, %249 : vector<8x128xf32>, vector<8x128xf32>
    }
    %c110_i32_7 = arith.constant 110 : i32
    %c0_8 = arith.constant 0 : index
    %c0_9 = arith.constant 0 : index
    %7 = vector.load %arg8[%c0_8, %c0_9] : memref<1x128xf32, #tpu.memory_space<vmem>>, vector<1x128xf32>
    %8 = vector.broadcast %7 : vector<1x128xf32> to vector<8x128xf32>
    %9 = arith.mulf %6#0, %8 : vector<8x128xf32>
    %cst_10 = arith.constant dense<0.000000e+00> : vector<8xf32>
    %10 = vector.multi_reduction <add>, %9, %cst_10 [1] : vector<8x128xf32> to vector<8xf32>
    %11 = vector.shape_cast %10 : vector<8xf32> to vector<8x1xf32>
    %c0_11 = arith.constant 0 : index
    %c0_12 = arith.constant 0 : index
    %12 = vector.load %arg9[%c0_11, %c0_12] : memref<1x1xf32, #tpu.memory_space<vmem>>, vector<1x1xf32>
    %13 = vector.broadcast %12 : vector<1x1xf32> to vector<8x1xf32>
    %14 = arith.addf %11, %13 : vector<8x1xf32>
    %c0_13 = arith.constant 0 : index
    %c0_14 = arith.constant 0 : index
    %15 = vector.load %arg10[%c0_13, %c0_14] : memref<8x1xf32, #tpu.memory_space<vmem>>, vector<8x1xf32>
    tpu.vector_store %arg10[%c0_13, %c0_14], %14 {strides = array<i32>} : memref<8x1xf32, #tpu.memory_space<vmem>>, vector<8x1xf32>,
    return
  }
  func.func @transform_0(%arg0: i32) -> (i32, i32, i32) {
    %c0_i32 = arith.constant 0 : i32
    %c0_i32_0 = arith.constant 0 : i32
    %c0_i32_1 = arith.constant 0 : i32
    return %c0_i32, %arg0, %c0_i32_0 : i32, i32, i32
  }
  func.func @transform_1(%arg0: i32) -> (i32, i32) {
    %c0_i32 = arith.constant 0 : i32
    %c0_i32_0 = arith.constant 0 : i32
    %c0_i32_1 = arith.constant 0 : i32
    return %c0_i32, %c0_i32_0 : i32, i32
  }
  func.func @transform_2(%arg0: i32) -> (i32, i32) {
    %c0_i32 = arith.constant 0 : i32
    %c0_i32_0 = arith.constant 0 : i32
    %c0_i32_1 = arith.constant 0 : i32
    return %c0_i32, %c0_i32_0 : i32, i32
  }
  func.func @transform_3(%arg0: i32) -> (i32, i32) {
    %c0_i32 = arith.constant 0 : i32
    %c0_i32_0 = arith.constant 0 : i32
    %c0_i32_1 = arith.constant 0 : i32
    return %c0_i32, %c0_i32_0 : i32, i32
  }
  func.func @transform_4(%arg0: i32) -> (i32, i32) {
    %c0_i32 = arith.constant 0 : i32
    %c0_i32_0 = arith.constant 0 : i32
    %c0_i32_1 = arith.constant 0 : i32
    return %c0_i32, %c0_i32_0 : i32, i32
  }
  func.func @transform_5(%arg0: i32) -> (i32, i32) {
    %c0_i32 = arith.constant 0 : i32
    %c0_i32_0 = arith.constant 0 : i32
    %c0_i32_1 = arith.constant 0 : i32
    return %c0_i32, %c0_i32_0 : i32, i32
  }
  func.func @transform_6(%arg0: i32) -> (i32, i32) {
    %c0_i32 = arith.constant 0 : i32
    %c0_i32_0 = arith.constant 0 : i32
    %c0_i32_1 = arith.constant 0 : i32
    return %c0_i32, %c0_i32_0 : i32, i32
  }
  func.func @transform_7(%arg0: i32) -> (i32, i32) {
    %c0_i32 = arith.constant 0 : i32
    %c0_i32_0 = arith.constant 0 : i32
    %c0_i32_1 = arith.constant 0 : i32
    return %c0_i32, %c0_i32_0 : i32, i32
  }
  func.func @transform_8(%arg0: i32) -> (i32, i32) {
    %c0_i32 = arith.constant 0 : i32
    %c0_i32_0 = arith.constant 0 : i32
    %c0_i32_1 = arith.constant 0 : i32
    return %c0_i32, %c0_i32_0 : i32, i32
  }
  func.func @transform_9(%arg0: i32) -> (i32, i32) {
    %c0_i32 = arith.constant 0 : i32
    %c0_i32_0 = arith.constant 0 : i32
    return %arg0, %c0_i32 : i32, i32
  }
}

</mosaic_0001>

<bundles_post_ra>
// kernel: reverse
= control target key start
LH: loop header
LB: loop body
LE: loop exit
PB: predicated region body
PF: predicated region fallthrough
CT: control target
= control target key end

     0   :  { %v2_v0 = vlaneseq  ;;  %s580_s0 = inlined_call_operand.vmem [shape: f32[640,8,2], index: 0, kind: input, shape index: {}]   ;;  %s581_s1 = inlined_call_operand.vmem [shape: f32[640,8,2], index: 1, kind: output, shape index: {}]  }
   0x2   :  { %v509_v1 = vsub.s32 127, %v2_v0 }
   0x4   :  { %4 = vset.pattern.permute.xlu0 %v509_v1 }
   0x5   :  { %s512_s6 = smov 0   ;;  %s514_s7 = smov 0  }
   0x6   :  { %s516_s8 = smov 0  }
   0x7 LB: > { %s424_s9 = sadd.s32 4294967295, %s497_s8   ;;  %s22_s10 = sadd.s32 1, %s493_s7  ;;  %s497_s8 = sphi %s516_s8, %s10_s8   ;;  %s493_s7 = sphi %s514_s7, %s583_s7   ;;  %s489_s6 = sphi %s512_s6, %s582_s6  }
   0x8   : > { %p23_p0 = scmp.ge.s32.totalorder %s22_s10, 5  ;;  %p426_p1 = scmp.ge.s32.totalorder %s497_s8, 5 }
   0x9   : > { %s45_s11 = sand.u32 (!%p426_p1), 1, %s497_s8   ;;  %s48_s12 = ssub.s32 (!%p426_p1), 4, %s493_s7 }
   0xa   : > { %s585_s10 = smov (%p23_p0, %s22_s10), 0  ;;  %43 = sbr.rel (%p426_p1) target bundleno = 19 (0x13), region = 16 }
   0xb   : > { %s427_s13 = sshll.u32 (!%p426_p1), %s45_s11, 4  ;;  %s428_s14 = sshll.u32 (!%p426_p1), %s48_s12, 1 }
   0xc   : > { %s55_s17 = scalar_lea.vmem (!%p426_p1), %s580_s0, %s428_s14  ;;  %s47_s18 = scalar_lea.vmem (!%p426_p1), [#allocation1], %s427_s13 }
   0xd   : > { %v71_v2 = vld [vmem:[%s55_s17] sm:$0x3] (!%p426_p1)  ;;  %v73_v3 = vld [vmem:[%s55_s17 + $0xa] sm:$0x3] (!%p426_p1)  ;;  %v75_v4 = vld [vmem:[%s55_s17 + $0x14] sm:$0x3] (!%p426_p1) }
   0xe   : > { %72 = vst [vmem:[%s47_s18] sm:$0x3] (!%p426_p1), %v71_v2  ;;  %74 = vst [vmem:[%s47_s18 + $0x2] sm:$0x3] (!%p426_p1), %v73_v3  ;;  %v77_v5 = vld [vmem:[%s55_s17 + $0x1e] sm:$0x3] (!%p426_p1) }
   0xf   : > { %76 = vst [vmem:[%s47_s18 + $0x4] sm:$0x3] (!%p426_p1), %v75_v4  ;;  %v79_v6 = vld [vmem:[%s55_s17 + $0x28] sm:$0x3] (!%p426_p1)  ;;  %v81_v7 = vld [vmem:[%s55_s17 + $0x32] sm:$0x3] (!%p426_p1) }
  0x10   : > { %78 = vst [vmem:[%s47_s18 + $0x6] sm:$0x3] (!%p426_p1), %v77_v5  ;;  %80 = vst [vmem:[%s47_s18 + $0x8] sm:$0x3] (!%p426_p1), %v79_v6  ;;  %v83_v8 = vld [vmem:[%s55_s17 + $0x3c] sm:$0x3] (!%p426_p1) }
  0x11   : > { %82 = vst [vmem:[%s47_s18 + $0xa] sm:$0x3] %v81_v7  ;;  %v85_v9 = vld [vmem:[%s55_s17 + $0x46] sm:$0x3]  ;;  %84 = vst [vmem:[%s47_s18 + $0xc] sm:$0x3] %v83_v8 }
  0x12   : > { %86 = vst [vmem:[%s47_s18 + $0xe] sm:$0x3] %v85_v9 }
  0x13 PF: > { %p429_p2 = scmp.ge.s32.totalorder %s497_s8, 1  ;;  %p124_p3 = scmp.lt.s32.totalorder %s497_s8, 6 }
  0x15   : > { %p125_p4 = pnand %p429_p2, %p124_p3 }
  0x16   : > { %474 = vset.pattern.permute.xlu1 (!%p125_p4), %v509_v1  ;;  %s542_s19 = sand.u32 (!%p125_p4), 1, %s424_s9   ;;  %s447_s23 = sshll.u32 (!%p125_p4), %s489_s6, 1 }
  0x17   : > { %128 = sbr.rel (%p125_p4) target bundleno = 193 (0xc1), region = 57  ;;  %s430_s20 = sshll.u32 (!%p125_p4), %s542_s19, 4 }
  0x18   : > { %s137_s21 = scalar_lea.vmem (!%p125_p4), [#allocation1], %s430_s20  ;;  %s549_s22 = scalar_lea.vmem (!%p125_p4), [#allocation3], %s430_s20 }
  0x19   : > { %v178_v10 = vld [vmem:[%s137_s21] sm:$0x3] (!%p125_p4)  ;;  %v437_v11 = vld [vmem:[%s137_s21 + $0x4] sm:$0x3] (!%p125_p4)  ;;  %v438_v12 = vld [vmem:[%s137_s21 + $0x2] sm:$0x3] (!%p125_p4)  ;;  %s286_s26 = scalar_lea.vmem (!%p125_p4), %s581_s1, %s447_s23 }
  0x1a   : > { %179 = vst [vmem:[#allocation0] sm:$0x3] (!%p125_p4), %v178_v10  ;;  %173 = vst [vmem:[#allocation0 + $0x10] sm:$0x3] (!%p125_p4), %v437_v11  ;;  %v436_v13 = vld [vmem:[%s137_s21 + $0x6] sm:$0x3] (!%p125_p4) }
  0x1b   : > { %177 = vst [vmem:[#allocation0 + $0x8] sm:$0x3] (!%p125_p4), %v438_v12  ;;  %v435_v14 = vld [vmem:[%s137_s21 + $0x8] sm:$0x3] (!%p125_p4)  ;;  %v434_v15 = vld [vmem:[%s137_s21 + $0xa] sm:$0x3] (!%p125_p4) }
  0x1c   : > { %168 = vst [vmem:[#allocation0 + $0x18] sm:$0x3] (!%p125_p4), %v436_v13  ;;  %163 = vst [vmem:[#allocation0 + $0x20] sm:$0x3] (!%p125_p4), %v435_v14  ;;  %v433_v16 = vld [vmem:[%s137_s21 + $0xc] sm:$0x3] (!%p125_p4) }
  0x1d   : > { %158 = vst [vmem:[#allocation0 + $0x28] sm:$0x3] (!%p125_p4), %v434_v15  ;;  %v432_v17 = vld [vmem:[%s137_s21 + $0xe] sm:$0x3] (!%p125_p4)  ;;  %153 = vst [vmem:[#allocation0 + $0x30] sm:$0x3] (!%p125_p4), %v433_v16 }
  0x1e   : > { %148 = vst [vmem:[#allocation0 + $0x38] sm:$0x3] %v432_v17 }
  0x21   : > { %v183_v18 = vld [vmem:[#allocation0] sm:$0xff]  ;;  %v195_v19 = vld [vmem:[#allocation0 + $0x10] sm:$0xff] }
  0x22   : > { %184 = vperm.xlu0 %4, %v183_v18   ;;  %196 = vperm.xlu1 %474, %v195_v19   ;;  %v189_v20 = vld [vmem:[#allocation0 + $0x8] sm:$0xff] }
  0x23   : > { %v201_v21 = vld [vmem:[#allocation0 + $0x18] sm:$0xff]  ;;  %v207_v22 = vld [vmem:[#allocation0 + $0x20] sm:$0xff] }
  0x24   : > { %v213_v23 = vld [vmem:[#allocation0 + $0x28] sm:$0xff]  ;;  %v219_v24 = vld [vmem:[#allocation0 + $0x30] sm:$0xff] }
  0x25   : > { %v225_v25 = vld [vmem:[#allocation0 + $0x38] sm:$0xff] }
  0x26   : > { %190 = vperm.xlu0 %4, %v189_v20   ;;  %202 = vperm.xlu1 %474, %v201_v21  }
  0x2a   : > { %208 = vperm.xlu0 %4, %v207_v22   ;;  %214 = vperm.xlu1 %474, %v213_v23  }
  0x2e   : > { %220 = vperm.xlu0 %4, %v219_v24   ;;  %226 = vperm.xlu1 %474, %v225_v25  }
  0xa1   : > { %v185_v26 = vpop.permute.xlu0 %184  ;;  %v197_v27 = vpop.permute.xlu1 %196 }
  0xa2   : > { %186 = vst [vmem:[#allocation2] sm:$0xff] %v185_v26  ;;  %198 = vst [vmem:[#allocation2 + $0x10] sm:$0xff] %v197_v27 }
  0xa5   : > { %v191_v28 = vpop.permute.xlu0 %190  ;;  %v203_v29 = vpop.permute.xlu1 %202 }
  0xa6   : > { %192 = vst [vmem:[#allocation2 + $0x8] sm:$0xff] %v191_v28  ;;  %204 = vst [vmem:[#allocation2 + $0x18] sm:$0xff] %v203_v29 }
  0xa9   : > { %v232_v30 = vld [vmem:[#allocation2] sm:$0x3]  ;;  %v241_v31 = vld [vmem:[#allocation2 + $0x10] sm:$0x3]  ;;  %v209_v32 = vpop.permute.xlu0 %208  ;;  %v215_v33 = vpop.permute.xlu1 %214 }
  0xaa   : > { %234 = vst [vmem:[%s549_s22] sm:$0x3] %v232_v30  ;;  %440 = vst [vmem:[%s549_s22 + $0x4] sm:$0x3] %v241_v31 }
  0xab   : > { %210 = vst [vmem:[#allocation2 + $0x20] sm:$0xff] %v209_v32  ;;  %216 = vst [vmem:[#allocation2 + $0x28] sm:$0xff] %v215_v33 }
  0xad   : > { %v236_v34 = vld [vmem:[#allocation2 + $0x8] sm:$0x3]  ;;  %v247_v35 = vld [vmem:[#allocation2 + $0x18] sm:$0x3]  ;;  %v221_v36 = vpop.permute.xlu0 %220  ;;  %v227_v37 = vpop.permute.xlu1 %226 }
  0xae   : > { %439 = vst [vmem:[%s549_s22 + $0x2] sm:$0x3] %v236_v34  ;;  %441 = vst [vmem:[%s549_s22 + $0x6] sm:$0x3] %v247_v35 }
  0xaf   : > { %222 = vst [vmem:[#allocation2 + $0x30] sm:$0xff] %v221_v36  ;;  %228 = vst [vmem:[#allocation2 + $0x38] sm:$0xff] %v227_v37 }
  0xb1   : > { %v302_v38 = vld [vmem:[%s549_s22] sm:$0x3]  ;;  %v306_v39 = vld [vmem:[%s549_s22 + $0x4] sm:$0x3] }
  0xb2   : > { %v253_v40 = vld [vmem:[#allocation2 + $0x20] sm:$0x3]  ;;  %303 = vst [vmem:[%s286_s26] sm:$0x3] %v302_v38  ;;  %307 = vst [vmem:[%s286_s26 + $0x14] sm:$0x3] %v306_v39 }
  0xb3   : > { %442 = vst [vmem:[%s549_s22 + $0x8] sm:$0x3] %v253_v40  ;;  %v259_v41 = vld [vmem:[#allocation2 + $0x28] sm:$0x3] }
  0xb4   : > { %443 = vst [vmem:[%s549_s22 + $0xa] sm:$0x3] %v259_v41 }
  0xb5   : > { %v304_v42 = vld [vmem:[%s549_s22 + $0x2] sm:$0x3]  ;;  %v308_v43 = vld [vmem:[%s549_s22 + $0x6] sm:$0x3] }
  0xb6   : > { %v265_v44 = vld [vmem:[#allocation2 + $0x30] sm:$0x3]  ;;  %305 = vst [vmem:[%s286_s26 + $0xa] sm:$0x3] %v304_v42  ;;  %309 = vst [vmem:[%s286_s26 + $0x1e] sm:$0x3] %v308_v43 }
  0xb7   : > { %444 = vst [vmem:[%s549_s22 + $0xc] sm:$0x3] %v265_v44  ;;  %v271_v45 = vld [vmem:[#allocation2 + $0x38] sm:$0x3] }
  0xb8   : > { %445 = vst [vmem:[%s549_s22 + $0xe] sm:$0x3] %v271_v45 }
  0xba   : > { %v310_v46 = vld [vmem:[%s549_s22 + $0x8] sm:$0x3] }
  0xbb   : > { %311 = vst [vmem:[%s286_s26 + $0x28] sm:$0x3] %v310_v46  ;;  %v312_v47 = vld [vmem:[%s549_s22 + $0xa] sm:$0x3] }
  0xbc   : > { %313 = vst [vmem:[%s286_s26 + $0x32] sm:$0x3] %v312_v47 }
  0xbe   : > { %v314_v48 = vld [vmem:[%s549_s22 + $0xc] sm:$0x3] }
  0xbf   : > { %315 = vst [vmem:[%s286_s26 + $0x3c] sm:$0x3] %v314_v48  ;;  %v316_v49 = vld [vmem:[%s549_s22 + $0xe] sm:$0x3] }
  0xc0   : > { %317 = vst [vmem:[%s286_s26 + $0x46] sm:$0x3] %v316_v49 }
  0xc1 PF: > { %s10_s8 = sadd.s32 1, %s497_s8   ;;  %s582_s6 = smov %s493_s7 }
  0xc2   : > { %p7_p5 = scmp.ge.s32.totalorder %s10_s8, 7   ;;  %s583_s7 = smov %s585_s10 }
  0xc4   :  { %9 = sbr.rel (!%p7_p5) target bundleno = 7 (0x7), region = 166 }

// kernel: lstm_anomaly_forward.1
= control target key start
LH: loop header
LB: loop body
LE: loop exit
PB: predicated region body
PF: predicated region fallthrough
CT: control target
= control target key end

     0   :  { %v5548_v3 = vmov 0.0   ;;  %v5550_v4 = vmov 0.0   ;;  %s5552_s15 = smov 0   ;;  %s7775_s0 = inlined_call_operand.vmem [shape: f32[550,8,8], index: 0, kind: input, shape index: {}]   ;;  %s7776_s1 = inlined_call_operand.vmem [shape: f32[8,512], index: 1, kind: input, shape index: {}]   ;;  %s7777_s2 = inlined_call_operand.vmem [shape: f32[1,512], index: 2, kind: input, shape index: {}]   ;;  %s7778_s3 = inlined_call_operand.vmem [shape: f32[128,512], index: 3, kind: input, shape index: {}]   ;;  %s7779_s4 = inlined_call_operand.vmem [shape: f32[256,512], index: 4, kind: input, shape index: {}]   ;;  %s7780_s5 = inlined_call_operand.vmem [shape: f32[1,512], index: 5, kind: input, shape index: {}]   ;;  %s7781_s6 = inlined_call_operand.vmem [shape: f32[128,512], index: 6, kind: input, shape index: {}]   ;;  %s7782_s7 = inlined_call_operand.vmem [shape: f32[1,128], index: 7, kind: input, shape index: {}]   ;;  %s7783_s8 = inlined_call_operand.<no memory space> [shape: f32[1,1], index: 8, kind: input, shape index: {}]   ;;  %s7784_s9 = inlined_call_operand.vmem [shape: f32[8,1], index: 9, kind: output, shape index: {}]  }
   0x1   :  { %v14_v0 = vstv %s7783_s8  ;;  %v5541_v1 = vld [vmem:[%s7777_s2] sm:$0xf] }
   0x2   :  { %v5546_v2 = vld [vmem:[%s7780_s5] sm:$0xf]  ;;  %15 = vst [vmem:[#allocation3] sm:$0x1] %v14_v0 }
   0x3   :  { %7919 = vst [vmem:[#allocation4_spill] sm:$0xff] %v5546_v2 }
   0x4 LB: > { %v5566_v5 = vld [vmem:[%s7776_s1 + $0x8] sm:$0xff]  ;;  %v5571_v6 = vld [vmem:[%s7776_s1 + $0x18] sm:$0xff]  ;;  %v5576_v7 = vld [vmem:[%s7776_s1] sm:$0xff]  ;;  %s3882_s29 = smul.u32 40, %s5469_s15  ;;  %v5483_v15 = vmov 0.0   ;;  %vm73_vm0 = vcmask 64512   ;;  %s5469_s15 = sphi %s5552_s15, %s41_s15   ;;  %v5465_v4 = vphi %v5550_v4, %v1978_v4   ;;  %v5461_v3 = vphi %v5548_v3, %v1976_v3  }
   0x5   : > { %77 = vmatprep.subr.mxu0 %v5566_v5  ;;  %148 = vmatprep.subr.mxu1 %v5571_v6  ;;  %v5583_v8 = vld [vmem:[%s7776_s1 + $0x10] sm:$0xff]  ;;  %v220_v9 = vld [vmem:[%s7778_s3 + $0x8] sm:$0xff]  ;;  %v222_v12 = vld [vmem:[%s7778_s3 + $0x18] sm:$0xff]  ;;  %s41_s15 = sadd.s32 1, %s5469_s15  }
   0x6   : > { %v224_v10 = vld [vmem:[%s7778_s3 + $0x28] sm:$0xff]  ;;  %78 = vmatpush1.msra.mxu0 %v5576_v7  ;;  %149 = vmatpush1.msra.mxu1 %v5583_v8  ;;  %v226_v13 = vld [vmem:[%s7778_s3 + $0x38] sm:$0xff]  ;;  %v219_v14 = vld [vmem:[%s7778_s3] sm:$0xff]  ;;  %s5624_s17 = scalar_lea.vmem %s7775_s0, %s3882_s29  ;;  %s5973_s25 = scalar_lea.vmem [#allocation2], %s3882_s29 }
   0x7   : > { %v5593_v11 = vpack.c.bf16 %v224_v10, %v220_v9  ;;  %141 = vmatprep.mubr.f32.mxu0 %v5483_v15  ;;  %212 = vmatprep.mubr.f32.mxu1 %v5483_v15  ;;  %v5607_v16 = vpack.c.bf16 %v226_v13, %v222_v12  ;;  %v223_v17 = vld [vmem:[%s7778_s3 + $0x20] sm:$0xff]  ;;  %v221_v18 = vld [vmem:[%s7778_s3 + $0x10] sm:$0xff]  ;;  %v228_v22 = vld [vmem:[%s7778_s3 + $0x48] sm:$0xff]  ;;  %p38_p0 = scmp.ge.s32.totalorder %s41_s15, 110  }
   0x8   : > { %v225_v19 = vld [vmem:[%s7778_s3 + $0x30] sm:$0xff]  ;;  %v5626_v20 = vpack.c.bf16 %v223_v17, %v219_v14  ;;  %v232_v23 = vld [vmem:[%s7778_s3 + $0x68] sm:$0xff]  ;;  %v230_v24 = vld [vmem:[%s7778_s3 + $0x58] sm:$0xff] }
   0x9   : > { %3926 = vmatprep.subr.bf16.mxu0 %v5593_v11  ;;  %v5628_v21 = vpack.c.bf16 %v225_v19, %v221_v18  ;;  %3958 = vmatprep.subr.bf16.mxu1 %v5607_v16  ;;  %v47_v25 = vld [vmem:[%s5624_s17] sm:$0xff]  ;;  %v5641_v26 = vpack.c.bf16 %v232_v23, %v228_v22  ;;  %v234_v27 = vld [vmem:[%s7778_s3 + $0x78] sm:$0xff]  ;;  %v229_v31 = vld [vmem:[%s7778_s3 + $0x50] sm:$0xff] }
   0xa   : > { %v227_v28 = vld [vmem:[%s7778_s3 + $0x40] sm:$0xff]  ;;  %3883 = vmatmul.mubr.msk.f32.vlgmr.msra.gmra.mrb[0].mxu0 %vm73_vm0, %v47_v25  ;;  %3884 = vmatmul.mubr.msk.f32.vlgmr.msra.gmra.mrb[0].mxu1 %vm73_vm0, %v47_v25  ;;  %v5651_v29 = vpack.c.bf16 %v234_v27, %v230_v24  ;;  %v233_v32 = vld [vmem:[%s7778_s3 + $0x70] sm:$0xff]  ;;  %v236_v35 = vld [vmem:[%s7778_s3 + $0x88] sm:$0xff] }
   0xb   : > { %v231_v30 = vld [vmem:[%s7778_s3 + $0x60] sm:$0xff]  ;;  %3928 = vmatpush1.bf16.msra.mxu0 %v5626_v20  ;;  %3960 = vmatpush1.bf16.msra.mxu1 %v5628_v21  ;;  %v5666_v34 = vpack.c.bf16 %v233_v32, %v229_v31  ;;  %v240_v36 = vld [vmem:[%s7778_s3 + $0xa8] sm:$0xff]  ;;  %v238_v37 = vld [vmem:[%s7778_s3 + $0x98] sm:$0xff] }
   0xc   : > { %v5664_v33 = vpack.c.bf16 %v231_v30, %v227_v28  ;;  %3930 = vmatprep.subr.bf16.mxu0 %v5641_v26  ;;  %3962 = vmatprep.subr.bf16.mxu1 %v5651_v29  ;;  %v5679_v38 = vpack.c.bf16 %v240_v36, %v236_v35  ;;  %v242_v39 = vld [vmem:[%s7778_s3 + $0xb8] sm:$0xff]  ;;  %v235_v40 = vld [vmem:[%s7778_s3 + $0x80] sm:$0xff]  ;;  %v237_v43 = vld [vmem:[%s7778_s3 + $0x90] sm:$0xff] }
   0xd   : > { %v239_v41 = vld [vmem:[%s7778_s3 + $0xa0] sm:$0xff]  ;;  %v5690_v42 = vpack.c.bf16 %v242_v39, %v238_v37  ;;  %v241_v44 = vld [vmem:[%s7778_s3 + $0xb0] sm:$0xff]  ;;  %v244_v45 = vld [vmem:[%s7778_s3 + $0xc8] sm:$0xff]  ;;  %347 = vmatprep.mubr.f32.mxu0 %v5483_v15  ;;  %418 = vmatprep.mubr.f32.mxu1 %v5483_v15 }
   0xe   : > { %v248_v46 = vld [vmem:[%s7778_s3 + $0xe8] sm:$0xff]  ;;  %v246_v47 = vld [vmem:[%s7778_s3 + $0xd8] sm:$0xff]  ;;  %v5714_v49 = vpack.c.bf16 %v239_v41, %v235_v40  ;;  %v5716_v50 = vpack.c.bf16 %v241_v44, %v237_v43  ;;  %v243_v51 = vld [vmem:[%s7778_s3 + $0xc0] sm:$0xff] }
   0xf   : > { %v250_v48 = vld [vmem:[%s7778_s3 + $0xf8] sm:$0xff]  ;;  %3932 = vmatpush1.bf16.msra.mxu0 %v5664_v33  ;;  %3964 = vmatpush1.bf16.msra.mxu1 %v5666_v34  ;;  %v247_v52 = vld [vmem:[%s7778_s3 + $0xe0] sm:$0xff]  ;;  %v5726_v53 = vpack.c.bf16 %v248_v46, %v244_v45  ;;  %v245_v55 = vld [vmem:[%s7778_s3 + $0xd0] sm:$0xff] }
  0x10   : > { %3934 = vmatprep.subr.bf16.mxu0 %v5679_v38  ;;  %3966 = vmatprep.subr.bf16.mxu1 %v5690_v42  ;;  %v5728_v54 = vpack.c.bf16 %v250_v48, %v246_v47  ;;  %v249_v56 = vld [vmem:[%s7778_s3 + $0xf0] sm:$0xff]  ;;  %v252_v57 = vld [vmem:[%s7778_s3 + $0x108] sm:$0xff]  ;;  %v254_v59 = vld [vmem:[%s7778_s3 + $0x118] sm:$0xff]  ;;  %v5750_v61 = vpack.c.bf16 %v247_v52, %v243_v51 }
  0x11   : > { %v256_v58 = vld [vmem:[%s7778_s3 + $0x128] sm:$0xff]  ;;  %v258_v60 = vld [vmem:[%s7778_s3 + $0x138] sm:$0xff]  ;;  %v5752_v62 = vpack.c.bf16 %v249_v56, %v245_v55  ;;  %v251_v63 = vld [vmem:[%s7778_s3 + $0x100] sm:$0xff] }
  0x12   : > { %v255_v0 = vld [vmem:[%s7778_s3 + $0x120] sm:$0xff]  ;;  %v5762_v9 = vpack.c.bf16 %v256_v58, %v252_v57  ;;  %v5764_v10 = vpack.c.bf16 %v258_v60, %v254_v59  ;;  %v253_v12 = vld [vmem:[%s7778_s3 + $0x110] sm:$0xff]  ;;  %v260_v14 = vld [vmem:[%s7778_s3 + $0x148] sm:$0xff] }
  0x13   : > { %3936 = vmatpush1.bf16.msra.mxu0 %v5714_v49  ;;  %3968 = vmatpush1.bf16.msra.mxu1 %v5716_v50  ;;  %v257_v13 = vld [vmem:[%s7778_s3 + $0x130] sm:$0xff]  ;;  %v264_v17 = vld [vmem:[%s7778_s3 + $0x168] sm:$0xff]  ;;  %v262_v18 = vld [vmem:[%s7778_s3 + $0x158] sm:$0xff]  ;;  %v5786_v22 = vpack.c.bf16 %v255_v0, %v251_v63 }
  0x14   : > { %3938 = vmatprep.subr.bf16.mxu0 %v5726_v53  ;;  %3970 = vmatprep.subr.bf16.mxu1 %v5728_v54  ;;  %v266_v19 = vld [vmem:[%s7778_s3 + $0x178] sm:$0xff]  ;;  %v5788_v23 = vpack.c.bf16 %v257_v13, %v253_v12  ;;  %v259_v24 = vld [vmem:[%s7778_s3 + $0x140] sm:$0xff]  ;;  %v5798_v27 = vpack.c.bf16 %v264_v17, %v260_v14  ;;  %v261_v30 = vld [vmem:[%s7778_s3 + $0x150] sm:$0xff] }
  0x15   : > { %v263_v25 = vld [vmem:[%s7778_s3 + $0x160] sm:$0xff]  ;;  %v5800_v28 = vpack.c.bf16 %v266_v19, %v262_v18  ;;  %v265_v31 = vld [vmem:[%s7778_s3 + $0x170] sm:$0xff]  ;;  %v268_v32 = vld [vmem:[%s7778_s3 + $0x188] sm:$0xff] }
  0x16   : > { %v272_v35 = vld [vmem:[%s7778_s3 + $0x1a8] sm:$0xff]  ;;  %v270_v36 = vld [vmem:[%s7778_s3 + $0x198] sm:$0xff]  ;;  %v5822_v39 = vpack.c.bf16 %v263_v25, %v259_v24  ;;  %v5824_v40 = vpack.c.bf16 %v265_v31, %v261_v30  ;;  %v267_v41 = vld [vmem:[%s7778_s3 + $0x180] sm:$0xff] }
  0x17   : > { %3940 = vmatpush1.bf16.msra.mxu0 %v5750_v61  ;;  %3972 = vmatpush1.bf16.msra.mxu1 %v5752_v62  ;;  %v274_v37 = vld [vmem:[%s7778_s3 + $0x1b8] sm:$0xff]  ;;  %v271_v43 = vld [vmem:[%s7778_s3 + $0x1a0] sm:$0xff]  ;;  %v5834_v44 = vpack.c.bf16 %v272_v35, %v268_v32  ;;  %v269_v46 = vld [vmem:[%s7778_s3 + $0x190] sm:$0xff] }
  0x18   : > { %3942 = vmatprep.subr.bf16.mxu0 %v5762_v9  ;;  %3974 = vmatprep.subr.bf16.mxu1 %v5764_v10  ;;  %v5836_v45 = vpack.c.bf16 %v274_v37, %v270_v36  ;;  %v273_v47 = vld [vmem:[%s7778_s3 + $0x1b0] sm:$0xff]  ;;  %v276_v48 = vld [vmem:[%s7778_s3 + $0x1c8] sm:$0xff]  ;;  %v278_v52 = vld [vmem:[%s7778_s3 + $0x1d8] sm:$0xff]  ;;  %v5858_v56 = vpack.c.bf16 %v271_v43, %v267_v41 }
  0x19   : > { %v280_v51 = vld [vmem:[%s7778_s3 + $0x1e8] sm:$0xff]  ;;  %v282_v55 = vld [vmem:[%s7778_s3 + $0x1f8] sm:$0xff]  ;;  %v5860_v57 = vpack.c.bf16 %v273_v47, %v269_v46  ;;  %v275_v58 = vld [vmem:[%s7778_s3 + $0x1c0] sm:$0xff] }
  0x1a   : > { %v5867_v59 = vpack.c.bf16 %v280_v51, %v276_v48  ;;  %v5869_v60 = vpack.c.bf16 %v282_v55, %v278_v52  ;;  %v279_v63 = vld [vmem:[%s7778_s3 + $0x1e0] sm:$0xff]  ;;  %v277_v0 = vld [vmem:[%s7778_s3 + $0x1d0] sm:$0xff]  ;;  %v3886_v17 = vld [vmem:[%s5624_s17 + $0x8] sm:$0xff] }
  0x1b   : > { %3944 = vmatpush1.bf16.msra.mxu0 %v5786_v22  ;;  %3976 = vmatpush1.bf16.msra.mxu1 %v5788_v23  ;;  %v281_v12 = vld [vmem:[%s7778_s3 + $0x1f0] sm:$0xff]  ;;  %v5882_v13 = vpack.c.bf16 %v279_v63, %v275_v58 }
  0x1c   : > { %3946 = vmatprep.subr.bf16.mxu0 %v5798_v27  ;;  %3978 = vmatprep.subr.bf16.mxu1 %v5800_v28  ;;  %v5884_v14 = vpack.c.bf16 %v281_v12, %v277_v0 }
  0x1f   : > { %3948 = vmatpush1.bf16.msra.mxu0 %v5822_v39  ;;  %3980 = vmatpush1.bf16.msra.mxu1 %v5824_v40 }
  0x20   : > { %3950 = vmatprep.subr.bf16.mxu0 %v5834_v44  ;;  %3982 = vmatprep.subr.bf16.mxu1 %v5836_v45 }
  0x23   : > { %3952 = vmatpush1.bf16.msra.mxu0 %v5858_v56  ;;  %3984 = vmatpush1.bf16.msra.mxu1 %v5860_v57 }
  0x24   : > { %3954 = vmatprep.subr.bf16.mxu0 %v5867_v59  ;;  %3986 = vmatprep.subr.bf16.mxu1 %v5869_v60 }
  0x27   : > { %3956 = vmatpush1.bf16.msra.mxu0 %v5882_v13  ;;  %3988 = vmatpush1.bf16.msra.mxu1 %v5884_v14 }
  0x28   : > { %460 = vmatprep.subr.mxu0 %v5566_v5  ;;  %531 = vmatprep.subr.mxu1 %v5571_v6 }
  0x2a   : > { %348 = vmatmul.mubr.f32.vlgmr.msra.gmra.mrb[0].mxu0 %v5465_v4  ;;  %419 = vmatmul.mubr.f32.vlgmr.msra.gmra.mrb[0].mxu1 %v5465_v4  ;;  %v53_v4 = vlaneseq }
  0x2b   : > { %461 = vmatpush1.msra.mxu0 %v5576_v7  ;;  %532 = vmatpush1.msra.mxu1 %v5583_v8 }
  0x2c   : > { %524 = vmatprep.mubr.f32.mxu0 %v5483_v15  ;;  %595 = vmatprep.mubr.f32.mxu1 %v5483_v15  ;;  %v5937_v18 = vshrl.u32 %v53_v4, 7 }
  0x2d   : > { %3990 = vmatprep.subr.bf16.mxu0 %v5593_v11  ;;  %4022 = vmatprep.subr.bf16.mxu1 %v5607_v16 }
  0x2e   : > { %3887 = vmatmul.mubr.msk.f32.vlgmr.msra.gmra.mrb[2].mxu0 %vm73_vm0, %v3886_v17  ;;  %3888 = vmatmul.mubr.msk.f32.vlgmr.msra.gmra.mrb[2].mxu1 %vm73_vm0, %v3886_v17  ;;  %7920 = vst [vmem:[#allocation5_spill] sm:$0xff] %v5937_v18  ;;  %v7788_v19 = vsub.s32 0, %v5937_v18  ;;  %v7787_v24 = vsub.s32 1, %v5937_v18  ;;  %v7786_v30 = vsub.s32 2, %v5937_v18  ;;  %v7785_v37 = vsub.s32 3, %v5937_v18 }
  0x2f   : > { %3992 = vmatpush1.bf16.msra.mxu0 %v5626_v20  ;;  %4024 = vmatpush1.bf16.msra.mxu1 %v5628_v21 }
  0x30   : > { %3994 = vmatprep.subr.bf16.mxu0 %v5641_v26  ;;  %4026 = vmatprep.subr.bf16.mxu1 %v5651_v29  ;;  %v5944_v25 = vrot.slane %v5541_v1, %v7788_v19  ;;  %v5956_v35 = vrot.slane %v5541_v1, %v7786_v30  ;;  %v5964_v51 = vrot.slane %v5541_v1, %v7785_v37 }
  0x31   : > { %730 = vmatprep.mubr.f32.mxu0 %v5483_v15  ;;  %801 = vmatprep.mubr.f32.mxu1 %v5483_v15 }
  0x33   : > { %3996 = vmatpush1.bf16.msra.mxu0 %v5664_v33  ;;  %4028 = vmatpush1.bf16.msra.mxu1 %v5666_v34 }
  0x34   : > { %3998 = vmatprep.subr.bf16.mxu0 %v5679_v38  ;;  %4030 = vmatprep.subr.bf16.mxu1 %v5690_v42 }
  0x37   : > { %4000 = vmatpush1.bf16.msra.mxu0 %v5714_v49  ;;  %4032 = vmatpush1.bf16.msra.mxu1 %v5716_v50 }
  0x38   : > { %4002 = vmatprep.subr.bf16.mxu0 %v5726_v53  ;;  %4034 = vmatprep.subr.bf16.mxu1 %v5728_v54 }
  0x3b   : > { %4004 = vmatpush1.bf16.msra.mxu0 %v5750_v61  ;;  %4036 = vmatpush1.bf16.msra.mxu1 %v5752_v62 }
  0x3c   : > { %4006 = vmatprep.subr.bf16.mxu0 %v5762_v9  ;;  %4038 = vmatprep.subr.bf16.mxu1 %v5764_v10 }
  0x3f   : > { %4008 = vmatpush1.bf16.msra.mxu0 %v5786_v22  ;;  %4040 = vmatpush1.bf16.msra.mxu1 %v5788_v23 }
  0x40   : > { %4010 = vmatprep.subr.bf16.mxu0 %v5798_v27  ;;  %4042 = vmatprep.subr.bf16.mxu1 %v5800_v28 }
  0x43   : > { %4012 = vmatpush1.bf16.msra.mxu0 %v5822_v39  ;;  %4044 = vmatpush1.bf16.msra.mxu1 %v5824_v40 }
  0x44   : > { %4014 = vmatprep.subr.bf16.mxu0 %v5834_v44  ;;  %4046 = vmatprep.subr.bf16.mxu1 %v5836_v45 }
  0x47   : > { %4016 = vmatpush1.bf16.msra.mxu0 %v5858_v56  ;;  %4048 = vmatpush1.bf16.msra.mxu1 %v5860_v57 }
  0x48   : > { %4018 = vmatprep.subr.bf16.mxu0 %v5867_v59  ;;  %4050 = vmatprep.subr.bf16.mxu1 %v5869_v60 }
  0x4b   : > { %4020 = vmatpush1.bf16.msra.mxu0 %v5882_v13  ;;  %4052 = vmatpush1.bf16.msra.mxu1 %v5884_v14 }
  0x4c   : > { %843 = vmatprep.subr.mxu0 %v5566_v5  ;;  %914 = vmatprep.subr.mxu1 %v5571_v6  ;;  %v5950_v5 = vrot.slane %v5541_v1, %v7787_v24 }
  0xfd   : > { %v349_v6 = vpop.f32.mrb[0].mxu0  ;;  %v420_v31 = vpop.f32.mrb[0].mxu1 }
  0xfe   : > { %v5205_v32 = vadd.f32 %v349_v6, %v5944_v25  ;;  %v351_v36 = vpop.f32.mrb[1].mxu0  ;;  %v422_v41 = vpop.f32.mrb[1].mxu1  ;;  %v5207_v48 = vadd.f32 %v420_v31, %v5956_v35 }
  0xff   : > { %v5206_v43 = vadd.f32 %v351_v36, %v5950_v5  ;;  %v5208_v52 = vadd.f32 %v422_v41, %v5964_v51 }
 0x100   : > { %v429_v46 = vmul.f32 0.5, %v5205_v32 }
 0x101   : > { %v433_v47 = vmul.f32 0.5, %v5206_v43  ;;  %v438_v55 = vmul.f32 0.5, %v5208_v52  ;;  %v1375_v52 = vld [vmem:[%s7778_s3 + $0x38] sm:$0xff] }
 0x102   : > { %5335 = vtanh.f32 %v429_v46 }
 0x103   : > { %5337 = vtanh.f32 %v433_v47 }
 0x104   : > { %5339 = vtanh.f32 %v5207_v48 }
 0x105   : > { %5341 = vtanh.f32 %v438_v55  ;;  %v1368_v55 = vld [vmem:[%s7778_s3] sm:$0xff] }
 0x10c   : > { %v5336_v58 = vpop.eup %5335 }
 0x10d   : > { %v5338_v63 = vpop.eup %5337  ;;  %v431_v0 = vmul.f32 0.5, %v5336_v58 }
 0x10e   : > { %v435_v12 = vmul.f32 0.5, %v5338_v63  ;;  %v5340_v4 = vpop.eup %5339  ;;  %v3898_v63 = vld [vmem:[%s5624_s17 + $0x18] sm:$0xff] }
 0x10f   : > { %v432_v17 = vadd.f32 0.5, %v431_v0  ;;  %v5342_v43 = vpop.eup %5341  ;;  %v1372_v0 = vld [vmem:[%s7778_s3 + $0x20] sm:$0xff] }
 0x110   : > { %v436_v6 = vadd.f32 0.5, %v435_v12  ;;  %v440_v41 = vmul.f32 0.5, %v5342_v43  ;;  %v1370_v12 = vld [vmem:[%s7778_s3 + $0x10] sm:$0xff]  ;;  %v1379_v43 = vld [vmem:[%s7778_s3 + $0x58] sm:$0xff] }
 0x111   : > { %v443_v31 = vmul.f32 %v5340_v4, %v432_v17  ;;  %v6080_v17 = vpack.c.bf16 %v1372_v0, %v1368_v55  ;;  %v1374_v4 = vld [vmem:[%s7778_s3 + $0x30] sm:$0xff]  ;;  %v1403_v55 = vld [vmem:[%s7778_s3 + $0x118] sm:$0xff] }
 0x112   : > { %v442_v32 = vmul.f32 %v5461_v3, %v436_v6  ;;  %v441_v46 = vadd.f32 0.5, %v440_v41  ;;  %v3892_v3 = vld [vmem:[%s5624_s17 + $0x10] sm:$0xff]  ;;  %v1377_v6 = vld [vmem:[%s7778_s3 + $0x48] sm:$0xff]  ;;  %v1383_v41 = vld [vmem:[%s7778_s3 + $0x78] sm:$0xff] }
 0x113   : > { %v1407_v0 = vld [vmem:[%s7778_s3 + $0x138] sm:$0xff] }
 0x114   : > { %v5968_v36 = vadd.f32 %v443_v31, %v442_v32  ;;  %v1381_v31 = vld [vmem:[%s7778_s3 + $0x68] sm:$0xff]  ;;  %v6093_v32 = vpack.c.bf16 %v1374_v4, %v1370_v12  ;;  %v1400_v12 = vld [vmem:[%s7778_s3 + $0x100] sm:$0xff] }
 0x115   : > { %v1404_v4 = vld [vmem:[%s7778_s3 + $0x120] sm:$0xff] }
 0x116   : > { %5343 = vtanh.f32 %v5968_v36 }
 0x120   : > { %v5344_v47 = vpop.eup %5343 }
 0x121   : > { %v446_v48 = vmul.f32 %v5344_v47, %v441_v46  ;;  %v1376_v46 = vld [vmem:[%s7778_s3 + $0x40] sm:$0xff]  ;;  %v6107_v47 = vpack.c.bf16 %v1383_v41, %v1379_v43  ;;  %v1402_v43 = vld [vmem:[%s7778_s3 + $0x110] sm:$0xff] }
 0x122   : > { %v1406_v41 = vld [vmem:[%s7778_s3 + $0x130] sm:$0xff] }
 0x123   : > { %448 = vst [vmem:[%s5973_s25] sm:$0xff] %v446_v48  ;;  %731 = vmatmul.mubr.f32.vlgmr.msra.gmra.mrb[2].mxu0 %v446_v48  ;;  %802 = vmatmul.mubr.f32.vlgmr.msra.gmra.mrb[2].mxu1 %v446_v48  ;;  %v1380_v48 = vld [vmem:[%s7778_s3 + $0x60] sm:$0xff] }
 0x124   : > { %844 = vmatpush1.msra.mxu0 %v5576_v7  ;;  %915 = vmatpush1.msra.mxu1 %v5583_v8 }
 0x125   : > { %907 = vmatprep.mubr.f32.mxu0 %v5483_v15  ;;  %978 = vmatprep.mubr.f32.mxu1 %v5483_v15 }
 0x126   : > { %4054 = vmatprep.subr.bf16.mxu0 %v5593_v11  ;;  %4086 = vmatprep.subr.bf16.mxu1 %v5607_v16 }
 0x127   : > { %3893 = vmatmul.mubr.msk.f32.vlgmr.msra.gmra.mrb[4].mxu0 %vm73_vm0, %v3892_v3  ;;  %3894 = vmatmul.mubr.msk.f32.vlgmr.msra.gmra.mrb[4].mxu1 %vm73_vm0, %v3892_v3  ;;  %v1378_v3 = vld [vmem:[%s7778_s3 + $0x50] sm:$0xff] }
 0x128   : > { %4056 = vmatpush1.bf16.msra.mxu0 %v5626_v20  ;;  %4088 = vmatpush1.bf16.msra.mxu1 %v5628_v21 }
 0x129   : > { %4058 = vmatprep.subr.bf16.mxu0 %v5641_v26  ;;  %4090 = vmatprep.subr.bf16.mxu1 %v5651_v29 }
 0x12a   : > { %1113 = vmatprep.mubr.f32.mxu0 %v5483_v15  ;;  %1184 = vmatprep.mubr.f32.mxu1 %v5483_v15 }
 0x12c   : > { %4060 = vmatpush1.bf16.msra.mxu0 %v5664_v33  ;;  %4092 = vmatpush1.bf16.msra.mxu1 %v5666_v34 }
 0x12d   : > { %4062 = vmatprep.subr.bf16.mxu0 %v5679_v38  ;;  %4094 = vmatprep.subr.bf16.mxu1 %v5690_v42 }
 0x130   : > { %4064 = vmatpush1.bf16.msra.mxu0 %v5714_v49  ;;  %4096 = vmatpush1.bf16.msra.mxu1 %v5716_v50 }
 0x131   : > { %4066 = vmatprep.subr.bf16.mxu0 %v5726_v53  ;;  %4098 = vmatprep.subr.bf16.mxu1 %v5728_v54 }
 0x134   : > { %4068 = vmatpush1.bf16.msra.mxu0 %v5750_v61  ;;  %4100 = vmatpush1.bf16.msra.mxu1 %v5752_v62 }
 0x135   : > { %4070 = vmatprep.subr.bf16.mxu0 %v5762_v9  ;;  %4102 = vmatprep.subr.bf16.mxu1 %v5764_v10 }
 0x138   : > { %4072 = vmatpush1.bf16.msra.mxu0 %v5786_v22  ;;  %4104 = vmatpush1.bf16.msra.mxu1 %v5788_v23 }
 0x139   : > { %4074 = vmatprep.subr.bf16.mxu0 %v5798_v27  ;;  %4106 = vmatprep.subr.bf16.mxu1 %v5800_v28 }
 0x13c   : > { %4076 = vmatpush1.bf16.msra.mxu0 %v5822_v39  ;;  %4108 = vmatpush1.bf16.msra.mxu1 %v5824_v40 }
 0x13d   : > { %4078 = vmatprep.subr.bf16.mxu0 %v5834_v44  ;;  %4110 = vmatprep.subr.bf16.mxu1 %v5836_v45  ;;  %v6031_v44 = vld [vmem:[%s7776_s1 + $0x8] sm:$0xff]  ;;  %v6036_v45 = vld [vmem:[%s7776_s1 + $0x18] sm:$0xff] }
 0x140   : > { %4080 = vmatpush1.bf16.msra.mxu0 %v5858_v56  ;;  %4112 = vmatpush1.bf16.msra.mxu1 %v5860_v57  ;;  %v1369_v56 = vld [vmem:[%s7778_s3 + $0x8] sm:$0xff]  ;;  %v6045_v57 = vld [vmem:[%s7776_s1] sm:$0xff] }
 0x141   : > { %4082 = vmatprep.subr.bf16.mxu0 %v5867_v59  ;;  %4114 = vmatprep.subr.bf16.mxu1 %v5869_v60  ;;  %v6051_v59 = vld [vmem:[%s7776_s1 + $0x10] sm:$0xff]  ;;  %v1373_v60 = vld [vmem:[%s7778_s3 + $0x28] sm:$0xff] }
 0x144   : > { %4084 = vmatpush1.bf16.msra.mxu0 %v5882_v13  ;;  %4116 = vmatpush1.bf16.msra.mxu1 %v5884_v14  ;;  %v6058_v13 = vpack.c.bf16 %v1373_v60, %v1369_v56  ;;  %v1371_v14 = vld [vmem:[%s7778_s3 + $0x18] sm:$0xff]  ;;  %v1398_v56 = vld [vmem:[%s7778_s3 + $0xf0] sm:$0xff] }
 0x145   : > { %1226 = vmatprep.subr.mxu0 %v6031_v44  ;;  %1297 = vmatprep.subr.mxu1 %v6036_v45  ;;  %v6069_v58 = vpack.c.bf16 %v1375_v52, %v1371_v14  ;;  %v1401_v14 = vld [vmem:[%s7778_s3 + $0x108] sm:$0xff] }
 0x146   : > { %v1405_v52 = vld [vmem:[%s7778_s3 + $0x128] sm:$0xff] }
 0x1f6   : > { %v732_v7 = vpop.f32.mrb[2].mxu0  ;;  %v803_v8 = vpop.f32.mrb[2].mxu1 }
 0x1f7   : > { %v5209_v11 = vadd.f32 %v732_v7, %v5944_v25  ;;  %v734_v16 = vpop.f32.mrb[3].mxu0  ;;  %v805_v20 = vpop.f32.mrb[3].mxu1  ;;  %v5211_v33 = vadd.f32 %v803_v8, %v5956_v35  ;;  %v1382_v7 = vld [vmem:[%s7778_s3 + $0x70] sm:$0xff]  ;;  %v6121_v8 = vpack.c.bf16 %v1380_v48, %v1376_v46  ;;  %v6232_v46 = vpack.c.bf16 %v1406_v41, %v1402_v43  ;;  %v1409_v48 = vld [vmem:[%s7778_s3 + $0x148] sm:$0xff]  ;;  %v1427_v41 = vld [vmem:[%s7778_s3 + $0x1d8] sm:$0xff] }
 0x1f8   : > { %v5210_v21 = vadd.f32 %v734_v16, %v5950_v5  ;;  %v5212_v34 = vadd.f32 %v805_v20, %v5964_v51  ;;  %v1385_v16 = vld [vmem:[%s7778_s3 + $0x88] sm:$0xff] }
 0x1f9   : > { %v812_v26 = vmul.f32 0.5, %v5209_v11  ;;  %v6123_v11 = vpack.c.bf16 %v1382_v7, %v1378_v3  ;;  %v1389_v20 = vld [vmem:[%s7778_s3 + $0xa8] sm:$0xff]  ;;  %v1411_v7 = vld [vmem:[%s7778_s3 + $0x158] sm:$0xff] }
 0x1fa   : > { %v816_v29 = vmul.f32 0.5, %v5210_v21  ;;  %v821_v38 = vmul.f32 0.5, %v5212_v34  ;;  %v1387_v21 = vld [vmem:[%s7778_s3 + $0x98] sm:$0xff]  ;;  %v1388_v34 = vld [vmem:[%s7778_s3 + $0xa0] sm:$0xff]  ;;  %v1413_v3 = vld [vmem:[%s7778_s3 + $0x168] sm:$0xff] }
 0x1fb   : > { %5345 = vtanh.f32 %v812_v26  ;;  %v6136_v26 = vpack.c.bf16 %v1389_v20, %v1385_v16  ;;  %v6244_v16 = vpack.c.bf16 %v1413_v3, %v1409_v48  ;;  %v1415_v20 = vld [vmem:[%s7778_s3 + $0x178] sm:$0xff]  ;;  %v1429_v43 = vld [vmem:[%s7778_s3 + $0x1e8] sm:$0xff] }
 0x1fc   : > { %5347 = vtanh.f32 %v816_v29  ;;  %v1391_v29 = vld [vmem:[%s7778_s3 + $0xb8] sm:$0xff] }
 0x1fd   : > { %5349 = vtanh.f32 %v5211_v33  ;;  %v1384_v33 = vld [vmem:[%s7778_s3 + $0x80] sm:$0xff]  ;;  %v1431_v3 = vld [vmem:[%s7778_s3 + $0x1f8] sm:$0xff] }
 0x1fe   : > { %5351 = vtanh.f32 %v821_v38  ;;  %v6148_v38 = vpack.c.bf16 %v1391_v29, %v1387_v21  ;;  %v1408_v21 = vld [vmem:[%s7778_s3 + $0x140] sm:$0xff] }
 0x1ff   : > { %v1412_v29 = vld [vmem:[%s7778_s3 + $0x160] sm:$0xff] }
 0x205   : > { %v5346_v42 = vpop.eup %5345 }
 0x206   : > { %v5348_v49 = vpop.eup %5347  ;;  %v814_v50 = vmul.f32 0.5, %v5346_v42  ;;  %v6150_v42 = vpack.c.bf16 %v1388_v34, %v1384_v33  ;;  %v6256_v33 = vpack.c.bf16 %v1415_v20, %v1411_v7  ;;  %v6258_v34 = vpack.c.bf16 %v1412_v29, %v1408_v21  ;;  %v1424_v7 = vld [vmem:[%s7778_s3 + $0x1c0] sm:$0xff] }
 0x207   : > { %v818_v53 = vmul.f32 0.5, %v5348_v49  ;;  %v5350_v61 = vpop.eup %5349  ;;  %v1386_v49 = vld [vmem:[%s7778_s3 + $0x90] sm:$0xff]  ;;  %v1428_v20 = vld [vmem:[%s7778_s3 + $0x1e0] sm:$0xff]  ;;  %v6328_v21 = vpack.c.bf16 %v1431_v3, %v1427_v41 }
 0x208   : > { %v815_v54 = vadd.f32 0.5, %v814_v50  ;;  %v5352_v23 = vpop.eup %5351  ;;  %v1390_v50 = vld [vmem:[%s7778_s3 + $0xb0] sm:$0xff]  ;;  %v6330_v29 = vpack.c.bf16 %v1428_v20, %v1424_v7 }
 0x209   : > { %v819_v62 = vadd.f32 0.5, %v818_v53  ;;  %v823_v27 = vmul.f32 0.5, %v5352_v23  ;;  %v6160_v53 = vpack.c.bf16 %v1390_v50, %v1386_v49  ;;  %v1392_v23 = vld [vmem:[%s7778_s3 + $0xc0] sm:$0xff]  ;;  %v1410_v49 = vld [vmem:[%s7778_s3 + $0x150] sm:$0xff] }
 0x20a   : > { %v826_v9 = vmul.f32 %v5350_v61, %v815_v54  ;;  %v1393_v54 = vld [vmem:[%s7778_s3 + $0xc8] sm:$0xff]  ;;  %v1414_v50 = vld [vmem:[%s7778_s3 + $0x170] sm:$0xff] }
 0x20b   : > { %v825_v10 = vmul.f32 %v819_v62, %v5968_v36  ;;  %v824_v28 = vadd.f32 0.5, %v823_v27  ;;  %v6095_v36 = vpack.c.bf16 %v1381_v31, %v1377_v6  ;;  %v1397_v61 = vld [vmem:[%s7778_s3 + $0xe8] sm:$0xff]  ;;  %v1395_v62 = vld [vmem:[%s7778_s3 + $0xd8] sm:$0xff]  ;;  %v1396_v27 = vld [vmem:[%s7778_s3 + $0xe0] sm:$0xff]  ;;  %v6220_v6 = vpack.c.bf16 %v1407_v0, %v1403_v55 }
 0x20c   : > { %v6222_v31 = vpack.c.bf16 %v1404_v4, %v1400_v12  ;;  %v1418_v55 = vld [vmem:[%s7778_s3 + $0x190] sm:$0xff]  ;;  %v1425_v4 = vld [vmem:[%s7778_s3 + $0x1c8] sm:$0xff] }
 0x20d   : > { %v6022_v22 = vadd.f32 %v826_v9, %v825_v10  ;;  %v6172_v9 = vpack.c.bf16 %v1397_v61, %v1393_v54  ;;  %v1399_v10 = vld [vmem:[%s7778_s3 + $0xf8] sm:$0xff]  ;;  %v6268_v54 = vpack.c.bf16 %v1414_v50, %v1410_v49  ;;  %v1417_v61 = vld [vmem:[%s7778_s3 + $0x188] sm:$0xff]  ;;  %v1422_v0 = vld [vmem:[%s7778_s3 + $0x1b0] sm:$0xff]  ;;  %v6316_v48 = vpack.c.bf16 %v1429_v43, %v1425_v4 }
 0x20e   : > { %v6304_v12 = vpack.c.bf16 %v1422_v0, %v1418_v55  ;;  %v1426_v49 = vld [vmem:[%s7778_s3 + $0x1d0] sm:$0xff] }
 0x20f   : > { %5353 = vtanh.f32 %v6022_v22  ;;  %v1430_v50 = vld [vmem:[%s7778_s3 + $0x1f0] sm:$0xff] }
 0x219   : > { %v5354_v39 = vpop.eup %5353 }
 0x21a   : > { %v829_v40 = vmul.f32 %v5354_v39, %v824_v28  ;;  %v6184_v28 = vpack.c.bf16 %v1399_v10, %v1395_v62  ;;  %v6186_v39 = vpack.c.bf16 %v1396_v27, %v1392_v23  ;;  %v1421_v62 = vld [vmem:[%s7778_s3 + $0x1a8] sm:$0xff]  ;;  %v1419_v10 = vld [vmem:[%s7778_s3 + $0x198] sm:$0xff] }
 0x21b   : > { %v6280_v23 = vpack.c.bf16 %v1421_v62, %v1417_v61  ;;  %v1423_v27 = vld [vmem:[%s7778_s3 + $0x1b8] sm:$0xff]  ;;  %v6340_v61 = vpack.c.bf16 %v1430_v50, %v1426_v49 }
 0x21c   : > { %3890 = vst [vmem:[%s5973_s25 + $0x8] sm:$0xff] %v829_v40  ;;  %1114 = vmatmul.mubr.f32.vlgmr.msra.gmra.mrb[4].mxu0 %v829_v40  ;;  %1185 = vmatmul.mubr.f32.vlgmr.msra.gmra.mrb[4].mxu1 %v829_v40  ;;  %v1394_v40 = vld [vmem:[%s7778_s3 + $0xd0] sm:$0xff] }
 0x21d   : > { %1290 = vmatprep.mubr.f32.mxu0 %v5483_v15  ;;  %1361 = vmatprep.mubr.f32.mxu1 %v5483_v15  ;;  %v6196_v60 = vpack.c.bf16 %v1398_v56, %v1394_v40  ;;  %v1416_v40 = vld [vmem:[%s7778_s3 + $0x180] sm:$0xff] }
 0x21e   : > { %1227 = vmatpush1.msra.mxu0 %v6045_v57  ;;  %1298 = vmatpush1.msra.mxu1 %v6051_v59  ;;  %v1420_v56 = vld [vmem:[%s7778_s3 + $0x1a0] sm:$0xff] }
 0x21f   : > { %4118 = vmatprep.subr.bf16.mxu0 %v6058_v13  ;;  %4150 = vmatprep.subr.bf16.mxu1 %v6069_v58 }
 0x220   : > { %3899 = vmatmul.mubr.msk.f32.vlgmr.msra.gmra.mrb[6].mxu0 %vm73_vm0, %v3898_v63  ;;  %3900 = vmatmul.mubr.msk.f32.vlgmr.msra.gmra.mrb[6].mxu1 %vm73_vm0, %v3898_v63  ;;  %v6208_v63 = vpack.c.bf16 %v1405_v52, %v1401_v14  ;;  %v6292_v14 = vpack.c.bf16 %v1423_v27, %v1419_v10  ;;  %v6294_v52 = vpack.c.bf16 %v1420_v56, %v1416_v40 }
 0x221   : > { %4120 = vmatpush1.bf16.msra.mxu0 %v6080_v17  ;;  %1496 = vmatprep.mubr.f32.mxu0 %v5483_v15 }
 0x222   : > { %4152 = vmatpush1.bf16.msra.mxu1 %v6093_v32  ;;  %4122 = vmatprep.subr.bf16.mxu0 %v6095_v36 }
 0x223   : > { %4154 = vmatprep.subr.bf16.mxu1 %v6107_v47  ;;  %1567 = vmatprep.mubr.f32.mxu1 %v5483_v15 }
 0x225   : > { %4124 = vmatpush1.bf16.msra.mxu0 %v6121_v8 }
 0x226   : > { %4156 = vmatpush1.bf16.msra.mxu1 %v6123_v11  ;;  %4126 = vmatprep.subr.bf16.mxu0 %v6136_v26 }
 0x227   : > { %4158 = vmatprep.subr.bf16.mxu1 %v6148_v38 }
 0x229   : > { %4128 = vmatpush1.bf16.msra.mxu0 %v6150_v42 }
 0x22a   : > { %4160 = vmatpush1.bf16.msra.mxu1 %v6160_v53  ;;  %4130 = vmatprep.subr.bf16.mxu0 %v6172_v9 }
 0x22b   : > { %4162 = vmatprep.subr.bf16.mxu1 %v6184_v28 }
 0x22d   : > { %4132 = vmatpush1.bf16.msra.mxu0 %v6186_v39 }
 0x22e   : > { %4164 = vmatpush1.bf16.msra.mxu1 %v6196_v60  ;;  %4134 = vmatprep.subr.bf16.mxu0 %v6208_v63 }
 0x22f   : > { %4166 = vmatprep.subr.bf16.mxu1 %v6220_v6 }
 0x231   : > { %4136 = vmatpush1.bf16.msra.mxu0 %v6222_v31 }
 0x232   : > { %4168 = vmatpush1.bf16.msra.mxu1 %v6232_v46  ;;  %4138 = vmatprep.subr.bf16.mxu0 %v6244_v16 }
 0x233   : > { %4170 = vmatprep.subr.bf16.mxu1 %v6256_v33 }
 0x235   : > { %4140 = vmatpush1.bf16.msra.mxu0 %v6258_v34 }
 0x236   : > { %4172 = vmatpush1.bf16.msra.mxu1 %v6268_v54  ;;  %4142 = vmatprep.subr.bf16.mxu0 %v6280_v23 }
 0x237   : > { %4174 = vmatprep.subr.bf16.mxu1 %v6292_v14 }
 0x239   : > { %4144 = vmatpush1.bf16.msra.mxu0 %v6294_v52 }
 0x23a   : > { %4176 = vmatpush1.bf16.msra.mxu1 %v6304_v12  ;;  %4146 = vmatprep.subr.bf16.mxu0 %v6316_v48 }
 0x23b   : > { %4178 = vmatprep.subr.bf16.mxu1 %v6328_v21 }
 0x23d   : > { %4148 = vmatpush1.bf16.msra.mxu0 %v6330_v29 }
 0x23e   : > { %4180 = vmatpush1.bf16.msra.mxu1 %v6340_v61  ;;  %1609 = vmatprep.subr.mxu0 %v6031_v44 }
 0x23f   : > { %1680 = vmatprep.subr.mxu1 %v6036_v45 }
 0x2ef   : > { %v1115_v62 = vpop.f32.mrb[4].mxu0  ;;  %v1186_v10 = vpop.f32.mrb[4].mxu1 }
 0x2f0   : > { %v5213_v27 = vadd.f32 %v1115_v62, %v5944_v25  ;;  %v1117_v40 = vpop.f32.mrb[5].mxu0  ;;  %v1188_v56 = vpop.f32.mrb[5].mxu1  ;;  %v5215_v43 = vadd.f32 %v1186_v10, %v5956_v35 }
 0x2f1   : > { %v5214_v55 = vadd.f32 %v1117_v40, %v5950_v5  ;;  %v5216_v41 = vadd.f32 %v1188_v56, %v5964_v51 }
 0x2f2   : > { %v1195_v0 = vmul.f32 0.5, %v5213_v27 }
 0x2f3   : > { %v1199_v4 = vmul.f32 0.5, %v5214_v55  ;;  %v1204_v44 = vmul.f32 0.5, %v5216_v41 }
 0x2f4   : > { %5355 = vtanh.f32 %v1195_v0 }
 0x2f5   : > { %5357 = vtanh.f32 %v1199_v4 }
 0x2f6   : > { %5359 = vtanh.f32 %v5215_v43 }
 0x2f7   : > { %5361 = vtanh.f32 %v1204_v44 }
 0x2fe   : > { %v5356_v3 = vpop.eup %5355 }
 0x2ff   : > { %v5358_v45 = vpop.eup %5357  ;;  %v1197_v7 = vmul.f32 0.5, %v5356_v3 }
 0x300   : > { %v1201_v20 = vmul.f32 0.5, %v5358_v45  ;;  %v5360_v50 = vpop.eup %5359 }
 0x301   : > { %v1198_v49 = vadd.f32 0.5, %v1197_v7  ;;  %v5362_v10 = vpop.eup %5361 }
 0x302   : > { %v1202_v62 = vadd.f32 0.5, %v1201_v20  ;;  %v1206_v56 = vmul.f32 0.5, %v5362_v10  ;;  %v6417_v10 = vmov (%p38_p0), 0.0  }
 0x303   : > { %v1209_v40 = vmul.f32 %v5360_v50, %v1198_v49 }
 0x304   : > { %v1208_v27 = vmul.f32 %v1202_v62, %v6022_v22  ;;  %v1207_v0 = vadd.f32 0.5, %v1206_v56  ;;  %v3904_v22 = vld [vmem:[%s5624_s17 + $0x20] sm:$0xff]  ;;  %s6419_s17 = smov (%p38_p0), 0  }
 0x306   : > { %v6352_v55 = vadd.f32 %v1209_v40, %v1208_v27 }
 0x308   : > { %5363 = vtanh.f32 %v6352_v55 }
 0x312   : > { %v5364_v4 = vpop.eup %5363 }
 0x313   : > { %v1212_v43 = vmul.f32 %v5364_v4, %v1207_v0 }
 0x315   : > { %3896 = vst [vmem:[%s5973_s25 + $0x10] sm:$0xff] %v1212_v43  ;;  %1497 = vmatmul.mubr.f32.vlgmr.msra.gmra.mrb[6].mxu0 %v1212_v43  ;;  %1568 = vmatmul.mubr.f32.vlgmr.msra.gmra.mrb[6].mxu1 %v1212_v43 }
 0x316   : > { %1610 = vmatpush1.msra.mxu0 %v6045_v57  ;;  %1681 = vmatpush1.msra.mxu1 %v6051_v59 }
 0x317   : > { %1673 = vmatprep.mubr.f32.mxu0 %v5483_v15  ;;  %1744 = vmatprep.mubr.f32.mxu1 %v5483_v15 }
 0x318   : > { %4182 = vmatprep.subr.bf16.mxu0 %v6058_v13  ;;  %4214 = vmatprep.subr.bf16.mxu1 %v6069_v58 }
 0x319   : > { %3905 = vmatmul.mubr.msk.f32.vlgmr.msra.gmra.mrb[8].mxu0 %vm73_vm0, %v3904_v22  ;;  %3906 = vmatmul.mubr.msk.f32.vlgmr.msra.gmra.mrb[8].mxu1 %vm73_vm0, %v3904_v22 }
 0x31a   : > { %4184 = vmatpush1.bf16.msra.mxu0 %v6080_v17  ;;  %4216 = vmatpush1.bf16.msra.mxu1 %v6093_v32 }
 0x31b   : > { %4186 = vmatprep.subr.bf16.mxu0 %v6095_v36  ;;  %4218 = vmatprep.subr.bf16.mxu1 %v6107_v47 }
 0x31c   : > { %1879 = vmatprep.mubr.f32.mxu0 %v5483_v15  ;;  %1950 = vmatprep.mubr.f32.mxu1 %v5483_v15 }
 0x31e   : > { %4188 = vmatpush1.bf16.msra.mxu0 %v6121_v8  ;;  %4220 = vmatpush1.bf16.msra.mxu1 %v6123_v11 }
 0x31f   : > { %4190 = vmatprep.subr.bf16.mxu0 %v6136_v26  ;;  %4222 = vmatprep.subr.bf16.mxu1 %v6148_v38 }
 0x322   : > { %4192 = vmatpush1.bf16.msra.mxu0 %v6150_v42  ;;  %4224 = vmatpush1.bf16.msra.mxu1 %v6160_v53 }
 0x323   : > { %4194 = vmatprep.subr.bf16.mxu0 %v6172_v9  ;;  %4226 = vmatprep.subr.bf16.mxu1 %v6184_v28 }
 0x326   : > { %4196 = vmatpush1.bf16.msra.mxu0 %v6186_v39  ;;  %4228 = vmatpush1.bf16.msra.mxu1 %v6196_v60 }
 0x327   : > { %4198 = vmatprep.subr.bf16.mxu0 %v6208_v63  ;;  %4230 = vmatprep.subr.bf16.mxu1 %v6220_v6 }
 0x32a   : > { %4200 = vmatpush1.bf16.msra.mxu0 %v6222_v31  ;;  %4232 = vmatpush1.bf16.msra.mxu1 %v6232_v46 }
 0x32b   : > { %4202 = vmatprep.subr.bf16.mxu0 %v6244_v16  ;;  %4234 = vmatprep.subr.bf16.mxu1 %v6256_v33 }
 0x32e   : > { %4204 = vmatpush1.bf16.msra.mxu0 %v6258_v34  ;;  %4236 = vmatpush1.bf16.msra.mxu1 %v6268_v54 }
 0x32f   : > { %4206 = vmatprep.subr.bf16.mxu0 %v6280_v23  ;;  %4238 = vmatprep.subr.bf16.mxu1 %v6292_v14 }
 0x332   : > { %4208 = vmatpush1.bf16.msra.mxu0 %v6294_v52  ;;  %4240 = vmatpush1.bf16.msra.mxu1 %v6304_v12 }
 0x333   : > { %4210 = vmatprep.subr.bf16.mxu0 %v6316_v48  ;;  %4242 = vmatprep.subr.bf16.mxu1 %v6328_v21 }
 0x336   : > { %4212 = vmatpush1.bf16.msra.mxu0 %v6330_v29  ;;  %4244 = vmatpush1.bf16.msra.mxu1 %v6340_v61 }
 0x3e8   : > { %v1498_v15 = vpop.f32.mrb[6].mxu0  ;;  %v1569_v57 = vpop.f32.mrb[6].mxu1 }
 0x3e9   : > { %v5217_v59 = vadd.f32 %v1498_v15, %v5944_v25  ;;  %v1500_v13 = vpop.f32.mrb[7].mxu0  ;;  %v1571_v58 = vpop.f32.mrb[7].mxu1  ;;  %v5219_v47 = vadd.f32 %v1569_v57, %v5956_v35 }
 0x3ea   : > { %v5218_v17 = vadd.f32 %v1500_v13, %v5950_v5  ;;  %v5220_v8 = vadd.f32 %v1571_v58, %v5964_v51 }
 0x3eb   : > { %v1578_v32 = vmul.f32 0.5, %v5217_v59 }
 0x3ec   : > { %v1582_v36 = vmul.f32 0.5, %v5218_v17  ;;  %v1587_v11 = vmul.f32 0.5, %v5220_v8 }
 0x3ed   : > { %5365 = vtanh.f32 %v1578_v32 }
 0x3ee   : > { %5367 = vtanh.f32 %v1582_v36 }
 0x3ef   : > { %5369 = vtanh.f32 %v5219_v47 }
 0x3f0   : > { %5371 = vtanh.f32 %v1587_v11 }
 0x3f7   : > { %v5366_v26 = vpop.eup %5365 }
 0x3f8   : > { %v5368_v38 = vpop.eup %5367  ;;  %v1580_v42 = vmul.f32 0.5, %v5366_v26 }
 0x3f9   : > { %v1584_v53 = vmul.f32 0.5, %v5368_v38  ;;  %v5370_v28 = vpop.eup %5369 }
 0x3fa   : > { %v1581_v9 = vadd.f32 0.5, %v1580_v42  ;;  %v5372_v31 = vpop.eup %5371 }
 0x3fb   : > { %v1585_v39 = vadd.f32 0.5, %v1584_v53  ;;  %v1589_v46 = vmul.f32 0.5, %v5372_v31 }
 0x3fc   : > { %v1592_v60 = vmul.f32 %v5370_v28, %v1581_v9 }
 0x3fd   : > { %v1591_v63 = vmul.f32 %v1585_v39, %v6352_v55  ;;  %v1590_v16 = vadd.f32 0.5, %v1589_v46 }
 0x3ff   : > { %v1593_v6 = vadd.f32 %v1592_v60, %v1591_v63 }
 0x401   : > { %5373 = vtanh.f32 %v1593_v6 }
 0x40b   : > { %v5374_v33 = vpop.eup %5373 }
 0x40c   : > { %v1595_v34 = vmul.f32 %v5374_v33, %v1590_v16 }
 0x40e   : > { %3902 = vst [vmem:[%s5973_s25 + $0x18] sm:$0xff] %v1595_v34  ;;  %1880 = vmatmul.mubr.f32.vlgmr.msra.gmra.mrb[8].mxu0 %v1595_v34  ;;  %1951 = vmatmul.mubr.f32.vlgmr.msra.gmra.mrb[8].mxu1 %v1595_v34 }
 0x4e1   : > { %v1881_v54 = vpop.f32.mrb[8].mxu0  ;;  %v1952_v23 = vpop.f32.mrb[8].mxu1 }
 0x4e2   : > { %v5221_v14 = vadd.f32 %v1881_v54, %v5944_v25  ;;  %v1883_v52 = vpop.f32.mrb[9].mxu0  ;;  %v1954_v12 = vpop.f32.mrb[9].mxu1  ;;  %v5223_v61 = vadd.f32 %v1952_v23, %v5956_v35 }
 0x4e3   : > { %v5222_v48 = vadd.f32 %v1883_v52, %v5950_v5  ;;  %v5224_v41 = vadd.f32 %v1954_v12, %v5964_v51  ;;  %v6415_v51 = vmov (%p38_p0), 0.0  }
 0x4e4   : > { %v1961_v21 = vmul.f32 0.5, %v5221_v14 }
 0x4e5   : > { %v1965_v29 = vmul.f32 0.5, %v5222_v48  ;;  %v1970_v44 = vmul.f32 0.5, %v5224_v41 }
 0x4e6   : > { %5375 = vtanh.f32 %v1961_v21 }
 0x4e7   : > { %5377 = vtanh.f32 %v1965_v29 }
 0x4e8   : > { %5379 = vtanh.f32 %v5223_v61 }
 0x4e9   : > { %5381 = vtanh.f32 %v1970_v44 }
 0x4f0   : > { %v5376_v3 = vpop.eup %5375 }
 0x4f1   : > { %v5378_v45 = vpop.eup %5377  ;;  %v1963_v7 = vmul.f32 0.5, %v5376_v3 }
 0x4f2   : > { %v1967_v20 = vmul.f32 0.5, %v5378_v45  ;;  %v5380_v49 = vpop.eup %5379 }
 0x4f3   : > { %v1964_v25 = vadd.f32 0.5, %v1963_v7  ;;  %v5382_v40 = vpop.eup %5381 }
 0x4f4   : > { %v1968_v50 = vadd.f32 0.5, %v1967_v20  ;;  %v1972_v35 = vmul.f32 0.5, %v5382_v40 }
 0x4f5   : > { %v1975_v5 = vmul.f32 %v5380_v49, %v1964_v25 }
 0x4f6   : > { %v1974_v62 = vmul.f32 %v1968_v50, %v1593_v6  ;;  %v1973_v27 = vadd.f32 0.5, %v1972_v35 }
 0x4f8   : > { %v1976_v3 = vadd.f32 %v1975_v5, %v1974_v62  }
 0x4fa   : > { %5383 = vtanh.f32 %v1976_v3 }
 0x501   :  { %40 = sbr.rel (!%p38_p0) target bundleno = 4 (0x4), region = 90 }
 0x504   : > { %v5384_v55 = vpop.eup %5383 }
 0x505   : > { %v1978_v4 = vmul.f32 %v5384_v55, %v1973_v27  }
 0x507   : > { %3908 = vst [vmem:[%s5973_s25 + $0x20] sm:$0xff] %v1978_v4 }
 0x508 LB: > { %7921 = vst [vmem:[#allocation6_spill] sm:$0xff] %v5473_v51  ;;  %v1998_v1 = vld [vmem:[%s7779_s4 + $0x8] sm:$0xff]  ;;  %v2000_v0 = vld [vmem:[%s7779_s4 + $0x18] sm:$0xff]  ;;  %v1997_v22 = vld [vmem:[%s7779_s4] sm:$0xff]  ;;  %s6739_s21 = smul.u32 5, %s5481_s17  ;;  %s5481_s17 = sphi %s6419_s17, %s1986_s17   ;;  %v5477_v10 = vphi %v6417_v10, %v8193_v10   ;;  %v5473_v51 = vphi %v6415_v51, %v3769_v51  }
 0x509   : > { %v2002_v56 = vld [vmem:[%s7779_s4 + $0x28] sm:$0xff]  ;;  %v2004_v43 = vld [vmem:[%s7779_s4 + $0x38] sm:$0xff]  ;;  %v2001_v15 = vld [vmem:[%s7779_s4 + $0x20] sm:$0xff]  ;;  %s3909_s0 = smul.u32 40, %s5481_s17  ;;  %s1986_s17 = sadd.s32 1, %s5481_s17  }
 0x50a   : > { %v6439_v4 = vpack.c.bf16 %v2002_v56, %v1998_v1  ;;  %v6450_v57 = vpack.c.bf16 %v2004_v43, %v2000_v0  ;;  %v6452_v59 = vpack.c.bf16 %v2001_v15, %v1997_v22  ;;  %v1999_v13 = vld [vmem:[%s7779_s4 + $0x10] sm:$0xff]  ;;  %v2006_v17 = vld [vmem:[%s7779_s4 + $0x48] sm:$0xff]  ;;  %v2008_v47 = vld [vmem:[%s7779_s4 + $0x58] sm:$0xff]  ;;  %s1993_s1 = ssub.s32 549, %s6739_s21  ;;  %s2520_s23 = ssub.s32 548, %s6739_s21 }
 0x50b   : > { %v2003_v58 = vld [vmem:[%s7779_s4 + $0x30] sm:$0xff]  ;;  %v2010_v36 = vld [vmem:[%s7779_s4 + $0x68] sm:$0xff]  ;;  %v2012_v8 = vld [vmem:[%s7779_s4 + $0x78] sm:$0xff]  ;;  %s6799_s24 = sshll.u32 %s1993_s1, 3  ;;  %s7053_s2 = scalar_lea.vmem [#allocation2], %s3909_s0 }
 0x50c   : > { %7922 = vst [vmem:[#allocation7_spill] sm:$0xff] %v6439_v4  ;;  %7923 = vst [vmem:[#allocation8_spill] sm:$0xff] %v6450_v57  ;;  %4246 = vmatprep.subr.bf16.mxu0 %v6439_v4  ;;  %v6464_v32 = vpack.c.bf16 %v2003_v58, %v1999_v13  ;;  %4310 = vmatprep.subr.bf16.mxu1 %v6450_v57  ;;  %v6477_v11 = vpack.c.bf16 %v2010_v36, %v2006_v17  ;;  %v2005_v38 = vld [vmem:[%s7779_s4 + $0x40] sm:$0xff]  ;;  %v2007_v53 = vld [vmem:[%s7779_s4 + $0x50] sm:$0xff]  ;;  %s1995_s30 = scalar_lea.vmem [#allocation2], %s6799_s24  ;;  %s3913_s29 = sshll.u32 %s2520_s23, 3 }
 0x50d   : > { %4248 = vmatpush1.bf16.msra.mxu0 %v6452_v59  ;;  %v6479_v26 = vpack.c.bf16 %v2012_v8, %v2008_v47  ;;  %v2009_v42 = vld [vmem:[%s7779_s4 + $0x60] sm:$0xff]  ;;  %v2011_v28 = vld [vmem:[%s7779_s4 + $0x70] sm:$0xff]  ;;  %v2014_v39 = vld [vmem:[%s7779_s4 + $0x88] sm:$0xff]  ;;  %s2522_s26 = scalar_lea.vmem [#allocation2], %s3913_s29  ;;  %s2834_s27 = ssub.s32 547, %s6739_s21 }
 0x50e   : > { %4312 = vmatpush1.bf16.msra.mxu1 %v6464_v32  ;;  %v6491_v9 = vpack.c.bf16 %v2009_v42, %v2005_v38  ;;  %v2018_v60 = vld [vmem:[%s7779_s4 + $0xa8] sm:$0xff]  ;;  %4250 = vmatprep.subr.bf16.mxu0 %v6477_v11  ;;  %v6504_v63 = vpack.c.bf16 %v2011_v28, %v2007_v53  ;;  %v2016_v31 = vld [vmem:[%s7779_s4 + $0x98] sm:$0xff]  ;;  %v2013_v16 = vld [vmem:[%s7779_s4 + $0x80] sm:$0xff]  ;;  %s3916_s28 = sshll.u32 %s2834_s27, 3  ;;  %s3148_s10 = ssub.s32 546, %s6739_s21 }
 0x50f   : > { %4314 = vmatprep.subr.bf16.mxu1 %v6479_v26  ;;  %v6506_v6 = vpack.c.bf16 %v2018_v60, %v2014_v39  ;;  %v2020_v46 = vld [vmem:[%s7779_s4 + $0xb8] sm:$0xff]  ;;  %v2017_v34 = vld [vmem:[%s7779_s4 + $0xa0] sm:$0xff]  ;;  %v2015_v54 = vld [vmem:[%s7779_s4 + $0x90] sm:$0xff]  ;;  %s3919_s11 = sshll.u32 %s3148_s10, 3  ;;  %s3462_s13 = ssub.s32 545, %s6739_s21 }
 0x510   : > { %v6517_v33 = vpack.c.bf16 %v2020_v46, %v2016_v31  ;;  %v2019_v23 = vld [vmem:[%s7779_s4 + $0xb0] sm:$0xff]  ;;  %v6529_v14 = vpack.c.bf16 %v2017_v34, %v2013_v16  ;;  %v2022_v52 = vld [vmem:[%s7779_s4 + $0xc8] sm:$0xff]  ;;  %v2024_v48 = vld [vmem:[%s7779_s4 + $0xd8] sm:$0xff]  ;;  %s3150_s12 = scalar_lea.vmem [#allocation2], %s3919_s11  ;;  %s3922_s24 = sshll.u32 %s3462_s13, 3 }
 0x511   : > { %4252 = vmatpush1.bf16.msra.mxu0 %v6491_v9  ;;  %v2026_v12 = vld [vmem:[%s7779_s4 + $0xe8] sm:$0xff]  ;;  %v6542_v21 = vpack.c.bf16 %v2019_v23, %v2015_v54  ;;  %v2028_v61 = vld [vmem:[%s7779_s4 + $0xf8] sm:$0xff]  ;;  %v2021_v41 = vld [vmem:[%s7779_s4 + $0xc0] sm:$0xff]  ;;  %s3464_s14 = scalar_lea.vmem [#allocation2], %s3922_s24  ;;  %p1983_p1 = scmp.ge.s32.totalorder %s1986_s17, 110  }
 0x512   : > { %4316 = vmatpush1.bf16.msra.mxu1 %v6504_v63  ;;  %4254 = vmatprep.subr.bf16.mxu0 %v6506_v6  ;;  %v6544_v29 = vpack.c.bf16 %v2026_v12, %v2022_v52  ;;  %v2025_v44 = vld [vmem:[%s7779_s4 + $0xe0] sm:$0xff]  ;;  %v6556_v3 = vpack.c.bf16 %v2028_v61, %v2024_v48  ;;  %v2023_v45 = vld [vmem:[%s7779_s4 + $0xd0] sm:$0xff]  ;;  %v2030_v20 = vld [vmem:[%s7779_s4 + $0x108] sm:$0xff]  ;;  %vm3790_vm1 = vcmask (%p1983_p1), 7168  }
 0x513   : > { %4318 = vmatprep.subr.bf16.mxu1 %v6517_v33  ;;  %v2027_v7 = vld [vmem:[%s7779_s4 + $0xf0] sm:$0xff]  ;;  %v2034_v25 = vld [vmem:[%s7779_s4 + $0x128] sm:$0xff]  ;;  %v2032_v49 = vld [vmem:[%s7779_s4 + $0x118] sm:$0xff]  ;;  %v6577_v5 = vpack.c.bf16 %v2025_v44, %v2021_v41 }
 0x514   : > { %v2036_v50 = vld [vmem:[%s7779_s4 + $0x138] sm:$0xff]  ;;  %v6581_v62 = vpack.c.bf16 %v2027_v7, %v2023_v45  ;;  %v6583_v40 = vpack.c.bf16 %v2034_v25, %v2030_v20  ;;  %v2029_v35 = vld [vmem:[%s7779_s4 + $0x100] sm:$0xff]  ;;  %v2031_v55 = vld [vmem:[%s7779_s4 + $0x110] sm:$0xff] }
 0x515   : > { %4256 = vmatpush1.bf16.msra.mxu0 %v6529_v14  ;;  %v2033_v27 = vld [vmem:[%s7779_s4 + $0x120] sm:$0xff]  ;;  %v6595_v1 = vpack.c.bf16 %v2036_v50, %v2032_v49  ;;  %v2035_v56 = vld [vmem:[%s7779_s4 + $0x130] sm:$0xff]  ;;  %v2038_v0 = vld [vmem:[%s7779_s4 + $0x148] sm:$0xff] }
 0x516   : > { %4320 = vmatpush1.bf16.msra.mxu1 %v6542_v21  ;;  %4258 = vmatprep.subr.bf16.mxu0 %v6544_v29  ;;  %v2042_v43 = vld [vmem:[%s7779_s4 + $0x168] sm:$0xff]  ;;  %v2040_v22 = vld [vmem:[%s7779_s4 + $0x158] sm:$0xff]  ;;  %v6613_v13 = vpack.c.bf16 %v2033_v27, %v2029_v35  ;;  %v6617_v58 = vpack.c.bf16 %v2035_v56, %v2031_v55  ;;  %v2037_v36 = vld [vmem:[%s7779_s4 + $0x140] sm:$0xff] }
 0x517   : > { %4322 = vmatprep.subr.bf16.mxu1 %v6556_v3  ;;  %v2044_v15 = vld [vmem:[%s7779_s4 + $0x178] sm:$0xff]  ;;  %v6619_v17 = vpack.c.bf16 %v2042_v43, %v2038_v0  ;;  %v2041_v47 = vld [vmem:[%s7779_s4 + $0x160] sm:$0xff]  ;;  %v2039_v8 = vld [vmem:[%s7779_s4 + $0x150] sm:$0xff] }
 0x518   : > { %v6631_v38 = vpack.c.bf16 %v2044_v15, %v2040_v22  ;;  %v2043_v42 = vld [vmem:[%s7779_s4 + $0x170] sm:$0xff]  ;;  %v2046_v53 = vld [vmem:[%s7779_s4 + $0x188] sm:$0xff]  ;;  %v2048_v39 = vld [vmem:[%s7779_s4 + $0x198] sm:$0xff]  ;;  %v6649_v31 = vpack.c.bf16 %v2041_v47, %v2037_v36 }
 0x519   : > { %4260 = vmatpush1.bf16.msra.mxu0 %v6577_v5  ;;  %v2050_v28 = vld [vmem:[%s7779_s4 + $0x1a8] sm:$0xff]  ;;  %v2052_v60 = vld [vmem:[%s7779_s4 + $0x1b8] sm:$0xff]  ;;  %v6653_v46 = vpack.c.bf16 %v2043_v42, %v2039_v8  ;;  %v2045_v34 = vld [vmem:[%s7779_s4 + $0x180] sm:$0xff] }
 0x51a   : > { %4324 = vmatpush1.bf16.msra.mxu1 %v6581_v62  ;;  %4262 = vmatprep.subr.bf16.mxu0 %v6583_v40  ;;  %v6655_v16 = vpack.c.bf16 %v2050_v28, %v2046_v53  ;;  %v2049_v54 = vld [vmem:[%s7779_s4 + $0x1a0] sm:$0xff]  ;;  %v2047_v23 = vld [vmem:[%s7779_s4 + $0x190] sm:$0xff]  ;;  %v6667_v52 = vpack.c.bf16 %v2052_v60, %v2048_v39  ;;  %v2054_v48 = vld [vmem:[%s7779_s4 + $0x1c8] sm:$0xff] }
 0x51b   : > { %4326 = vmatprep.subr.bf16.mxu1 %v6595_v1  ;;  %v2051_v12 = vld [vmem:[%s7779_s4 + $0x1b0] sm:$0xff]  ;;  %v2058_v61 = vld [vmem:[%s7779_s4 + $0x1e8] sm:$0xff]  ;;  %v2056_v41 = vld [vmem:[%s7779_s4 + $0x1d8] sm:$0xff]  ;;  %v6685_v45 = vpack.c.bf16 %v2049_v54, %v2045_v34 }
 0x51c   : > { %v2060_v44 = vld [vmem:[%s7779_s4 + $0x1f8] sm:$0xff]  ;;  %v6689_v7 = vpack.c.bf16 %v2051_v12, %v2047_v23  ;;  %v6691_v20 = vpack.c.bf16 %v2058_v61, %v2054_v48  ;;  %v2053_v25 = vld [vmem:[%s7779_s4 + $0x1c0] sm:$0xff]  ;;  %v2055_v50 = vld [vmem:[%s7779_s4 + $0x1d0] sm:$0xff] }
 0x51d   : > { %4264 = vmatpush1.bf16.msra.mxu0 %v6613_v13  ;;  %v2057_v49 = vld [vmem:[%s7779_s4 + $0x1e0] sm:$0xff]  ;;  %v6703_v35 = vpack.c.bf16 %v2060_v44, %v2056_v41  ;;  %v2059_v27 = vld [vmem:[%s7779_s4 + $0x1f0] sm:$0xff]  ;;  %v2062_v55 = vld [vmem:[%s7779_s4 + $0x208] sm:$0xff] }
 0x51e   : > { %4328 = vmatpush1.bf16.msra.mxu1 %v6617_v58  ;;  %4266 = vmatprep.subr.bf16.mxu0 %v6619_v17  ;;  %v2066_v56 = vld [vmem:[%s7779_s4 + $0x228] sm:$0xff]  ;;  %v2064_v0 = vld [vmem:[%s7779_s4 + $0x218] sm:$0xff]  ;;  %v6721_v22 = vpack.c.bf16 %v2057_v49, %v2053_v25  ;;  %v6725_v15 = vpack.c.bf16 %v2059_v27, %v2055_v50  ;;  %v2061_v47 = vld [vmem:[%s7779_s4 + $0x200] sm:$0xff] }
 0x51f   : > { %4330 = vmatprep.subr.bf16.mxu1 %v6631_v38  ;;  %v2068_v43 = vld [vmem:[%s7779_s4 + $0x238] sm:$0xff]  ;;  %v6727_v36 = vpack.c.bf16 %v2066_v56, %v2062_v55  ;;  %v2065_v8 = vld [vmem:[%s7779_s4 + $0x220] sm:$0xff]  ;;  %v2063_v42 = vld [vmem:[%s7779_s4 + $0x210] sm:$0xff] }
 0x520   : > { %v6742_v53 = vpack.c.bf16 %v2068_v43, %v2064_v0  ;;  %v2067_v28 = vld [vmem:[%s7779_s4 + $0x230] sm:$0xff]  ;;  %v2070_v39 = vld [vmem:[%s7779_s4 + $0x248] sm:$0xff]  ;;  %v2072_v34 = vld [vmem:[%s7779_s4 + $0x258] sm:$0xff]  ;;  %v6760_v23 = vpack.c.bf16 %v2065_v8, %v2061_v47 }
 0x521   : > { %4268 = vmatpush1.bf16.msra.mxu0 %v6649_v31  ;;  %v2074_v60 = vld [vmem:[%s7779_s4 + $0x268] sm:$0xff]  ;;  %v2076_v54 = vld [vmem:[%s7779_s4 + $0x278] sm:$0xff]  ;;  %v6764_v12 = vpack.c.bf16 %v2067_v28, %v2063_v42  ;;  %v2069_v61 = vld [vmem:[%s7779_s4 + $0x240] sm:$0xff] }
 0x522   : > { %4332 = vmatpush1.bf16.msra.mxu1 %v6653_v46  ;;  %4270 = vmatprep.subr.bf16.mxu0 %v6655_v16  ;;  %v6766_v48 = vpack.c.bf16 %v2074_v60, %v2070_v39  ;;  %v2073_v41 = vld [vmem:[%s7779_s4 + $0x260] sm:$0xff]  ;;  %v2071_v44 = vld [vmem:[%s7779_s4 + $0x250] sm:$0xff]  ;;  %v6779_v25 = vpack.c.bf16 %v2076_v54, %v2072_v34  ;;  %v2078_v50 = vld [vmem:[%s7779_s4 + $0x288] sm:$0xff] }
 0x523   : > { %4334 = vmatprep.subr.bf16.mxu1 %v6667_v52  ;;  %v2075_v49 = vld [vmem:[%s7779_s4 + $0x270] sm:$0xff]  ;;  %v2082_v27 = vld [vmem:[%s7779_s4 + $0x2a8] sm:$0xff]  ;;  %v2080_v55 = vld [vmem:[%s7779_s4 + $0x298] sm:$0xff]  ;;  %v6797_v0 = vpack.c.bf16 %v2073_v41, %v2069_v61 }
 0x524   : > { %v2084_v56 = vld [vmem:[%s7779_s4 + $0x2b8] sm:$0xff]  ;;  %v6803_v43 = vpack.c.bf16 %v2075_v49, %v2071_v44  ;;  %v6805_v47 = vpack.c.bf16 %v2082_v27, %v2078_v50  ;;  %v2077_v8 = vld [vmem:[%s7779_s4 + $0x280] sm:$0xff]  ;;  %v2079_v28 = vld [vmem:[%s7779_s4 + $0x290] sm:$0xff] }
 0x525   : > { %4272 = vmatpush1.bf16.msra.mxu0 %v6685_v45  ;;  %v2081_v42 = vld [vmem:[%s7779_s4 + $0x2a0] sm:$0xff]  ;;  %v6817_v39 = vpack.c.bf16 %v2084_v56, %v2080_v55  ;;  %v2083_v60 = vld [vmem:[%s7779_s4 + $0x2b0] sm:$0xff]  ;;  %v2086_v34 = vld [vmem:[%s7779_s4 + $0x2c8] sm:$0xff] }
 0x526   : > { %4336 = vmatpush1.bf16.msra.mxu1 %v6689_v7  ;;  %4274 = vmatprep.subr.bf16.mxu0 %v6691_v20  ;;  %v2090_v54 = vld [vmem:[%s7779_s4 + $0x2e8] sm:$0xff]  ;;  %v2088_v61 = vld [vmem:[%s7779_s4 + $0x2d8] sm:$0xff]  ;;  %v6835_v44 = vpack.c.bf16 %v2081_v42, %v2077_v8  ;;  %v2085_v49 = vld [vmem:[%s7779_s4 + $0x2c0] sm:$0xff]  ;;  %v6842_v50 = vpack.c.bf16 %v2083_v60, %v2079_v28 }
 0x527   : > { %4338 = vmatprep.subr.bf16.mxu1 %v6703_v35  ;;  %v2092_v41 = vld [vmem:[%s7779_s4 + $0x2f8] sm:$0xff]  ;;  %v6844_v27 = vpack.c.bf16 %v2090_v54, %v2086_v34  ;;  %v2089_v55 = vld [vmem:[%s7779_s4 + $0x2e0] sm:$0xff]  ;;  %v2087_v56 = vld [vmem:[%s7779_s4 + $0x2d0] sm:$0xff] }
 0x528   : > { %7924 = vst [vmem:[#allocation9_spill] sm:$0xff] %v6842_v50  ;;  %v2091_v8 = vld [vmem:[%s7779_s4 + $0x2f0] sm:$0xff]  ;;  %v6856_v42 = vpack.c.bf16 %v2092_v41, %v2088_v61  ;;  %v2094_v28 = vld [vmem:[%s7779_s4 + $0x308] sm:$0xff]  ;;  %v1996_v34 = vld [vmem:[%s1995_s30] sm:$0xff]  ;;  %v6872_v61 = vpack.c.bf16 %v2089_v55, %v2085_v49  ;;  %s2836_s30 = scalar_lea.vmem [#allocation2], %s3916_s28 }
 0x529   : > { %4276 = vmatpush1.bf16.msra.mxu0 %v6721_v22  ;;  %7925 = vst [vmem:[#allocation10_spill] sm:$0xff] %v6844_v27  ;;  %v2098_v60 = vld [vmem:[%s7779_s4 + $0x328] sm:$0xff]  ;;  %v2096_v54 = vld [vmem:[%s7779_s4 + $0x318] sm:$0xff]  ;;  %2210 = vmatprep.mubr.f32.mxu0 %v1996_v34  ;;  %v6876_v41 = vpack.c.bf16 %v2091_v8, %v2087_v56  ;;  %v2093_v24 = vld [vmem:[%s7779_s4 + $0x300] sm:$0xff] }
 0x52a   : > { %4340 = vmatpush1.bf16.msra.mxu1 %v6725_v15  ;;  %4278 = vmatprep.subr.bf16.mxu0 %v6727_v36  ;;  %7926 = vst [vmem:[#allocation11_spill] sm:$0xff] %v6856_v42  ;;  %v2100_v37 = vld [vmem:[%s7779_s4 + $0x338] sm:$0xff]  ;;  %7927 = vst [vmem:[#allocation12_spill] sm:$0xff] %v6872_v61  ;;  %v6878_v30 = vpack.c.bf16 %v2098_v60, %v2094_v28  ;;  %v2095_v49 = vld [vmem:[%s7779_s4 + $0x310] sm:$0xff] }
 0x52b   : > { %4342 = vmatprep.subr.bf16.mxu1 %v6742_v53  ;;  %2281 = vmatprep.mubr.f32.mxu1 %v1996_v34  ;;  %7928 = vst [vmem:[#allocation13_spill] sm:$0xff] %v6876_v41  ;;  %v2097_v34 = vld [vmem:[%s7779_s4 + $0x320] sm:$0xff]  ;;  %v6890_v55 = vpack.c.bf16 %v2100_v37, %v2096_v54  ;;  %v2099_v56 = vld [vmem:[%s7779_s4 + $0x330] sm:$0xff]  ;;  %v2102_v8 = vld [vmem:[%s7779_s4 + $0x348] sm:$0xff] }
 0x52c   : > { %7929 = vst [vmem:[#allocation14_spill] sm:$0xff] %v6878_v30  ;;  %v2106_v28 = vld [vmem:[%s7779_s4 + $0x368] sm:$0xff]  ;;  %v2104_v60 = vld [vmem:[%s7779_s4 + $0x358] sm:$0xff]  ;;  %v6908_v54 = vpack.c.bf16 %v2097_v34, %v2093_v24  ;;  %v6912_v19 = vpack.c.bf16 %v2099_v56, %v2095_v49  ;;  %v2101_v2 = vld [vmem:[%s7779_s4 + $0x340] sm:$0xff] }
 0x52d   : > { %4280 = vmatpush1.bf16.msra.mxu0 %v6760_v23  ;;  %7930 = vst [vmem:[#allocation15_spill] sm:$0xff] %v6890_v55  ;;  %v2108_v37 = vld [vmem:[%s7779_s4 + $0x378] sm:$0xff]  ;;  %v6914_v51 = vpack.c.bf16 %v2106_v28, %v2102_v8  ;;  %v2105_v18 = vld [vmem:[%s7779_s4 + $0x360] sm:$0xff]  ;;  %v2103_v24 = vld [vmem:[%s7779_s4 + $0x350] sm:$0xff] }
 0x52e   : > { %4344 = vmatpush1.bf16.msra.mxu1 %v6764_v12  ;;  %4282 = vmatprep.subr.bf16.mxu0 %v6766_v48  ;;  %7931 = vst [vmem:[#allocation16_spill] sm:$0xff] %v6908_v54  ;;  %7932 = vst [vmem:[#allocation17_spill] sm:$0xff] %v6912_v19  ;;  %v6926_v34 = vpack.c.bf16 %v2108_v37, %v2104_v60  ;;  %v2107_v49 = vld [vmem:[%s7779_s4 + $0x370] sm:$0xff]  ;;  %v2110_v56 = vld [vmem:[%s7779_s4 + $0x388] sm:$0xff]  ;;  %v6944_v37 = vpack.c.bf16 %v2105_v18, %v2101_v2 }
 0x52f   : > { %4346 = vmatprep.subr.bf16.mxu1 %v6779_v25  ;;  %7933 = vst [vmem:[#allocation18_spill] sm:$0xff] %v6914_v51  ;;  %v2114_v8 = vld [vmem:[%s7779_s4 + $0x3a8] sm:$0xff]  ;;  %v2112_v28 = vld [vmem:[%s7779_s4 + $0x398] sm:$0xff]  ;;  %v2111_v2 = vld [vmem:[%s7779_s4 + $0x390] sm:$0xff] }
 0x530   : > { %7934 = vst [vmem:[#allocation19_spill] sm:$0xff] %v6926_v34  ;;  %v2116_v60 = vld [vmem:[%s7779_s4 + $0x3b8] sm:$0xff]  ;;  %7935 = vst [vmem:[#allocation20_spill] sm:$0xff] %v6944_v37 }
 0x531   : > { %4284 = vmatpush1.bf16.msra.mxu0 %v6797_v0  ;;  %v6962_v18 = vpack.c.bf16 %v2116_v60, %v2112_v28  ;;  %v2124_v28 = vld [vmem:[%s7779_s4 + $0x3f8] sm:$0xff] }
 0x532   : > { %4348 = vmatpush1.bf16.msra.mxu1 %v6803_v43  ;;  %4286 = vmatprep.subr.bf16.mxu0 %v6805_v47 }
 0x533   : > { %4350 = vmatprep.subr.bf16.mxu1 %v6817_v39  ;;  %7938 = vst [vmem:[#allocation23_spill] sm:$0xff] %v6962_v18 }
 0x535   : > { %4288 = vmatpush1.bf16.msra.mxu0 %v6835_v44 }
 0x536   : > { %4352 = vmatpush1.bf16.msra.mxu1 %v6842_v50  ;;  %4290 = vmatprep.subr.bf16.mxu0 %v6844_v27 }
 0x537   : > { %4354 = vmatprep.subr.bf16.mxu1 %v6856_v42 }
 0x539   : > { %4292 = vmatpush1.bf16.msra.mxu0 %v6872_v61  ;;  %v2113_v61 = vld [vmem:[%s7779_s4 + $0x3a0] sm:$0xff] }
 0x53a   : > { %4356 = vmatpush1.bf16.msra.mxu1 %v6876_v41  ;;  %4294 = vmatprep.subr.bf16.mxu0 %v6878_v30  ;;  %v6950_v30 = vpack.c.bf16 %v2114_v8, %v2110_v56  ;;  %v2109_v41 = vld [vmem:[%s7779_s4 + $0x380] sm:$0xff]  ;;  %v2122_v56 = vld [vmem:[%s7779_s4 + $0x3e8] sm:$0xff]  ;;  %v2120_v8 = vld [vmem:[%s7779_s4 + $0x3d8] sm:$0xff] }
 0x53b   : > { %4358 = vmatprep.subr.bf16.mxu1 %v6890_v55  ;;  %v6948_v55 = vpack.c.bf16 %v2107_v49, %v2103_v24  ;;  %v2115_v24 = vld [vmem:[%s7779_s4 + $0x3b0] sm:$0xff]  ;;  %v2118_v49 = vld [vmem:[%s7779_s4 + $0x3c8] sm:$0xff]  ;;  %v6980_v60 = vpack.c.bf16 %v2113_v61, %v2109_v41  ;;  %v6999_v41 = vpack.c.bf16 %v2124_v28, %v2120_v8  ;;  %v2295_v8 = vld [vmem:[%s7781_s6 + $0x38] sm:$0xff] }
 0x53c   : > { %7937 = vst [vmem:[#allocation22_spill] sm:$0xff] %v6950_v30  ;;  %v2119_v61 = vld [vmem:[%s7779_s4 + $0x3d0] sm:$0xff] }
 0x53d   : > { %4296 = vmatpush1.bf16.msra.mxu0 %v6908_v54  ;;  %7936 = vst [vmem:[#allocation21_spill] sm:$0xff] %v6948_v55  ;;  %7939 = vst [vmem:[#allocation24_spill] sm:$0xff] %v6980_v60  ;;  %v2121_v54 = vld [vmem:[%s7779_s4 + $0x3e0] sm:$0xff] }
 0x53e   : > { %4360 = vmatpush1.bf16.msra.mxu1 %v6912_v19  ;;  %4298 = vmatprep.subr.bf16.mxu0 %v6914_v51  ;;  %v6986_v51 = vpack.c.bf16 %v2122_v56, %v2118_v49  ;;  %v2117_v19 = vld [vmem:[%s7779_s4 + $0x3c0] sm:$0xff]  ;;  %7942 = vst [vmem:[#allocation27_spill] sm:$0xff] %v6999_v41  ;;  %v2293_v49 = vld [vmem:[%s7781_s6 + $0x28] sm:$0xff]  ;;  %v2291_v56 = vld [vmem:[%s7781_s6 + $0x18] sm:$0xff] }
 0x53f   : > { %4362 = vmatprep.subr.bf16.mxu1 %v6926_v34  ;;  %v6984_v34 = vpack.c.bf16 %v2115_v24, %v2111_v2  ;;  %v2123_v2 = vld [vmem:[%s7779_s4 + $0x3f0] sm:$0xff]  ;;  %v2289_v24 = vld [vmem:[%s7781_s6 + $0x8] sm:$0xff]  ;;  %v7017_v28 = vpack.c.bf16 %v2121_v54, %v2117_v19  ;;  %v7035_v54 = vpack.c.bf16 %v2295_v8, %v2291_v56  ;;  %v2303_v56 = vld [vmem:[%s7781_s6 + $0x78] sm:$0xff] }
 0x540   : > { %7941 = vst [vmem:[#allocation26_spill] sm:$0xff] %v6986_v51  ;;  %v2290_v19 = vld [vmem:[%s7781_s6 + $0x10] sm:$0xff]  ;;  %v1992_v8 = vld [vmem:[%s7053_s2] sm:$0xff] }
 0x541   : > { %4300 = vmatpush1.bf16.msra.mxu0 %v6944_v37  ;;  %7940 = vst [vmem:[#allocation25_spill] sm:$0xff] %v6984_v34  ;;  %7943 = vst [vmem:[#allocation28_spill] sm:$0xff] %v7017_v28  ;;  %v2292_v37 = vld [vmem:[%s7781_s6 + $0x20] sm:$0xff] }
 0x542   : > { %4364 = vmatpush1.bf16.msra.mxu1 %v6948_v55  ;;  %4302 = vmatprep.subr.bf16.mxu0 %v6950_v30  ;;  %v7023_v30 = vpack.c.bf16 %v2293_v49, %v2289_v24  ;;  %v2288_v55 = vld [vmem:[%s7781_s6] sm:$0xff]  ;;  %7946 = vst [vmem:[#allocation31_spill] sm:$0xff] %v7035_v54  ;;  %v2301_v24 = vld [vmem:[%s7781_s6 + $0x68] sm:$0xff]  ;;  %v2299_v49 = vld [vmem:[%s7781_s6 + $0x58] sm:$0xff] }
 0x543   : > { %4366 = vmatprep.subr.bf16.mxu1 %v6962_v18  ;;  %v7021_v18 = vpack.c.bf16 %v2123_v2, %v2119_v61  ;;  %v2294_v61 = vld [vmem:[%s7781_s6 + $0x30] sm:$0xff]  ;;  %v2297_v2 = vld [vmem:[%s7781_s6 + $0x48] sm:$0xff] }
 0x544   : > { %7945 = vst [vmem:[#allocation30_spill] sm:$0xff] %v7023_v30 }
 0x545   : > { %4304 = vmatpush1.bf16.msra.mxu0 %v6980_v60  ;;  %7944 = vst [vmem:[#allocation29_spill] sm:$0xff] %v7021_v18  ;;  %v2296_v60 = vld [vmem:[%s7781_s6 + $0x40] sm:$0xff] }
 0x546   : > { %4368 = vmatpush1.bf16.msra.mxu1 %v6984_v34  ;;  %4306 = vmatprep.subr.bf16.mxu0 %v6986_v51  ;;  %v7060_v51 = vpack.c.bf16 %v2294_v61, %v2290_v19  ;;  %v7062_v34 = vpack.c.bf16 %v2301_v24, %v2297_v2  ;;  %v2302_v19 = vld [vmem:[%s7781_s6 + $0x70] sm:$0xff]  ;;  %v2305_v61 = vld [vmem:[%s7781_s6 + $0x88] sm:$0xff]  ;;  %v2307_v24 = vld [vmem:[%s7781_s6 + $0x98] sm:$0xff] }
 0x547   : > { %4370 = vmatprep.subr.bf16.mxu1 %v6999_v41  ;;  %v7056_v41 = vpack.c.bf16 %v2292_v37, %v2288_v55  ;;  %v2298_v55 = vld [vmem:[%s7781_s6 + $0x50] sm:$0xff]  ;;  %v7074_v37 = vpack.c.bf16 %v2303_v56, %v2299_v49  ;;  %v2309_v2 = vld [vmem:[%s7781_s6 + $0xa8] sm:$0xff]  ;;  %v2311_v49 = vld [vmem:[%s7781_s6 + $0xb8] sm:$0xff] }
 0x548   : > { %7948 = vst [vmem:[#allocation33_spill] sm:$0xff] %v7060_v51  ;;  %7949 = vst [vmem:[#allocation34_spill] sm:$0xff] %v7062_v34 }
 0x549   : > { %4308 = vmatpush1.bf16.msra.mxu0 %v7017_v28  ;;  %7947 = vst [vmem:[#allocation32_spill] sm:$0xff] %v7056_v41  ;;  %v2300_v28 = vld [vmem:[%s7781_s6 + $0x60] sm:$0xff]  ;;  %7950 = vst [vmem:[#allocation35_spill] sm:$0xff] %v7074_v37 }
 0x54a   : > { %4372 = vmatpush1.bf16.msra.mxu1 %v7021_v18  ;;  %4374 = vmatprep.subr.bf16.mxu0 %v7023_v30  ;;  %v7092_v56 = vpack.c.bf16 %v2300_v28, %v2296_v60  ;;  %v7098_v30 = vpack.c.bf16 %v2309_v2, %v2305_v61  ;;  %v2304_v18 = vld [vmem:[%s7781_s6 + $0x80] sm:$0xff]  ;;  %v2306_v60 = vld [vmem:[%s7781_s6 + $0x90] sm:$0xff]  ;;  %v7110_v28 = vpack.c.bf16 %v2311_v49, %v2307_v24  ;;  %v2317_v61 = vld [vmem:[%s7781_s6 + $0xe8] sm:$0xff]  ;;  %v7840_v2 = vmov 0.0  }
 0x54b   : > { %4406 = vmatprep.subr.bf16.mxu1 %v7035_v54  ;;  %v7096_v54 = vpack.c.bf16 %v2302_v19, %v2298_v55  ;;  %v2310_v55 = vld [vmem:[%s7781_s6 + $0xb0] sm:$0xff]  ;;  %v2313_v19 = vld [vmem:[%s7781_s6 + $0xc8] sm:$0xff]  ;;  %v2315_v24 = vld [vmem:[%s7781_s6 + $0xd8] sm:$0xff] }
 0x54c   : > { %2211 = vmatmul.mubr.f32.vlgmr.msra.gmra.mrb[0].mxu0 %v1992_v8  ;;  %7951 = vst [vmem:[#allocation36_spill] sm:$0xff] %v7092_v56  ;;  %7953 = vst [vmem:[#allocation38_spill] sm:$0xff] %v7098_v30  ;;  %v2319_v49 = vld [vmem:[%s7781_s6 + $0xf8] sm:$0xff] }
 0x54d   : > { %2282 = vmatmul.mubr.f32.vlgmr.msra.gmra.mrb[0].mxu1 %v1992_v8  ;;  %4376 = vmatpush1.bf16.msra.mxu0 %v7056_v41  ;;  %7952 = vst [vmem:[#allocation37_spill] sm:$0xff] %v7096_v54  ;;  %v2308_v8 = vld [vmem:[%s7781_s6 + $0xa0] sm:$0xff]  ;;  %7954 = vst [vmem:[#allocation39_spill] sm:$0xff] %v7110_v28 }
 0x54e   : > { %4408 = vmatpush1.bf16.msra.mxu1 %v7060_v51  ;;  %4378 = vmatprep.subr.bf16.mxu0 %v7062_v34  ;;  %v7134_v34 = vpack.c.bf16 %v2310_v55, %v2306_v60  ;;  %v7136_v51 = vpack.c.bf16 %v2317_v61, %v2313_v19  ;;  %v2312_v41 = vld [vmem:[%s7781_s6 + $0xc0] sm:$0xff]  ;;  %v2318_v60 = vld [vmem:[%s7781_s6 + $0xf0] sm:$0xff]  ;;  %v2321_v55 = vld [vmem:[%s7781_s6 + $0x108] sm:$0xff] }
 0x54f   : > { %4410 = vmatprep.subr.bf16.mxu1 %v7074_v37  ;;  %2416 = vmatprep.mubr.f32.mxu0 %v7840_v2  ;;  %v7130_v37 = vpack.c.bf16 %v2308_v8, %v2304_v18  ;;  %v2314_v18 = vld [vmem:[%s7781_s6 + $0xd0] sm:$0xff]  ;;  %v7148_v8 = vpack.c.bf16 %v2319_v49, %v2315_v24  ;;  %v2325_v19 = vld [vmem:[%s7781_s6 + $0x128] sm:$0xff]  ;;  %v2323_v61 = vld [vmem:[%s7781_s6 + $0x118] sm:$0xff] }
 0x550   : > { %2487 = vmatprep.mubr.f32.mxu1 %v7840_v2  ;;  %7956 = vst [vmem:[#allocation41_spill] sm:$0xff] %v7134_v34  ;;  %7957 = vst [vmem:[#allocation42_spill] sm:$0xff] %v7136_v51  ;;  %v2316_v2 = vld [vmem:[%s7781_s6 + $0xe0] sm:$0xff]  ;;  %v2327_v24 = vld [vmem:[%s7781_s6 + $0x138] sm:$0xff] }
 0x551   : > { %4380 = vmatpush1.bf16.msra.mxu0 %v7092_v56  ;;  %7955 = vst [vmem:[#allocation40_spill] sm:$0xff] %v7130_v37  ;;  %7958 = vst [vmem:[#allocation43_spill] sm:$0xff] %v7148_v8  ;;  %v7166_v49 = vpack.c.bf16 %v2316_v2, %v2312_v41  ;;  %v2324_v56 = vld [vmem:[%s7781_s6 + $0x120] sm:$0xff]  ;;  %v2322_v41 = vld [vmem:[%s7781_s6 + $0x110] sm:$0xff]  ;;  %v7184_v2 = vpack.c.bf16 %v2327_v24, %v2323_v61 }
 0x552   : > { %4412 = vmatpush1.bf16.msra.mxu1 %v7096_v54  ;;  %4382 = vmatprep.subr.bf16.mxu0 %v7098_v30  ;;  %v7172_v30 = vpack.c.bf16 %v2325_v19, %v2321_v55  ;;  %v2320_v54 = vld [vmem:[%s7781_s6 + $0x100] sm:$0xff]  ;;  %v2333_v55 = vld [vmem:[%s7781_s6 + $0x168] sm:$0xff]  ;;  %v2331_v19 = vld [vmem:[%s7781_s6 + $0x158] sm:$0xff] }
 0x553   : > { %4414 = vmatprep.subr.bf16.mxu1 %v7110_v28  ;;  %7959 = vst [vmem:[#allocation44_spill] sm:$0xff] %v7166_v49  ;;  %v7170_v28 = vpack.c.bf16 %v2318_v60, %v2314_v18  ;;  %7962 = vst [vmem:[#allocation47_spill] sm:$0xff] %v7184_v2  ;;  %v2326_v18 = vld [vmem:[%s7781_s6 + $0x130] sm:$0xff]  ;;  %v2329_v60 = vld [vmem:[%s7781_s6 + $0x148] sm:$0xff]  ;;  %v7202_v24 = vpack.c.bf16 %v2324_v56, %v2320_v54 }
 0x554   : > { %7961 = vst [vmem:[#allocation46_spill] sm:$0xff] %v7172_v30  ;;  %v2335_v61 = vld [vmem:[%s7781_s6 + $0x178] sm:$0xff]  ;;  %v2330_v54 = vld [vmem:[%s7781_s6 + $0x150] sm:$0xff] }
 0x555   : > { %4384 = vmatpush1.bf16.msra.mxu0 %v7130_v37  ;;  %7960 = vst [vmem:[#allocation45_spill] sm:$0xff] %v7170_v28  ;;  %7963 = vst [vmem:[#allocation48_spill] sm:$0xff] %v7202_v24  ;;  %v2332_v37 = vld [vmem:[%s7781_s6 + $0x160] sm:$0xff]  ;;  %v7220_v56 = vpack.c.bf16 %v2335_v61, %v2331_v19  ;;  %v2343_v19 = vld [vmem:[%s7781_s6 + $0x1b8] sm:$0xff] }
 0x556   : > { %4416 = vmatpush1.bf16.msra.mxu1 %v7134_v34  ;;  %4386 = vmatprep.subr.bf16.mxu0 %v7136_v51  ;;  %v7208_v51 = vpack.c.bf16 %v2333_v55, %v2329_v60  ;;  %v2328_v34 = vld [vmem:[%s7781_s6 + $0x140] sm:$0xff]  ;;  %v2341_v60 = vld [vmem:[%s7781_s6 + $0x1a8] sm:$0xff]  ;;  %v2339_v55 = vld [vmem:[%s7781_s6 + $0x198] sm:$0xff] }
 0x557   : > { %4418 = vmatprep.subr.bf16.mxu1 %v7148_v8  ;;  %v7206_v8 = vpack.c.bf16 %v2326_v18, %v2322_v41  ;;  %7966 = vst [vmem:[#allocation51_spill] sm:$0xff] %v7220_v56  ;;  %v2334_v41 = vld [vmem:[%s7781_s6 + $0x170] sm:$0xff]  ;;  %v2337_v18 = vld [vmem:[%s7781_s6 + $0x188] sm:$0xff]  ;;  %v7238_v61 = vpack.c.bf16 %v2332_v37, %v2328_v34  ;;  %v7256_v37 = vpack.c.bf16 %v2343_v19, %v2339_v55  ;;  %v2351_v55 = vld [vmem:[%s7781_s6 + $0x1f8] sm:$0xff] }
 0x558   : > { %7965 = vst [vmem:[#allocation50_spill] sm:$0xff] %v7208_v51  ;;  %v2338_v34 = vld [vmem:[%s7781_s6 + $0x190] sm:$0xff] }
 0x559   : > { %4388 = vmatpush1.bf16.msra.mxu0 %v7166_v49  ;;  %7964 = vst [vmem:[#allocation49_spill] sm:$0xff] %v7206_v8  ;;  %7967 = vst [vmem:[#allocation52_spill] sm:$0xff] %v7238_v61  ;;  %v2340_v49 = vld [vmem:[%s7781_s6 + $0x1a0] sm:$0xff] }
 0x55a   : > { %4420 = vmatpush1.bf16.msra.mxu1 %v7170_v28  ;;  %4390 = vmatprep.subr.bf16.mxu0 %v7172_v30  ;;  %v7244_v30 = vpack.c.bf16 %v2341_v60, %v2337_v18  ;;  %v2336_v28 = vld [vmem:[%s7781_s6 + $0x180] sm:$0xff]  ;;  %7970 = vst [vmem:[#allocation55_spill] sm:$0xff] %v7256_v37  ;;  %v2349_v18 = vld [vmem:[%s7781_s6 + $0x1e8] sm:$0xff]  ;;  %v2347_v60 = vld [vmem:[%s7781_s6 + $0x1d8] sm:$0xff] }
 0x55b   : > { %4422 = vmatprep.subr.bf16.mxu1 %v7184_v2  ;;  %v7242_v2 = vpack.c.bf16 %v2334_v41, %v2330_v54  ;;  %v2342_v54 = vld [vmem:[%s7781_s6 + $0x1b0] sm:$0xff]  ;;  %v2345_v41 = vld [vmem:[%s7781_s6 + $0x1c8] sm:$0xff]  ;;  %v7274_v19 = vpack.c.bf16 %v2340_v49, %v2336_v28  ;;  %v7289_v28 = vpack.c.bf16 %v2351_v55, %v2347_v60  ;;  %v7982_v55 = vld [vmem:[#allocation17_spill] sm:$0xff] }
 0x55c   : > { %7969 = vst [vmem:[#allocation54_spill] sm:$0xff] %v7244_v30  ;;  %v2346_v49 = vld [vmem:[%s7781_s6 + $0x1d0] sm:$0xff] }
 0x55d   : > { %4392 = vmatpush1.bf16.msra.mxu0 %v7202_v24  ;;  %7968 = vst [vmem:[#allocation53_spill] sm:$0xff] %v7242_v2  ;;  %7971 = vst [vmem:[#allocation56_spill] sm:$0xff] %v7274_v19  ;;  %v2348_v24 = vld [vmem:[%s7781_s6 + $0x1e0] sm:$0xff]  ;;  %v7981_v60 = vld [vmem:[#allocation16_spill] sm:$0xff] }
 0x55e   : > { %4424 = vmatpush1.bf16.msra.mxu1 %v7206_v8  ;;  %4394 = vmatprep.subr.bf16.mxu0 %v7208_v51  ;;  %v7280_v51 = vpack.c.bf16 %v2349_v18, %v2345_v41  ;;  %v2344_v8 = vld [vmem:[%s7781_s6 + $0x1c0] sm:$0xff]  ;;  %7974 = vst [vmem:[#allocation59_spill] sm:$0xff] %v7289_v28  ;;  %v7980_v18 = vld [vmem:[#allocation15_spill] sm:$0xff] }
 0x55f   : > { %4426 = vmatprep.subr.bf16.mxu1 %v7220_v56  ;;  %v7278_v56 = vpack.c.bf16 %v2342_v54, %v2338_v34  ;;  %v2350_v34 = vld [vmem:[%s7781_s6 + $0x1f0] sm:$0xff]  ;;  %v7298_v54 = vpack.c.bf16 %v2348_v24, %v2344_v8  ;;  %v7978_v8 = vld [vmem:[#allocation13_spill] sm:$0xff]  ;;  %v7979_v24 = vld [vmem:[#allocation14_spill] sm:$0xff] }
 0x560   : > { %7973 = vst [vmem:[#allocation58_spill] sm:$0xff] %v7280_v51  ;;  %v7302_v41 = vpack.c.bf16 %v2350_v34, %v2346_v49  ;;  %v7983_v49 = vld [vmem:[#allocation18_spill] sm:$0xff]  ;;  %v7984_v34 = vld [vmem:[#allocation19_spill] sm:$0xff] }
 0x561   : > { %4396 = vmatpush1.bf16.msra.mxu0 %v7238_v61  ;;  %7972 = vst [vmem:[#allocation57_spill] sm:$0xff] %v7278_v56  ;;  %7975 = vst [vmem:[#allocation60_spill] sm:$0xff] %v7298_v54 }
 0x562   : > { %4428 = vmatpush1.bf16.msra.mxu1 %v7242_v2  ;;  %4398 = vmatprep.subr.bf16.mxu0 %v7244_v30  ;;  %7976 = vst [vmem:[#allocation61_spill] sm:$0xff] %v7302_v41 }
 0x563   : > { %4430 = vmatprep.subr.bf16.mxu1 %v7256_v37 }
 0x565   : > { %4400 = vmatpush1.bf16.msra.mxu0 %v7274_v19 }
 0x566   : > { %4432 = vmatpush1.bf16.msra.mxu1 %v7278_v56  ;;  %4402 = vmatprep.subr.bf16.mxu0 %v7280_v51 }
 0x567   : > { %4434 = vmatprep.subr.bf16.mxu1 %v7289_v28 }
 0x569   : > { %4404 = vmatpush1.bf16.msra.mxu0 %v7298_v54 }
 0x56a   : > { %4436 = vmatpush1.bf16.msra.mxu1 %v7302_v41  ;;  %4438 = vmatprep.subr.bf16.mxu0 %v6439_v4 }
 0x56b   : > { %4502 = vmatprep.subr.bf16.mxu1 %v6450_v57 }
 0x56c   : > { %2417 = vmatmul.mubr.f32.vlgmr.msra.gmra.mrb[0].mxu0 %v5477_v10 }
 0x56d   : > { %2488 = vmatmul.mubr.f32.vlgmr.msra.gmra.mrb[0].mxu1 %v5477_v10  ;;  %4440 = vmatpush1.bf16.msra.mxu0 %v6452_v59  ;;  %v7977_v10 = vld [vmem:[#allocation12_spill] sm:$0xff] }
 0x56e   : > { %4504 = vmatpush1.bf16.msra.mxu1 %v6464_v32  ;;  %4442 = vmatprep.subr.bf16.mxu0 %v6477_v11 }
 0x56f   : > { %4506 = vmatprep.subr.bf16.mxu1 %v6479_v26 }
 0x571   : > { %4444 = vmatpush1.bf16.msra.mxu0 %v6491_v9 }
 0x572   : > { %4508 = vmatpush1.bf16.msra.mxu1 %v6504_v63  ;;  %4446 = vmatprep.subr.bf16.mxu0 %v6506_v6 }
 0x573   : > { %4510 = vmatprep.subr.bf16.mxu1 %v6517_v33 }
 0x575   : > { %4448 = vmatpush1.bf16.msra.mxu0 %v6529_v14 }
 0x576   : > { %4512 = vmatpush1.bf16.msra.mxu1 %v6542_v21  ;;  %4450 = vmatprep.subr.bf16.mxu0 %v6544_v29 }
 0x577   : > { %4514 = vmatprep.subr.bf16.mxu1 %v6556_v3 }
 0x579   : > { %4452 = vmatpush1.bf16.msra.mxu0 %v6577_v5 }
 0x57a   : > { %4516 = vmatpush1.bf16.msra.mxu1 %v6581_v62  ;;  %4454 = vmatprep.subr.bf16.mxu0 %v6583_v40 }
 0x57b   : > { %4518 = vmatprep.subr.bf16.mxu1 %v6595_v1 }
 0x57d   : > { %4456 = vmatpush1.bf16.msra.mxu0 %v6613_v13 }
 0x57e   : > { %4520 = vmatpush1.bf16.msra.mxu1 %v6617_v58  ;;  %4458 = vmatprep.subr.bf16.mxu0 %v6619_v17 }
 0x57f   : > { %4522 = vmatprep.subr.bf16.mxu1 %v6631_v38 }
 0x581   : > { %4460 = vmatpush1.bf16.msra.mxu0 %v6649_v31 }
 0x582   : > { %4524 = vmatpush1.bf16.msra.mxu1 %v6653_v46  ;;  %4462 = vmatprep.subr.bf16.mxu0 %v6655_v16 }
 0x583   : > { %4526 = vmatprep.subr.bf16.mxu1 %v6667_v52 }
 0x585   : > { %4464 = vmatpush1.bf16.msra.mxu0 %v6685_v45 }
 0x586   : > { %4528 = vmatpush1.bf16.msra.mxu1 %v6689_v7  ;;  %4466 = vmatprep.subr.bf16.mxu0 %v6691_v20 }
 0x587   : > { %4530 = vmatprep.subr.bf16.mxu1 %v6703_v35 }
 0x589   : > { %4468 = vmatpush1.bf16.msra.mxu0 %v6721_v22 }
 0x58a   : > { %4532 = vmatpush1.bf16.msra.mxu1 %v6725_v15  ;;  %4470 = vmatprep.subr.bf16.mxu0 %v6727_v36 }
 0x58b   : > { %4534 = vmatprep.subr.bf16.mxu1 %v6742_v53 }
 0x58d   : > { %4472 = vmatpush1.bf16.msra.mxu0 %v6760_v23 }
 0x58e   : > { %4536 = vmatpush1.bf16.msra.mxu1 %v6764_v12  ;;  %4474 = vmatprep.subr.bf16.mxu0 %v6766_v48 }
 0x58f   : > { %4538 = vmatprep.subr.bf16.mxu1 %v6779_v25 }
 0x591   : > { %4476 = vmatpush1.bf16.msra.mxu0 %v6797_v0 }
 0x592   : > { %4540 = vmatpush1.bf16.msra.mxu1 %v6803_v43  ;;  %4478 = vmatprep.subr.bf16.mxu0 %v6805_v47 }
 0x593   : > { %4542 = vmatprep.subr.bf16.mxu1 %v6817_v39 }
 0x595   : > { %4480 = vmatpush1.bf16.msra.mxu0 %v6835_v44 }
 0x596   : > { %4544 = vmatpush1.bf16.msra.mxu1 %v6842_v50  ;;  %4482 = vmatprep.subr.bf16.mxu0 %v6844_v27  ;;  %v7985_v27 = vld [vmem:[#allocation20_spill] sm:$0xff]  ;;  %v8011_v50 = vld [vmem:[#allocation45_spill] sm:$0xff] }
 0x597   : > { %4546 = vmatprep.subr.bf16.mxu1 %v6856_v42  ;;  %v7986_v42 = vld [vmem:[#allocation21_spill] sm:$0xff] }
 0x599   : > { %4484 = vmatpush1.bf16.msra.mxu0 %v7977_v10  ;;  %v7987_v10 = vld [vmem:[#allocation22_spill] sm:$0xff] }
 0x59a   : > { %4548 = vmatpush1.bf16.msra.mxu1 %v7978_v8  ;;  %4486 = vmatprep.subr.bf16.mxu0 %v7979_v24  ;;  %v7988_v8 = vld [vmem:[#allocation23_spill] sm:$0xff]  ;;  %v7989_v24 = vld [vmem:[#allocation24_spill] sm:$0xff] }
 0x59b   : > { %4550 = vmatprep.subr.bf16.mxu1 %v7980_v18  ;;  %v7990_v18 = vld [vmem:[#allocation25_spill] sm:$0xff] }
 0x59d   : > { %4488 = vmatpush1.bf16.msra.mxu0 %v7981_v60  ;;  %v7991_v60 = vld [vmem:[#allocation26_spill] sm:$0xff] }
 0x59e   : > { %4552 = vmatpush1.bf16.msra.mxu1 %v7982_v55  ;;  %4490 = vmatprep.subr.bf16.mxu0 %v7983_v49  ;;  %v7992_v55 = vld [vmem:[#allocation27_spill] sm:$0xff]  ;;  %v7993_v49 = vld [vmem:[#allocation28_spill] sm:$0xff] }
 0x59f   : > { %4554 = vmatprep.subr.bf16.mxu1 %v7984_v34  ;;  %v7994_v34 = vld [vmem:[#allocation29_spill] sm:$0xff] }
 0x5a1   : > { %4492 = vmatpush1.bf16.msra.mxu0 %v7985_v27  ;;  %v7995_v27 = vld [vmem:[#allocation30_spill] sm:$0xff] }
 0x5a2   : > { %4556 = vmatpush1.bf16.msra.mxu1 %v7986_v42  ;;  %4494 = vmatprep.subr.bf16.mxu0 %v7987_v10  ;;  %v7996_v42 = vld [vmem:[#allocation31_spill] sm:$0xff] }
 0x5a3   : > { %4558 = vmatprep.subr.bf16.mxu1 %v7988_v8  ;;  %v2523_v8 = vld [vmem:[%s2522_s26] sm:$0xff]  ;;  %v8005_v10 = vld [vmem:[#allocation39_spill] sm:$0xff] }
 0x5a4   : > { %2588 = vmatprep.mubr.f32.mxu0 %v2523_v8  ;;  %2659 = vmatprep.mubr.f32.mxu1 %v2523_v8  ;;  %v8004_v8 = vld [vmem:[#allocation38_spill] sm:$0xff] }
 0x5a5   : > { %4496 = vmatpush1.bf16.msra.mxu0 %v7989_v24  ;;  %v3912_v24 = vld [vmem:[%s7053_s2 + $0x8] sm:$0xff] }
 0x5a6   : > { %4560 = vmatpush1.bf16.msra.mxu1 %v7990_v18  ;;  %4498 = vmatprep.subr.bf16.mxu0 %v7991_v60  ;;  %v7997_v60 = vld [vmem:[#allocation32_spill] sm:$0xff]  ;;  %v8003_v18 = vld [vmem:[#allocation37_spill] sm:$0xff] }
 0x5a7   : > { %4562 = vmatprep.subr.bf16.mxu1 %v7992_v55  ;;  %v7998_v55 = vld [vmem:[#allocation33_spill] sm:$0xff] }
 0x5a9   : > { %4500 = vmatpush1.bf16.msra.mxu0 %v7993_v49  ;;  %v7999_v49 = vld [vmem:[#allocation34_spill] sm:$0xff] }
 0x5aa   : > { %4564 = vmatpush1.bf16.msra.mxu1 %v7994_v34  ;;  %4566 = vmatprep.subr.bf16.mxu0 %v7995_v27  ;;  %v8000_v34 = vld [vmem:[#allocation35_spill] sm:$0xff]  ;;  %v8001_v27 = vmov 0.0  }
 0x5ab   : > { %4598 = vmatprep.subr.bf16.mxu1 %v7996_v42  ;;  %v8002_v42 = vld [vmem:[#allocation36_spill] sm:$0xff] }
 0x5ac   : > { %2589 = vmatmul.mubr.f32.vlgmr.msra.gmra.mrb[2].mxu0 %v3912_v24 }
 0x5ad   : > { %2660 = vmatmul.mubr.f32.vlgmr.msra.gmra.mrb[2].mxu1 %v3912_v24  ;;  %4568 = vmatpush1.bf16.msra.mxu0 %v7997_v60  ;;  %v8006_v24 = vld [vmem:[#allocation40_spill] sm:$0xff]  ;;  %v8007_v60 = vld [vmem:[#allocation41_spill] sm:$0xff] }
 0x5ae   : > { %4600 = vmatpush1.bf16.msra.mxu1 %v7998_v55  ;;  %4570 = vmatprep.subr.bf16.mxu0 %v7999_v49  ;;  %v8008_v55 = vld [vmem:[#allocation42_spill] sm:$0xff]  ;;  %v8009_v49 = vld [vmem:[#allocation43_spill] sm:$0xff] }
 0x5af   : > { %4602 = vmatprep.subr.bf16.mxu1 %v8000_v34  ;;  %2730 = vmatprep.mubr.f32.mxu0 %v8001_v27  ;;  %v8010_v34 = vld [vmem:[#allocation44_spill] sm:$0xff] }
 0x5b0   : > { %2801 = vmatprep.mubr.f32.mxu1 %v8001_v27  ;;  %v8012_v27 = vld [vmem:[#allocation46_spill] sm:$0xff] }
 0x5b1   : > { %4572 = vmatpush1.bf16.msra.mxu0 %v8002_v42  ;;  %v8013_v42 = vld [vmem:[#allocation47_spill] sm:$0xff] }
 0x5b2   : > { %4604 = vmatpush1.bf16.msra.mxu1 %v8003_v18  ;;  %4574 = vmatprep.subr.bf16.mxu0 %v8004_v8  ;;  %v8014_v18 = vld [vmem:[#allocation48_spill] sm:$0xff]  ;;  %v8015_v8 = vld [vmem:[#allocation49_spill] sm:$0xff] }
 0x5b3   : > { %4606 = vmatprep.subr.bf16.mxu1 %v8005_v10  ;;  %v8016_v10 = vld [vmem:[#allocation50_spill] sm:$0xff] }
 0x5b5   : > { %4576 = vmatpush1.bf16.msra.mxu0 %v8006_v24  ;;  %v8017_v24 = vld [vmem:[#allocation51_spill] sm:$0xff] }
 0x5b6   : > { %4608 = vmatpush1.bf16.msra.mxu1 %v8007_v60  ;;  %4578 = vmatprep.subr.bf16.mxu0 %v8008_v55 }
 0x5b7   : > { %4610 = vmatprep.subr.bf16.mxu1 %v8009_v49 }
 0x5b9   : > { %4580 = vmatpush1.bf16.msra.mxu0 %v8010_v34 }
 0x5ba   : > { %4612 = vmatpush1.bf16.msra.mxu1 %v8011_v50  ;;  %4582 = vmatprep.subr.bf16.mxu0 %v8012_v27 }
 0x5bb   : > { %4614 = vmatprep.subr.bf16.mxu1 %v8013_v42 }
 0x5bd   : > { %4584 = vmatpush1.bf16.msra.mxu0 %v8014_v18 }
 0x5be   : > { %4616 = vmatpush1.bf16.msra.mxu1 %v8015_v8  ;;  %4586 = vmatprep.subr.bf16.mxu0 %v8016_v10 }
 0x5bf   : > { %4618 = vmatprep.subr.bf16.mxu1 %v8017_v24 }
 0x5c1   : > { %4588 = vmatpush1.bf16.msra.mxu0 %v7238_v61  ;;  %v8020_v61 = vld [vmem:[#allocation4_spill] sm:$0xff] }
 0x5c2   : > { %4620 = vmatpush1.bf16.msra.mxu1 %v7242_v2  ;;  %4590 = vmatprep.subr.bf16.mxu0 %v7244_v30  ;;  %v8018_v2 = vld [vmem:[#allocation5_spill] sm:$0xff] }
 0x5c3   : > { %4622 = vmatprep.subr.bf16.mxu1 %v7256_v37  ;;  %v8019_v30 = vsub.s32 0, %v8018_v2 }
 0x5c5   : > { %4592 = vmatpush1.bf16.msra.mxu0 %v7274_v19  ;;  %v7414_v37 = vrot.slane %v8020_v61, %v8019_v30  ;;  %v8022_v19 = vsub.s32 1, %v8018_v2 }
 0x5c6   : > { %4624 = vmatpush1.bf16.msra.mxu1 %v7278_v56  ;;  %4594 = vmatprep.subr.bf16.mxu0 %v7280_v51 }
 0x5c7   : > { %4626 = vmatprep.subr.bf16.mxu1 %v7289_v28  ;;  %8021 = vst [vmem:[#allocation62_spill] sm:$0xff] %v7414_v37  ;;  %v7419_v56 = vrot.slane %v8020_v61, %v8022_v19  ;;  %v8026_v19 = vsub.s32 3, %v8018_v2 }
 0x5c9   : > { %4596 = vmatpush1.bf16.msra.mxu0 %v7298_v54  ;;  %8023 = vst [vmem:[#allocation63_spill] sm:$0xff] %v7419_v56  ;;  %v8024_v54 = vsub.s32 2, %v8018_v2  ;;  %v7432_v42 = vrot.slane %v8020_v61, %v8026_v19 }
 0x5ca   : > { %4628 = vmatpush1.bf16.msra.mxu1 %v7302_v41  ;;  %4630 = vmatprep.subr.bf16.mxu0 %v6439_v4 }
 0x5cb   : > { %4694 = vmatprep.subr.bf16.mxu1 %v6450_v57  ;;  %v7425_v41 = vrot.slane %v8020_v61, %v8024_v54  ;;  %v8044_v61 = vld [vmem:[#allocation25_spill] sm:$0xff] }
 0x5cd   : > { %8025 = vst [vmem:[#allocation64_spill] sm:$0xff] %v7425_v41 }
 0x63f   : > { %v2418_v51 = vpop.f32.mrb[0].mxu0 }
 0x640   : > { %v5245_v28 = vadd.f32 %v2418_v51, %v7414_v37  ;;  %v2489_v4 = vpop.f32.mrb[0].mxu1  ;;  %v2420_v57 = vpop.f32.mrb[1].mxu0 }
 0x641   : > { %v5246_v24 = vadd.f32 %v2420_v57, %v7419_v56  ;;  %v2491_v10 = vpop.f32.mrb[1].mxu1  ;;  %v5247_v18 = vadd.f32 %v2489_v4, %v7425_v41  ;;  %v8027_v4 = vld [vmem:[#allocation6_spill] sm:$0xff] }
 0x642   : > { %v2498_v30 = vmul.f32 0.5, %v5245_v28  ;;  %v5248_v51 = vadd.f32 %v2491_v10, %v7432_v42 }
 0x643   : > { %v2502_v8 = vmul.f32 0.5, %v5246_v24 }
 0x644   : > { %5385 = vtanh.f32 %v2498_v30  ;;  %v2507_v54 = vmul.f32 0.5, %v5248_v51 }
 0x645   : > { %5387 = vtanh.f32 %v2502_v8 }
 0x646   : > { %5389 = vtanh.f32 %v5247_v18 }
 0x647   : > { %5391 = vtanh.f32 %v2507_v54  ;;  %v8033_v54 = vld [vmem:[#allocation14_spill] sm:$0xff] }
 0x64e   : > { %v5386_v37 = vpop.eup %5385 }
 0x64f   : > { %v5388_v27 = vpop.eup %5387  ;;  %v2500_v50 = vmul.f32 0.5, %v5386_v37  ;;  %v8031_v37 = vld [vmem:[#allocation12_spill] sm:$0xff] }
 0x650   : > { %v2504_v57 = vmul.f32 0.5, %v5388_v27  ;;  %v5390_v24 = vpop.eup %5389  ;;  %v8029_v27 = vld [vmem:[#allocation10_spill] sm:$0xff] }
 0x651   : > { %v2501_v28 = vadd.f32 0.5, %v2500_v50  ;;  %v5392_v8 = vpop.eup %5391  ;;  %v8028_v50 = vld [vmem:[#allocation9_spill] sm:$0xff] }
 0x652   : > { %v2505_v30 = vadd.f32 0.5, %v2504_v57  ;;  %v2509_v18 = vmul.f32 0.5, %v5392_v8  ;;  %v8034_v57 = vld [vmem:[#allocation15_spill] sm:$0xff]  ;;  %v8039_v8 = vld [vmem:[#allocation20_spill] sm:$0xff] }
 0x653   : > { %v2512_v56 = vmul.f32 %v5390_v24, %v2501_v28  ;;  %v8035_v28 = vld [vmem:[#allocation16_spill] sm:$0xff]  ;;  %v8036_v24 = vld [vmem:[#allocation17_spill] sm:$0xff] }
 0x654   : > { %v2511_v41 = vmul.f32 %v8027_v4, %v2505_v30  ;;  %v2510_v19 = vadd.f32 0.5, %v2509_v18  ;;  %v8037_v30 = vld [vmem:[#allocation18_spill] sm:$0xff]  ;;  %v8038_v4 = vld [vmem:[#allocation19_spill] sm:$0xff]  ;;  %v8040_v18 = vld [vmem:[#allocation21_spill] sm:$0xff] }
 0x656   : > { %v7436_v2 = vadd.f32 %v2512_v56, %v2511_v41  ;;  %v8030_v56 = vld [vmem:[#allocation11_spill] sm:$0xff]  ;;  %v8032_v41 = vld [vmem:[#allocation13_spill] sm:$0xff] }
 0x658   : > { %5393 = vtanh.f32 %v7436_v2 }
 0x662   : > { %v5394_v10 = vpop.eup %5393 }
 0x663   : > { %v2515_v51 = vmul.f32 %v5394_v10, %v2510_v19  ;;  %v8041_v19 = vld [vmem:[#allocation22_spill] sm:$0xff]  ;;  %v8042_v10 = vld [vmem:[#allocation23_spill] sm:$0xff] }
 0x665   : > { %2731 = vmatmul.mubr.f32.vlgmr.msra.gmra.mrb[2].mxu0 %v2515_v51  ;;  %2802 = vmatmul.mubr.f32.vlgmr.msra.gmra.mrb[2].mxu1 %v2515_v51  ;;  %v8043_v51 = vld [vmem:[#allocation24_spill] sm:$0xff] }
 0x666   : > { %4632 = vmatpush1.bf16.msra.mxu0 %v6452_v59  ;;  %4696 = vmatpush1.bf16.msra.mxu1 %v6464_v32 }
 0x667   : > { %4634 = vmatprep.subr.bf16.mxu0 %v6477_v11  ;;  %4698 = vmatprep.subr.bf16.mxu1 %v6479_v26 }
 0x66a   : > { %4636 = vmatpush1.bf16.msra.mxu0 %v6491_v9  ;;  %4700 = vmatpush1.bf16.msra.mxu1 %v6504_v63 }
 0x66b   : > { %4638 = vmatprep.subr.bf16.mxu0 %v6506_v6  ;;  %4702 = vmatprep.subr.bf16.mxu1 %v6517_v33 }
 0x66e   : > { %4640 = vmatpush1.bf16.msra.mxu0 %v6529_v14  ;;  %4704 = vmatpush1.bf16.msra.mxu1 %v6542_v21 }
 0x66f   : > { %4642 = vmatprep.subr.bf16.mxu0 %v6544_v29  ;;  %4706 = vmatprep.subr.bf16.mxu1 %v6556_v3 }
 0x672   : > { %4644 = vmatpush1.bf16.msra.mxu0 %v6577_v5  ;;  %4708 = vmatpush1.bf16.msra.mxu1 %v6581_v62 }
 0x673   : > { %4646 = vmatprep.subr.bf16.mxu0 %v6583_v40  ;;  %4710 = vmatprep.subr.bf16.mxu1 %v6595_v1 }
 0x676   : > { %4648 = vmatpush1.bf16.msra.mxu0 %v6613_v13  ;;  %4712 = vmatpush1.bf16.msra.mxu1 %v6617_v58 }
 0x677   : > { %4650 = vmatprep.subr.bf16.mxu0 %v6619_v17  ;;  %4714 = vmatprep.subr.bf16.mxu1 %v6631_v38 }
 0x67a   : > { %4652 = vmatpush1.bf16.msra.mxu0 %v6649_v31  ;;  %4716 = vmatpush1.bf16.msra.mxu1 %v6653_v46 }
 0x67b   : > { %4654 = vmatprep.subr.bf16.mxu0 %v6655_v16  ;;  %4718 = vmatprep.subr.bf16.mxu1 %v6667_v52 }
 0x67e   : > { %4656 = vmatpush1.bf16.msra.mxu0 %v6685_v45  ;;  %4720 = vmatpush1.bf16.msra.mxu1 %v6689_v7 }
 0x67f   : > { %4658 = vmatprep.subr.bf16.mxu0 %v6691_v20  ;;  %4722 = vmatprep.subr.bf16.mxu1 %v6703_v35 }
 0x682   : > { %4660 = vmatpush1.bf16.msra.mxu0 %v6721_v22  ;;  %4724 = vmatpush1.bf16.msra.mxu1 %v6725_v15 }
 0x683   : > { %4662 = vmatprep.subr.bf16.mxu0 %v6727_v36  ;;  %4726 = vmatprep.subr.bf16.mxu1 %v6742_v53 }
 0x686   : > { %4664 = vmatpush1.bf16.msra.mxu0 %v6760_v23  ;;  %4728 = vmatpush1.bf16.msra.mxu1 %v6764_v12 }
 0x687   : > { %4666 = vmatprep.subr.bf16.mxu0 %v6766_v48  ;;  %4730 = vmatprep.subr.bf16.mxu1 %v6779_v25 }
 0x68a   : > { %4668 = vmatpush1.bf16.msra.mxu0 %v6797_v0  ;;  %4732 = vmatpush1.bf16.msra.mxu1 %v6803_v43 }
 0x68b   : > { %4670 = vmatprep.subr.bf16.mxu0 %v6805_v47  ;;  %4734 = vmatprep.subr.bf16.mxu1 %v6817_v39 }
 0x68e   : > { %4672 = vmatpush1.bf16.msra.mxu0 %v6835_v44  ;;  %4736 = vmatpush1.bf16.msra.mxu1 %v8028_v50 }
 0x68f   : > { %4674 = vmatprep.subr.bf16.mxu0 %v8029_v27  ;;  %4738 = vmatprep.subr.bf16.mxu1 %v8030_v56 }
 0x692   : > { %4676 = vmatpush1.bf16.msra.mxu0 %v8031_v37  ;;  %4740 = vmatpush1.bf16.msra.mxu1 %v8032_v41 }
 0x693   : > { %4678 = vmatprep.subr.bf16.mxu0 %v8033_v54  ;;  %4742 = vmatprep.subr.bf16.mxu1 %v8034_v57 }
 0x696   : > { %4680 = vmatpush1.bf16.msra.mxu0 %v8035_v28  ;;  %4744 = vmatpush1.bf16.msra.mxu1 %v8036_v24  ;;  %v8045_v28 = vld [vmem:[#allocation26_spill] sm:$0xff]  ;;  %v8046_v24 = vld [vmem:[#allocation27_spill] sm:$0xff] }
 0x697   : > { %4682 = vmatprep.subr.bf16.mxu0 %v8037_v30  ;;  %4746 = vmatprep.subr.bf16.mxu1 %v8038_v4  ;;  %v8047_v30 = vld [vmem:[#allocation28_spill] sm:$0xff]  ;;  %v8048_v4 = vld [vmem:[#allocation29_spill] sm:$0xff] }
 0x69a   : > { %4684 = vmatpush1.bf16.msra.mxu0 %v8039_v8  ;;  %4748 = vmatpush1.bf16.msra.mxu1 %v8040_v18  ;;  %v8049_v8 = vld [vmem:[#allocation30_spill] sm:$0xff]  ;;  %v8050_v18 = vld [vmem:[#allocation31_spill] sm:$0xff] }
 0x69b   : > { %4686 = vmatprep.subr.bf16.mxu0 %v8041_v19  ;;  %4750 = vmatprep.subr.bf16.mxu1 %v8042_v10  ;;  %v2837_v10 = vld [vmem:[%s2836_s30] sm:$0xff]  ;;  %v8059_v19 = vld [vmem:[#allocation39_spill] sm:$0xff] }
 0x69c   : > { %2902 = vmatprep.mubr.f32.mxu0 %v2837_v10  ;;  %2973 = vmatprep.mubr.f32.mxu1 %v2837_v10  ;;  %v8058_v10 = vld [vmem:[#allocation38_spill] sm:$0xff] }
 0x69e   : > { %4688 = vmatpush1.bf16.msra.mxu0 %v8043_v51  ;;  %4752 = vmatpush1.bf16.msra.mxu1 %v8044_v61  ;;  %v3915_v51 = vld [vmem:[%s7053_s2 + $0x10] sm:$0xff]  ;;  %v8057_v61 = vld [vmem:[#allocation37_spill] sm:$0xff] }
 0x69f   : > { %4690 = vmatprep.subr.bf16.mxu0 %v8045_v28  ;;  %4754 = vmatprep.subr.bf16.mxu1 %v8046_v24  ;;  %v8051_v28 = vld [vmem:[#allocation32_spill] sm:$0xff]  ;;  %v8052_v24 = vld [vmem:[#allocation33_spill] sm:$0xff] }
 0x6a2   : > { %4692 = vmatpush1.bf16.msra.mxu0 %v8047_v30  ;;  %4756 = vmatpush1.bf16.msra.mxu1 %v8048_v4  ;;  %v8053_v30 = vld [vmem:[#allocation34_spill] sm:$0xff]  ;;  %v8054_v4 = vld [vmem:[#allocation35_spill] sm:$0xff] }
 0x6a3   : > { %4758 = vmatprep.subr.bf16.mxu0 %v8049_v8  ;;  %4790 = vmatprep.subr.bf16.mxu1 %v8050_v18  ;;  %v8055_v8 = vmov 0.0   ;;  %v8056_v18 = vld [vmem:[#allocation36_spill] sm:$0xff] }
 0x6a5   : > { %2903 = vmatmul.mubr.f32.vlgmr.msra.gmra.mrb[4].mxu0 %v3915_v51  ;;  %2974 = vmatmul.mubr.f32.vlgmr.msra.gmra.mrb[4].mxu1 %v3915_v51  ;;  %v8060_v51 = vld [vmem:[#allocation40_spill] sm:$0xff] }
 0x6a6   : > { %4760 = vmatpush1.bf16.msra.mxu0 %v8051_v28  ;;  %4792 = vmatpush1.bf16.msra.mxu1 %v8052_v24  ;;  %v8081_v28 = vld [vmem:[#allocation63_spill] sm:$0xff] }
 0x6a7   : > { %4762 = vmatprep.subr.bf16.mxu0 %v8053_v30  ;;  %4794 = vmatprep.subr.bf16.mxu1 %v8054_v4  ;;  %v8061_v4 = vld [vmem:[#allocation45_spill] sm:$0xff]  ;;  %v8080_v30 = vld [vmem:[#allocation62_spill] sm:$0xff] }
 0x6a8   : > { %3044 = vmatprep.mubr.f32.mxu0 %v8055_v8  ;;  %3115 = vmatprep.mubr.f32.mxu1 %v8055_v8  ;;  %v8062_v8 = vld [vmem:[#allocation46_spill] sm:$0xff] }
 0x6aa   : > { %4764 = vmatpush1.bf16.msra.mxu0 %v8056_v18  ;;  %4796 = vmatpush1.bf16.msra.mxu1 %v8057_v61  ;;  %v8063_v18 = vld [vmem:[#allocation47_spill] sm:$0xff]  ;;  %v8064_v61 = vld [vmem:[#allocation48_spill] sm:$0xff] }
 0x6ab   : > { %4766 = vmatprep.subr.bf16.mxu0 %v8058_v10  ;;  %4798 = vmatprep.subr.bf16.mxu1 %v8059_v19  ;;  %v8065_v10 = vld [vmem:[#allocation49_spill] sm:$0xff]  ;;  %v8066_v19 = vld [vmem:[#allocation50_spill] sm:$0xff] }
 0x6ae   : > { %4768 = vmatpush1.bf16.msra.mxu0 %v8060_v51  ;;  %4800 = vmatpush1.bf16.msra.mxu1 %v8007_v60  ;;  %v8067_v51 = vld [vmem:[#allocation51_spill] sm:$0xff]  ;;  %v8068_v60 = vld [vmem:[#allocation52_spill] sm:$0xff] }
 0x6af   : > { %4770 = vmatprep.subr.bf16.mxu0 %v8008_v55  ;;  %4802 = vmatprep.subr.bf16.mxu1 %v8009_v49  ;;  %v8069_v55 = vld [vmem:[#allocation53_spill] sm:$0xff]  ;;  %v8070_v49 = vld [vmem:[#allocation54_spill] sm:$0xff] }
 0x6b2   : > { %4772 = vmatpush1.bf16.msra.mxu0 %v8010_v34  ;;  %4804 = vmatpush1.bf16.msra.mxu1 %v8061_v4  ;;  %v8071_v34 = vld [vmem:[#allocation55_spill] sm:$0xff]  ;;  %v8072_v4 = vld [vmem:[#allocation56_spill] sm:$0xff] }
 0x6b3   : > { %4774 = vmatprep.subr.bf16.mxu0 %v8062_v8  ;;  %4806 = vmatprep.subr.bf16.mxu1 %v8063_v18  ;;  %v8073_v8 = vld [vmem:[#allocation57_spill] sm:$0xff]  ;;  %v8074_v18 = vld [vmem:[#allocation58_spill] sm:$0xff] }
 0x6b6   : > { %4776 = vmatpush1.bf16.msra.mxu0 %v8064_v61  ;;  %4808 = vmatpush1.bf16.msra.mxu1 %v8065_v10  ;;  %v8075_v61 = vld [vmem:[#allocation59_spill] sm:$0xff]  ;;  %v8076_v10 = vld [vmem:[#allocation60_spill] sm:$0xff] }
 0x6b7   : > { %4778 = vmatprep.subr.bf16.mxu0 %v8066_v19  ;;  %4810 = vmatprep.subr.bf16.mxu1 %v8067_v51  ;;  %v8077_v19 = vld [vmem:[#allocation61_spill] sm:$0xff]  ;;  %v8078_v51 = vld [vmem:[#allocation7_spill] sm:$0xff] }
 0x6ba   : > { %4780 = vmatpush1.bf16.msra.mxu0 %v8068_v60  ;;  %4812 = vmatpush1.bf16.msra.mxu1 %v8069_v55  ;;  %v8079_v60 = vld [vmem:[#allocation8_spill] sm:$0xff] }
 0x6bb   : > { %4782 = vmatprep.subr.bf16.mxu0 %v8070_v49  ;;  %4814 = vmatprep.subr.bf16.mxu1 %v8071_v34 }
 0x6be   : > { %4784 = vmatpush1.bf16.msra.mxu0 %v8072_v4  ;;  %4816 = vmatpush1.bf16.msra.mxu1 %v8073_v8 }
 0x6bf   : > { %4786 = vmatprep.subr.bf16.mxu0 %v8074_v18  ;;  %4818 = vmatprep.subr.bf16.mxu1 %v8075_v61  ;;  %v8082_v61 = vld [vmem:[#allocation64_spill] sm:$0xff] }
 0x6c2   : > { %4788 = vmatpush1.bf16.msra.mxu0 %v8076_v10  ;;  %4820 = vmatpush1.bf16.msra.mxu1 %v8077_v19 }
 0x6c3   : > { %4822 = vmatprep.subr.bf16.mxu0 %v8078_v51  ;;  %4886 = vmatprep.subr.bf16.mxu1 %v8079_v60 }
 0x738   : > { %v2732_v55 = vpop.f32.mrb[2].mxu0  ;;  %v2803_v49 = vpop.f32.mrb[2].mxu1 }
 0x739   : > { %v5249_v34 = vadd.f32 %v2732_v55, %v8080_v30  ;;  %v2734_v24 = vpop.f32.mrb[3].mxu0  ;;  %v2805_v4 = vpop.f32.mrb[3].mxu1  ;;  %v5251_v54 = vadd.f32 %v2803_v49, %v8082_v61 }
 0x73a   : > { %v5250_v8 = vadd.f32 %v2734_v24, %v8081_v28  ;;  %v5252_v19 = vadd.f32 %v2805_v4, %v7432_v42 }
 0x73b   : > { %v2812_v57 = vmul.f32 0.5, %v5249_v34 }
 0x73c   : > { %v2816_v18 = vmul.f32 0.5, %v5250_v8  ;;  %v2821_v51 = vmul.f32 0.5, %v5252_v19  ;;  %v8091_v19 = vld [vmem:[#allocation18_spill] sm:$0xff] }
 0x73d   : > { %5395 = vtanh.f32 %v2812_v57 }
 0x73e   : > { %5397 = vtanh.f32 %v2816_v18  ;;  %v8090_v18 = vld [vmem:[#allocation17_spill] sm:$0xff] }
 0x73f   : > { %5399 = vtanh.f32 %v5251_v54 }
 0x740   : > { %5401 = vtanh.f32 %v2821_v51  ;;  %v8093_v51 = vld [vmem:[#allocation20_spill] sm:$0xff] }
 0x747   : > { %v5396_v10 = vpop.eup %5395 }
 0x748   : > { %v5398_v60 = vpop.eup %5397  ;;  %v2814_v41 = vmul.f32 0.5, %v5396_v10  ;;  %v8092_v10 = vld [vmem:[#allocation19_spill] sm:$0xff] }
 0x749   : > { %v2818_v37 = vmul.f32 0.5, %v5398_v60  ;;  %v5400_v30 = vpop.eup %5399  ;;  %v8084_v60 = vld [vmem:[#allocation11_spill] sm:$0xff] }
 0x74a   : > { %v2815_v55 = vadd.f32 0.5, %v2814_v41  ;;  %v5402_v49 = vpop.eup %5401  ;;  %v8088_v41 = vld [vmem:[#allocation15_spill] sm:$0xff] }
 0x74b   : > { %v2819_v56 = vadd.f32 0.5, %v2818_v37  ;;  %v2823_v54 = vmul.f32 0.5, %v5402_v49  ;;  %v8087_v37 = vld [vmem:[#allocation14_spill] sm:$0xff]  ;;  %v8096_v49 = vld [vmem:[#allocation23_spill] sm:$0xff] }
 0x74c   : > { %v2826_v27 = vmul.f32 %v5400_v30, %v2815_v55  ;;  %v8089_v30 = vld [vmem:[#allocation16_spill] sm:$0xff]  ;;  %v8094_v55 = vld [vmem:[#allocation21_spill] sm:$0xff] }
 0x74d   : > { %v2825_v34 = vmul.f32 %v2819_v56, %v7436_v2  ;;  %v2824_v57 = vadd.f32 0.5, %v2823_v54  ;;  %v8083_v2 = vld [vmem:[#allocation10_spill] sm:$0xff]  ;;  %v8086_v56 = vld [vmem:[#allocation13_spill] sm:$0xff]  ;;  %v8097_v54 = vld [vmem:[#allocation24_spill] sm:$0xff] }
 0x74f   : > { %v7544_v24 = vadd.f32 %v2826_v27, %v2825_v34  ;;  %v8085_v27 = vld [vmem:[#allocation12_spill] sm:$0xff]  ;;  %v8095_v34 = vld [vmem:[#allocation22_spill] sm:$0xff] }
 0x751   : > { %5403 = vtanh.f32 %v7544_v24 }
 0x75b   : > { %v5404_v4 = vpop.eup %5403 }
 0x75c   : > { %v2829_v8 = vmul.f32 %v5404_v4, %v2824_v57  ;;  %v8098_v57 = vld [vmem:[#allocation25_spill] sm:$0xff]  ;;  %v8099_v4 = vld [vmem:[#allocation26_spill] sm:$0xff] }
 0x75e   : > { %3045 = vmatmul.mubr.f32.vlgmr.msra.gmra.mrb[4].mxu0 %v2829_v8  ;;  %3116 = vmatmul.mubr.f32.vlgmr.msra.gmra.mrb[4].mxu1 %v2829_v8  ;;  %v8100_v8 = vld [vmem:[#allocation27_spill] sm:$0xff] }
 0x75f   : > { %4824 = vmatpush1.bf16.msra.mxu0 %v6452_v59  ;;  %4888 = vmatpush1.bf16.msra.mxu1 %v6464_v32 }
 0x760   : > { %4826 = vmatprep.subr.bf16.mxu0 %v6477_v11  ;;  %4890 = vmatprep.subr.bf16.mxu1 %v6479_v26 }
 0x763   : > { %4828 = vmatpush1.bf16.msra.mxu0 %v6491_v9  ;;  %4892 = vmatpush1.bf16.msra.mxu1 %v6504_v63 }
 0x764   : > { %4830 = vmatprep.subr.bf16.mxu0 %v6506_v6  ;;  %4894 = vmatprep.subr.bf16.mxu1 %v6517_v33 }
 0x767   : > { %4832 = vmatpush1.bf16.msra.mxu0 %v6529_v14  ;;  %4896 = vmatpush1.bf16.msra.mxu1 %v6542_v21 }
 0x768   : > { %4834 = vmatprep.subr.bf16.mxu0 %v6544_v29  ;;  %4898 = vmatprep.subr.bf16.mxu1 %v6556_v3 }
 0x76b   : > { %4836 = vmatpush1.bf16.msra.mxu0 %v6577_v5  ;;  %4900 = vmatpush1.bf16.msra.mxu1 %v6581_v62 }
 0x76c   : > { %4838 = vmatprep.subr.bf16.mxu0 %v6583_v40  ;;  %4902 = vmatprep.subr.bf16.mxu1 %v6595_v1 }
 0x76f   : > { %4840 = vmatpush1.bf16.msra.mxu0 %v6613_v13  ;;  %4904 = vmatpush1.bf16.msra.mxu1 %v6617_v58 }
 0x770   : > { %4842 = vmatprep.subr.bf16.mxu0 %v6619_v17  ;;  %4906 = vmatprep.subr.bf16.mxu1 %v6631_v38 }
 0x773   : > { %4844 = vmatpush1.bf16.msra.mxu0 %v6649_v31  ;;  %4908 = vmatpush1.bf16.msra.mxu1 %v6653_v46 }
 0x774   : > { %4846 = vmatprep.subr.bf16.mxu0 %v6655_v16  ;;  %4910 = vmatprep.subr.bf16.mxu1 %v6667_v52 }
 0x777   : > { %4848 = vmatpush1.bf16.msra.mxu0 %v6685_v45  ;;  %4912 = vmatpush1.bf16.msra.mxu1 %v6689_v7 }
 0x778   : > { %4850 = vmatprep.subr.bf16.mxu0 %v6691_v20  ;;  %4914 = vmatprep.subr.bf16.mxu1 %v6703_v35 }
 0x77b   : > { %4852 = vmatpush1.bf16.msra.mxu0 %v6721_v22  ;;  %4916 = vmatpush1.bf16.msra.mxu1 %v6725_v15 }
 0x77c   : > { %4854 = vmatprep.subr.bf16.mxu0 %v6727_v36  ;;  %4918 = vmatprep.subr.bf16.mxu1 %v6742_v53 }
 0x77f   : > { %4856 = vmatpush1.bf16.msra.mxu0 %v6760_v23  ;;  %4920 = vmatpush1.bf16.msra.mxu1 %v6764_v12 }
 0x780   : > { %4858 = vmatprep.subr.bf16.mxu0 %v6766_v48  ;;  %4922 = vmatprep.subr.bf16.mxu1 %v6779_v25 }
 0x783   : > { %4860 = vmatpush1.bf16.msra.mxu0 %v6797_v0  ;;  %4924 = vmatpush1.bf16.msra.mxu1 %v6803_v43 }
 0x784   : > { %4862 = vmatprep.subr.bf16.mxu0 %v6805_v47  ;;  %4926 = vmatprep.subr.bf16.mxu1 %v6817_v39 }
 0x787   : > { %4864 = vmatpush1.bf16.msra.mxu0 %v6835_v44  ;;  %4928 = vmatpush1.bf16.msra.mxu1 %v8028_v50 }
 0x788   : > { %4866 = vmatprep.subr.bf16.mxu0 %v8083_v2  ;;  %4930 = vmatprep.subr.bf16.mxu1 %v8084_v60 }
 0x78b   : > { %4868 = vmatpush1.bf16.msra.mxu0 %v8085_v27  ;;  %4932 = vmatpush1.bf16.msra.mxu1 %v8086_v56 }
 0x78c   : > { %4870 = vmatprep.subr.bf16.mxu0 %v8087_v37  ;;  %4934 = vmatprep.subr.bf16.mxu1 %v8088_v41 }
 0x78f   : > { %4872 = vmatpush1.bf16.msra.mxu0 %v8089_v30  ;;  %4936 = vmatpush1.bf16.msra.mxu1 %v8090_v18  ;;  %v8119_v18 = vld [vmem:[#allocation45_spill] sm:$0xff]  ;;  %v8138_v30 = vld [vmem:[#allocation62_spill] sm:$0xff] }
 0x790   : > { %4874 = vmatprep.subr.bf16.mxu0 %v8091_v19  ;;  %4938 = vmatprep.subr.bf16.mxu1 %v8092_v10  ;;  %v8101_v19 = vld [vmem:[#allocation28_spill] sm:$0xff]  ;;  %v8102_v10 = vld [vmem:[#allocation29_spill] sm:$0xff] }
 0x793   : > { %4876 = vmatpush1.bf16.msra.mxu0 %v8093_v51  ;;  %4940 = vmatpush1.bf16.msra.mxu1 %v8094_v55  ;;  %v8103_v51 = vld [vmem:[#allocation30_spill] sm:$0xff]  ;;  %v8104_v55 = vld [vmem:[#allocation31_spill] sm:$0xff] }
 0x794   : > { %4878 = vmatprep.subr.bf16.mxu0 %v8095_v34  ;;  %4942 = vmatprep.subr.bf16.mxu1 %v8096_v49  ;;  %v3151_v49 = vld [vmem:[%s3150_s12] sm:$0xff]  ;;  %v8113_v34 = vld [vmem:[#allocation39_spill] sm:$0xff] }
 0x795   : > { %3216 = vmatprep.mubr.f32.mxu0 %v3151_v49  ;;  %3287 = vmatprep.mubr.f32.mxu1 %v3151_v49  ;;  %v8112_v49 = vld [vmem:[#allocation38_spill] sm:$0xff] }
 0x797   : > { %4880 = vmatpush1.bf16.msra.mxu0 %v8097_v54  ;;  %4944 = vmatpush1.bf16.msra.mxu1 %v8098_v57  ;;  %v3918_v54 = vld [vmem:[%s7053_s2 + $0x18] sm:$0xff] }
 0x798   : > { %4882 = vmatprep.subr.bf16.mxu0 %v8099_v4  ;;  %4946 = vmatprep.subr.bf16.mxu1 %v8100_v8  ;;  %v8105_v4 = vld [vmem:[#allocation32_spill] sm:$0xff]  ;;  %v8106_v8 = vld [vmem:[#allocation33_spill] sm:$0xff] }
 0x799   : > { %v8111_v57 = vld [vmem:[#allocation37_spill] sm:$0xff] }
 0x79b   : > { %4884 = vmatpush1.bf16.msra.mxu0 %v8101_v19  ;;  %4948 = vmatpush1.bf16.msra.mxu1 %v8102_v10  ;;  %v8107_v19 = vld [vmem:[#allocation34_spill] sm:$0xff]  ;;  %v8108_v10 = vld [vmem:[#allocation35_spill] sm:$0xff] }
 0x79c   : > { %4950 = vmatprep.subr.bf16.mxu0 %v8103_v51  ;;  %4982 = vmatprep.subr.bf16.mxu1 %v8104_v55  ;;  %v8109_v51 = vmov 0.0   ;;  %v8110_v55 = vld [vmem:[#allocation36_spill] sm:$0xff] }
 0x79e   : > { %3217 = vmatmul.mubr.f32.vlgmr.msra.gmra.mrb[6].mxu0 %v3918_v54  ;;  %3288 = vmatmul.mubr.f32.vlgmr.msra.gmra.mrb[6].mxu1 %v3918_v54  ;;  %v8114_v54 = vld [vmem:[#allocation40_spill] sm:$0xff] }
 0x79f   : > { %4952 = vmatpush1.bf16.msra.mxu0 %v8105_v4  ;;  %4984 = vmatpush1.bf16.msra.mxu1 %v8106_v8  ;;  %v8115_v4 = vld [vmem:[#allocation41_spill] sm:$0xff]  ;;  %v8116_v8 = vld [vmem:[#allocation42_spill] sm:$0xff] }
 0x7a0   : > { %4954 = vmatprep.subr.bf16.mxu0 %v8107_v19  ;;  %4986 = vmatprep.subr.bf16.mxu1 %v8108_v10  ;;  %v8117_v19 = vld [vmem:[#allocation43_spill] sm:$0xff]  ;;  %v8118_v10 = vld [vmem:[#allocation44_spill] sm:$0xff] }
 0x7a1   : > { %3358 = vmatprep.mubr.f32.mxu0 %v8109_v51  ;;  %3429 = vmatprep.mubr.f32.mxu1 %v8109_v51  ;;  %v8120_v51 = vld [vmem:[#allocation46_spill] sm:$0xff] }
 0x7a3   : > { %4956 = vmatpush1.bf16.msra.mxu0 %v8110_v55  ;;  %4988 = vmatpush1.bf16.msra.mxu1 %v8111_v57  ;;  %v8121_v55 = vld [vmem:[#allocation47_spill] sm:$0xff]  ;;  %v8122_v57 = vld [vmem:[#allocation48_spill] sm:$0xff] }
 0x7a4   : > { %4958 = vmatprep.subr.bf16.mxu0 %v8112_v49  ;;  %4990 = vmatprep.subr.bf16.mxu1 %v8113_v34  ;;  %v8123_v49 = vld [vmem:[#allocation49_spill] sm:$0xff]  ;;  %v8124_v34 = vld [vmem:[#allocation50_spill] sm:$0xff] }
 0x7a7   : > { %4960 = vmatpush1.bf16.msra.mxu0 %v8114_v54  ;;  %4992 = vmatpush1.bf16.msra.mxu1 %v8115_v4  ;;  %v8125_v54 = vld [vmem:[#allocation51_spill] sm:$0xff]  ;;  %v8126_v4 = vld [vmem:[#allocation52_spill] sm:$0xff] }
 0x7a8   : > { %4962 = vmatprep.subr.bf16.mxu0 %v8116_v8  ;;  %4994 = vmatprep.subr.bf16.mxu1 %v8117_v19  ;;  %v8127_v8 = vld [vmem:[#allocation53_spill] sm:$0xff]  ;;  %v8128_v19 = vld [vmem:[#allocation54_spill] sm:$0xff] }
 0x7ab   : > { %4964 = vmatpush1.bf16.msra.mxu0 %v8118_v10  ;;  %4996 = vmatpush1.bf16.msra.mxu1 %v8119_v18  ;;  %v8129_v10 = vld [vmem:[#allocation55_spill] sm:$0xff]  ;;  %v8130_v18 = vld [vmem:[#allocation56_spill] sm:$0xff] }
 0x7ac   : > { %4966 = vmatprep.subr.bf16.mxu0 %v8120_v51  ;;  %4998 = vmatprep.subr.bf16.mxu1 %v8121_v55  ;;  %v8131_v51 = vld [vmem:[#allocation57_spill] sm:$0xff]  ;;  %v8132_v55 = vld [vmem:[#allocation58_spill] sm:$0xff] }
 0x7af   : > { %4968 = vmatpush1.bf16.msra.mxu0 %v8122_v57  ;;  %5000 = vmatpush1.bf16.msra.mxu1 %v8123_v49  ;;  %v8133_v57 = vld [vmem:[#allocation59_spill] sm:$0xff]  ;;  %v8134_v49 = vld [vmem:[#allocation60_spill] sm:$0xff] }
 0x7b0   : > { %4970 = vmatprep.subr.bf16.mxu0 %v8124_v34  ;;  %5002 = vmatprep.subr.bf16.mxu1 %v8125_v54  ;;  %v8135_v34 = vld [vmem:[#allocation61_spill] sm:$0xff]  ;;  %v8136_v54 = vld [vmem:[#allocation7_spill] sm:$0xff] }
 0x7b3   : > { %4972 = vmatpush1.bf16.msra.mxu0 %v8126_v4  ;;  %5004 = vmatpush1.bf16.msra.mxu1 %v8127_v8  ;;  %v8137_v4 = vld [vmem:[#allocation8_spill] sm:$0xff] }
 0x7b4   : > { %4974 = vmatprep.subr.bf16.mxu0 %v8128_v19  ;;  %5006 = vmatprep.subr.bf16.mxu1 %v8129_v10 }
 0x7b7   : > { %4976 = vmatpush1.bf16.msra.mxu0 %v8130_v18  ;;  %5008 = vmatpush1.bf16.msra.mxu1 %v8131_v51 }
 0x7b8   : > { %4978 = vmatprep.subr.bf16.mxu0 %v8132_v55  ;;  %5010 = vmatprep.subr.bf16.mxu1 %v8133_v57 }
 0x7bb   : > { %4980 = vmatpush1.bf16.msra.mxu0 %v8134_v49  ;;  %5012 = vmatpush1.bf16.msra.mxu1 %v8135_v34 }
 0x7bc   : > { %5014 = vmatprep.subr.bf16.mxu0 %v8136_v54  ;;  %5078 = vmatprep.subr.bf16.mxu1 %v8137_v4 }
 0x831   : > { %v3046_v8 = vpop.f32.mrb[4].mxu0  ;;  %v3117_v19 = vpop.f32.mrb[4].mxu1 }
 0x832   : > { %v5253_v10 = vadd.f32 %v3046_v8, %v8138_v30  ;;  %v3048_v41 = vpop.f32.mrb[5].mxu0  ;;  %v3119_v18 = vpop.f32.mrb[5].mxu1  ;;  %v5255_v57 = vadd.f32 %v3117_v19, %v8082_v61 }
 0x833   : > { %v5254_v51 = vadd.f32 %v3048_v41, %v8081_v28  ;;  %v5256_v34 = vadd.f32 %v3119_v18, %v7432_v42 }
 0x834   : > { %v3126_v37 = vmul.f32 0.5, %v5253_v10 }
 0x835   : > { %v3130_v55 = vmul.f32 0.5, %v5254_v51  ;;  %v3135_v54 = vmul.f32 0.5, %v5256_v34  ;;  %v8185_v34 = vld [vmem:[#allocation55_spill] sm:$0xff] }
 0x836   : > { %5405 = vtanh.f32 %v3126_v37 }
 0x837   : > { %5407 = vtanh.f32 %v3130_v55 }
 0x838   : > { %5409 = vtanh.f32 %v5255_v57  ;;  %v8186_v57 = vld [vmem:[#allocation56_spill] sm:$0xff] }
 0x839   : > { %5411 = vtanh.f32 %v3135_v54  ;;  %v8188_v54 = vld [vmem:[#allocation58_spill] sm:$0xff] }
 0x840   : > { %v5406_v49 = vpop.eup %5405 }
 0x841   : > { %v5408_v4 = vpop.eup %5407  ;;  %v3128_v56 = vmul.f32 0.5, %v5406_v49  ;;  %v8187_v49 = vld [vmem:[#allocation57_spill] sm:$0xff] }
 0x842   : > { %v3132_v27 = vmul.f32 0.5, %v5408_v4  ;;  %v5410_v30 = vpop.eup %5409  ;;  %v8189_v4 = vld [vmem:[#allocation59_spill] sm:$0xff] }
 0x843   : > { %v3129_v8 = vadd.f32 0.5, %v3128_v56  ;;  %v5412_v37 = vpop.eup %5411  ;;  %v8183_v56 = vld [vmem:[#allocation53_spill] sm:$0xff] }
 0x844   : > { %v3133_v60 = vadd.f32 0.5, %v3132_v27  ;;  %v3137_v19 = vmul.f32 0.5, %v5412_v37  ;;  %v8182_v27 = vld [vmem:[#allocation52_spill] sm:$0xff] }
 0x845   : > { %v3140_v2 = vmul.f32 %v5410_v30, %v3129_v8  ;;  %v8184_v30 = vld [vmem:[#allocation54_spill] sm:$0xff]  ;;  %v8190_v8 = vld [vmem:[#allocation60_spill] sm:$0xff] }
 0x846   : > { %v3139_v41 = vmul.f32 %v3133_v60, %v7544_v24  ;;  %v3138_v51 = vadd.f32 0.5, %v3137_v19  ;;  %v8179_v24 = vld [vmem:[#allocation49_spill] sm:$0xff]  ;;  %v8181_v60 = vld [vmem:[#allocation51_spill] sm:$0xff] }
 0x848   : > { %v7652_v10 = vadd.f32 %v3140_v2, %v3139_v41  ;;  %v8180_v2 = vld [vmem:[#allocation50_spill] sm:$0xff]  ;;  %v8191_v41 = vld [vmem:[#allocation61_spill] sm:$0xff] }
 0x84a   : > { %5413 = vtanh.f32 %v7652_v10 }
 0x854   : > { %v5414_v18 = vpop.eup %5413 }
 0x855   : > { %v3143_v55 = vmul.f32 %v5414_v18, %v3138_v51  ;;  %v8192_v51 = vld [vmem:[#allocation62_spill] sm:$0xff] }
 0x857   : > { %3359 = vmatmul.mubr.f32.vlgmr.msra.gmra.mrb[6].mxu0 %v3143_v55  ;;  %3430 = vmatmul.mubr.f32.vlgmr.msra.gmra.mrb[6].mxu1 %v3143_v55 }
 0x858   : > { %5016 = vmatpush1.bf16.msra.mxu0 %v6452_v59  ;;  %5080 = vmatpush1.bf16.msra.mxu1 %v6464_v32  ;;  %v8139_v59 = vld [vmem:[#allocation10_spill] sm:$0xff]  ;;  %v8140_v32 = vld [vmem:[#allocation11_spill] sm:$0xff] }
 0x859   : > { %5018 = vmatprep.subr.bf16.mxu0 %v6477_v11  ;;  %5082 = vmatprep.subr.bf16.mxu1 %v6479_v26  ;;  %v8141_v11 = vld [vmem:[#allocation12_spill] sm:$0xff]  ;;  %v8142_v26 = vld [vmem:[#allocation13_spill] sm:$0xff] }
 0x85c   : > { %5020 = vmatpush1.bf16.msra.mxu0 %v6491_v9  ;;  %5084 = vmatpush1.bf16.msra.mxu1 %v6504_v63  ;;  %v8143_v9 = vld [vmem:[#allocation14_spill] sm:$0xff]  ;;  %v8144_v63 = vld [vmem:[#allocation15_spill] sm:$0xff] }
 0x85d   : > { %5022 = vmatprep.subr.bf16.mxu0 %v6506_v6  ;;  %5086 = vmatprep.subr.bf16.mxu1 %v6517_v33  ;;  %v8145_v6 = vld [vmem:[#allocation16_spill] sm:$0xff]  ;;  %v8146_v33 = vld [vmem:[#allocation17_spill] sm:$0xff] }
 0x860   : > { %5024 = vmatpush1.bf16.msra.mxu0 %v6529_v14  ;;  %5088 = vmatpush1.bf16.msra.mxu1 %v6542_v21  ;;  %v8147_v14 = vld [vmem:[#allocation18_spill] sm:$0xff]  ;;  %v8148_v21 = vld [vmem:[#allocation19_spill] sm:$0xff] }
 0x861   : > { %5026 = vmatprep.subr.bf16.mxu0 %v6544_v29  ;;  %5090 = vmatprep.subr.bf16.mxu1 %v6556_v3  ;;  %v8149_v29 = vld [vmem:[#allocation20_spill] sm:$0xff]  ;;  %v8150_v3 = vld [vmem:[#allocation21_spill] sm:$0xff] }
 0x864   : > { %5028 = vmatpush1.bf16.msra.mxu0 %v6577_v5  ;;  %5092 = vmatpush1.bf16.msra.mxu1 %v6581_v62  ;;  %v8151_v5 = vld [vmem:[#allocation22_spill] sm:$0xff]  ;;  %v8152_v62 = vld [vmem:[#allocation23_spill] sm:$0xff] }
 0x865   : > { %5030 = vmatprep.subr.bf16.mxu0 %v6583_v40  ;;  %5094 = vmatprep.subr.bf16.mxu1 %v6595_v1  ;;  %v8153_v40 = vld [vmem:[#allocation24_spill] sm:$0xff]  ;;  %v8154_v1 = vld [vmem:[#allocation25_spill] sm:$0xff] }
 0x868   : > { %5032 = vmatpush1.bf16.msra.mxu0 %v6613_v13  ;;  %5096 = vmatpush1.bf16.msra.mxu1 %v6617_v58  ;;  %v8155_v13 = vld [vmem:[#allocation26_spill] sm:$0xff]  ;;  %v8156_v58 = vld [vmem:[#allocation27_spill] sm:$0xff] }
 0x869   : > { %5034 = vmatprep.subr.bf16.mxu0 %v6619_v17  ;;  %5098 = vmatprep.subr.bf16.mxu1 %v6631_v38  ;;  %v8157_v17 = vld [vmem:[#allocation28_spill] sm:$0xff]  ;;  %v8158_v38 = vld [vmem:[#allocation29_spill] sm:$0xff] }
 0x86c   : > { %5036 = vmatpush1.bf16.msra.mxu0 %v6649_v31  ;;  %5100 = vmatpush1.bf16.msra.mxu1 %v6653_v46  ;;  %v8159_v31 = vld [vmem:[#allocation30_spill] sm:$0xff]  ;;  %v8160_v46 = vld [vmem:[#allocation31_spill] sm:$0xff] }
 0x86d   : > { %5038 = vmatprep.subr.bf16.mxu0 %v6655_v16  ;;  %5102 = vmatprep.subr.bf16.mxu1 %v6667_v52  ;;  %v3465_v16 = vld [vmem:[%s3464_s14] sm:$0xff] }
 0x86e   : > { %3530 = vmatprep.mubr.f32.mxu0 %v3465_v16  ;;  %3601 = vmatprep.mubr.f32.mxu1 %v3465_v16  ;;  %v3921_v52 = vld [vmem:[%s7053_s2 + $0x20] sm:$0xff] }
 0x870   : > { %5040 = vmatpush1.bf16.msra.mxu0 %v6685_v45  ;;  %5104 = vmatpush1.bf16.msra.mxu1 %v6689_v7  ;;  %v8161_v45 = vld [vmem:[#allocation32_spill] sm:$0xff]  ;;  %v8162_v7 = vld [vmem:[#allocation33_spill] sm:$0xff] }
 0x871   : > { %5042 = vmatprep.subr.bf16.mxu0 %v6691_v20  ;;  %5106 = vmatprep.subr.bf16.mxu1 %v6703_v35  ;;  %v8163_v20 = vld [vmem:[#allocation34_spill] sm:$0xff]  ;;  %v8164_v35 = vld [vmem:[#allocation35_spill] sm:$0xff] }
 0x874   : > { %5044 = vmatpush1.bf16.msra.mxu0 %v6721_v22  ;;  %5108 = vmatpush1.bf16.msra.mxu1 %v6725_v15  ;;  %v8165_v22 = vmov 0.0   ;;  %v8166_v15 = vld [vmem:[#allocation36_spill] sm:$0xff] }
 0x875   : > { %5046 = vmatprep.subr.bf16.mxu0 %v6727_v36  ;;  %5110 = vmatprep.subr.bf16.mxu1 %v6742_v53  ;;  %v8167_v36 = vld [vmem:[#allocation37_spill] sm:$0xff]  ;;  %v8168_v53 = vld [vmem:[#allocation38_spill] sm:$0xff] }
 0x878   : > { %5048 = vmatpush1.bf16.msra.mxu0 %v6760_v23  ;;  %5112 = vmatpush1.bf16.msra.mxu1 %v6764_v12  ;;  %v8169_v23 = vld [vmem:[#allocation39_spill] sm:$0xff]  ;;  %v8170_v12 = vld [vmem:[#allocation40_spill] sm:$0xff] }
 0x879   : > { %5050 = vmatprep.subr.bf16.mxu0 %v6766_v48  ;;  %5114 = vmatprep.subr.bf16.mxu1 %v6779_v25  ;;  %v8171_v48 = vld [vmem:[#allocation41_spill] sm:$0xff]  ;;  %v8172_v25 = vld [vmem:[#allocation42_spill] sm:$0xff] }
 0x87c   : > { %5052 = vmatpush1.bf16.msra.mxu0 %v6797_v0  ;;  %5116 = vmatpush1.bf16.msra.mxu1 %v6803_v43  ;;  %v8173_v0 = vld [vmem:[#allocation43_spill] sm:$0xff]  ;;  %v8174_v43 = vld [vmem:[#allocation44_spill] sm:$0xff] }
 0x87d   : > { %5054 = vmatprep.subr.bf16.mxu0 %v6805_v47  ;;  %5118 = vmatprep.subr.bf16.mxu1 %v6817_v39  ;;  %v8175_v47 = vld [vmem:[#allocation45_spill] sm:$0xff]  ;;  %v8176_v39 = vld [vmem:[#allocation46_spill] sm:$0xff] }
 0x880   : > { %5056 = vmatpush1.bf16.msra.mxu0 %v6835_v44  ;;  %5120 = vmatpush1.bf16.msra.mxu1 %v8028_v50  ;;  %v8177_v44 = vld [vmem:[#allocation47_spill] sm:$0xff]  ;;  %v8178_v50 = vld [vmem:[#allocation48_spill] sm:$0xff] }
 0x881   : > { %5058 = vmatprep.subr.bf16.mxu0 %v8139_v59  ;;  %5122 = vmatprep.subr.bf16.mxu1 %v8140_v32 }
 0x884   : > { %5060 = vmatpush1.bf16.msra.mxu0 %v8141_v11  ;;  %5124 = vmatpush1.bf16.msra.mxu1 %v8142_v26 }
 0x885   : > { %5062 = vmatprep.subr.bf16.mxu0 %v8143_v9  ;;  %5126 = vmatprep.subr.bf16.mxu1 %v8144_v63 }
 0x888   : > { %5064 = vmatpush1.bf16.msra.mxu0 %v8145_v6  ;;  %5128 = vmatpush1.bf16.msra.mxu1 %v8146_v33 }
 0x889   : > { %5066 = vmatprep.subr.bf16.mxu0 %v8147_v14  ;;  %5130 = vmatprep.subr.bf16.mxu1 %v8148_v21 }
 0x88c   : > { %5068 = vmatpush1.bf16.msra.mxu0 %v8149_v29  ;;  %5132 = vmatpush1.bf16.msra.mxu1 %v8150_v3 }
 0x88d   : > { %5070 = vmatprep.subr.bf16.mxu0 %v8151_v5  ;;  %5134 = vmatprep.subr.bf16.mxu1 %v8152_v62 }
 0x890   : > { %5072 = vmatpush1.bf16.msra.mxu0 %v8153_v40  ;;  %5136 = vmatpush1.bf16.msra.mxu1 %v8154_v1 }
 0x891   : > { %5074 = vmatprep.subr.bf16.mxu0 %v8155_v13  ;;  %5138 = vmatprep.subr.bf16.mxu1 %v8156_v58 }
 0x894   : > { %5076 = vmatpush1.bf16.msra.mxu0 %v8157_v17  ;;  %5140 = vmatpush1.bf16.msra.mxu1 %v8158_v38 }
 0x895   : > { %5142 = vmatprep.subr.bf16.mxu0 %v8159_v31  ;;  %5174 = vmatprep.subr.bf16.mxu1 %v8160_v46 }
 0x897   : > { %3531 = vmatmul.mubr.f32.vlgmr.msra.gmra.mrb[8].mxu0 %v3921_v52  ;;  %3602 = vmatmul.mubr.f32.vlgmr.msra.gmra.mrb[8].mxu1 %v3921_v52 }
 0x898   : > { %5144 = vmatpush1.bf16.msra.mxu0 %v8161_v45  ;;  %5176 = vmatpush1.bf16.msra.mxu1 %v8162_v7 }
 0x899   : > { %5146 = vmatprep.subr.bf16.mxu0 %v8163_v20  ;;  %5178 = vmatprep.subr.bf16.mxu1 %v8164_v35 }
 0x89a   : > { %3672 = vmatprep.mubr.f32.mxu0 %v8165_v22  ;;  %3743 = vmatprep.mubr.f32.mxu1 %v8165_v22 }
 0x89c   : > { %5148 = vmatpush1.bf16.msra.mxu0 %v8166_v15  ;;  %5180 = vmatpush1.bf16.msra.mxu1 %v8167_v36 }
 0x89d   : > { %5150 = vmatprep.subr.bf16.mxu0 %v8168_v53  ;;  %5182 = vmatprep.subr.bf16.mxu1 %v8169_v23 }
 0x8a0   : > { %5152 = vmatpush1.bf16.msra.mxu0 %v8170_v12  ;;  %5184 = vmatpush1.bf16.msra.mxu1 %v8171_v48 }
 0x8a1   : > { %5154 = vmatprep.subr.bf16.mxu0 %v8172_v25  ;;  %5186 = vmatprep.subr.bf16.mxu1 %v8173_v0 }
 0x8a4   : > { %5156 = vmatpush1.bf16.msra.mxu0 %v8174_v43  ;;  %5188 = vmatpush1.bf16.msra.mxu1 %v8175_v47 }
 0x8a5   : > { %5158 = vmatprep.subr.bf16.mxu0 %v8176_v39  ;;  %5190 = vmatprep.subr.bf16.mxu1 %v8177_v44 }
 0x8a8   : > { %5160 = vmatpush1.bf16.msra.mxu0 %v8178_v50  ;;  %5192 = vmatpush1.bf16.msra.mxu1 %v8179_v24 }
 0x8a9   : > { %5162 = vmatprep.subr.bf16.mxu0 %v8180_v2  ;;  %5194 = vmatprep.subr.bf16.mxu1 %v8181_v60 }
 0x8ac   : > { %5164 = vmatpush1.bf16.msra.mxu0 %v8182_v27  ;;  %5196 = vmatpush1.bf16.msra.mxu1 %v8183_v56  ;;  %v3924_v27 = vld [vmem:[#allocation3] ss:$0 sm:$0xff] (%p1983_p1) }
 0x8ad   : > { %5166 = vmatprep.subr.bf16.mxu0 %v8184_v30  ;;  %5198 = vmatprep.subr.bf16.mxu1 %v8185_v34 }
 0x8b0   : > { %5168 = vmatpush1.bf16.msra.mxu0 %v8186_v57  ;;  %5200 = vmatpush1.bf16.msra.mxu1 %v8187_v49 }
 0x8b1   : > { %5170 = vmatprep.subr.bf16.mxu0 %v8188_v54  ;;  %5202 = vmatprep.subr.bf16.mxu1 %v8189_v4 }
 0x8b4   : > { %5172 = vmatpush1.bf16.msra.mxu0 %v8190_v8  ;;  %5204 = vmatpush1.bf16.msra.mxu1 %v8191_v41 }
 0x92a   : > { %v3360_v37 = vpop.f32.mrb[6].mxu0  ;;  %v3431_v19 = vpop.f32.mrb[6].mxu1 }
 0x92b   : > { %v5257_v18 = vadd.f32 %v3360_v37, %v8192_v51  ;;  %v3362_v55 = vpop.f32.mrb[7].mxu0  ;;  %v3433_v59 = vpop.f32.mrb[7].mxu1  ;;  %v5259_v9 = vadd.f32 %v3431_v19, %v8082_v61 }
 0x92c   : > { %v5258_v32 = vadd.f32 %v3362_v55, %v8081_v28  ;;  %v5260_v63 = vadd.f32 %v3433_v59, %v7432_v42 }
 0x92d   : > { %v3440_v11 = vmul.f32 0.5, %v5257_v18 }
 0x92e   : > { %v3444_v26 = vmul.f32 0.5, %v5258_v32  ;;  %v3449_v6 = vmul.f32 0.5, %v5260_v63 }
 0x92f   : > { %5415 = vtanh.f32 %v3440_v11 }
 0x930   : > { %5417 = vtanh.f32 %v3444_v26 }
 0x931   : > { %5419 = vtanh.f32 %v5259_v9 }
 0x932   : > { %5421 = vtanh.f32 %v3449_v6 }
 0x939   : > { %v5416_v33 = vpop.eup %5415 }
 0x93a   : > { %v5418_v14 = vpop.eup %5417  ;;  %v3442_v21 = vmul.f32 0.5, %v5416_v33 }
 0x93b   : > { %v3446_v29 = vmul.f32 0.5, %v5418_v14  ;;  %v5420_v5 = vpop.eup %5419 }
 0x93c   : > { %v3443_v3 = vadd.f32 0.5, %v3442_v21  ;;  %v5422_v58 = vpop.eup %5421 }
 0x93d   : > { %v3447_v62 = vadd.f32 0.5, %v3446_v29  ;;  %v3451_v17 = vmul.f32 0.5, %v5422_v58 }
 0x93e   : > { %v3454_v40 = vmul.f32 %v5420_v5, %v3443_v3 }
 0x93f   : > { %v3453_v1 = vmul.f32 %v3447_v62, %v7652_v10  ;;  %v3452_v38 = vadd.f32 0.5, %v3451_v17 }
 0x941   : > { %v3455_v13 = vadd.f32 %v3454_v40, %v3453_v1 }
 0x943   : > { %5423 = vtanh.f32 %v3455_v13 }
 0x94d   : > { %v5424_v31 = vpop.eup %5423 }
 0x94e   : > { %v3457_v46 = vmul.f32 %v5424_v31, %v3452_v38 }
 0x950   : > { %3673 = vmatmul.mubr.f32.vlgmr.msra.gmra.mrb[8].mxu0 %v3457_v46  ;;  %3744 = vmatmul.mubr.f32.vlgmr.msra.gmra.mrb[8].mxu1 %v3457_v46 }
 0xa23   : > { %v3674_v16 = vpop.f32.mrb[8].mxu0  ;;  %v3745_v52 = vpop.f32.mrb[8].mxu1 }
 0xa24   : > { %v5261_v45 = vadd.f32 %v3674_v16, %v8192_v51  ;;  %v3676_v7 = vpop.f32.mrb[9].mxu0  ;;  %v3747_v20 = vpop.f32.mrb[9].mxu1  ;;  %v5263_v10 = vadd.f32 %v3745_v52, %v8082_v61 }
 0xa25   : > { %v5262_v35 = vadd.f32 %v3676_v7, %v8081_v28  ;;  %v5264_v36 = vadd.f32 %v3747_v20, %v7432_v42  ;;  %v3923_v42 = vld [vmem:[%s7782_s7] ss:$0 sm:$0xff] (%p1983_p1) }
 0xa26   : > { %v3754_v22 = vmul.f32 0.5, %v5261_v45 }
 0xa27   : > { %v3758_v15 = vmul.f32 0.5, %v5262_v35  ;;  %v3763_v53 = vmul.f32 0.5, %v5264_v36 }
 0xa28   : > { %5425 = vtanh.f32 %v3754_v22 }
 0xa29   : > { %5427 = vtanh.f32 %v3758_v15 }
 0xa2a   : > { %5429 = vtanh.f32 %v5263_v10 }
 0xa2b   : > { %5431 = vtanh.f32 %v3763_v53 }
 0xa32   : > { %v5426_v23 = vpop.eup %5425 }
 0xa33   : > { %v5428_v12 = vpop.eup %5427  ;;  %v3756_v48 = vmul.f32 0.5, %v5426_v23 }
 0xa34   : > { %v3760_v25 = vmul.f32 0.5, %v5428_v12  ;;  %v5430_v43 = vpop.eup %5429 }
 0xa35   : > { %v3757_v0 = vadd.f32 0.5, %v3756_v48  ;;  %v5432_v44 = vpop.eup %5431 }
 0xa36   : > { %v3761_v47 = vadd.f32 0.5, %v3760_v25  ;;  %v3765_v50 = vmul.f32 0.5, %v5432_v44 }
 0xa37   : > { %v3768_v39 = vmul.f32 %v5430_v43, %v3757_v0 }
 0xa38   : > { %v3767_v28 = vmul.f32 %v3761_v47, %v3455_v13  ;;  %v3766_v61 = vadd.f32 0.5, %v3765_v50 }
 0xa3a   : > { %v3769_v51 = vadd.f32 %v3768_v39, %v3767_v28  }
 0xa3c   : > { %5433 = vtanh.f32 %v3769_v51 }
 0xa43   :  { %1985 = sbr.rel (!%p1983_p1) target bundleno = 1288 (0x508), region = 101 }
 0xa46   : > { %v5434_v24 = vpop.eup %5433 }
 0xa47   : > { %v3771_v2 = vmul.f32 %v5434_v24, %v3766_v61  }
 0xa49   : > { %v8193_v10 = vmov %v3771_v2  ;;  %v3779_v60 = vmul.f32 (%p1983_p1), %v3923_v42, %v3771_v2 }
 0xa4b   :  { %3780 = vadd.xlane.f32.xlu0 %v3779_v60 }
 0xad8   :  { %v3781_v56 = vpop.xlane.xlu0 %3780 }
 0xad9   :  { %v3789_v30 = vadd.f32 %v3924_v27, %v3781_v56 }
 0xadb   :  { %3791 = vst.msk [vmem:[%s7784_s9] sm:$0xff] %vm3790_vm1, %v3789_v30 }

</bundles_post_ra>
